<compile_context>
chip_gen: v5e
topology: v5e:2x2
jax: 0.10.0
libtpu: 0.0.40
codegen_flags: <defaults>
</compile_context>

<pallas_src>
import jax
import jax.numpy as jnp
from jax import lax
from jax.experimental import pallas as pl
from jax.experimental.pallas import tpu as pltpu

NEG_SLOPE = 0.01        # F.leaky_relu default
LANE = 128              # lane-dense output width
STATIC_TIME_LOOP_MAX_T = 64   # full static unroll of the time loop up to here


def _leaky_relu(x):
    return jnp.where(x > 0, x, NEG_SLOPE * x)


def model_lstm_kernel(x_ref, w1t_ref, b1_ref, wih_t_ref, whh_t_ref, blstm_ref,
                      w2t_ref, b2_ref, out_ref, seq_buf, gates_buf):
    # x_ref:     (T, D_in)        f32   concatenated [sim, real, actions]
    # w1t_ref:   (D_in, H)        bf16  linear1 weight, transposed
    # b1_ref:    (1, H)           f32
    # wih_t_ref: (L, H, 4H)       bf16  LSTM input weights, transposed
    # whh_t_ref: (L, H, 4H)       bf16  LSTM recurrent weights, transposed
    # blstm_ref: (L, 1, 4H)       f32   b_ih + b_hh, gate order [i, f, o, g]
    # w2t_ref:   (H, LANE)        bf16  linear2 weight, transposed, zero-padded
    # b2_ref:    (1, LANE)        f32   zero-padded
    # out_ref:   (T, LANE)        f32   lane-dense padded output
    # seq_buf:   (T, H)   bf16|f32 scratch: current layer input/output sequence
    # gates_buf: (T, 4H)  f32      scratch: precomputed input-projection gates
    T, H = seq_buf.shape
    L = wih_t_ref.shape[0]
    static_time_loop = T <= STATIC_TIME_LOOP_MAX_T

    # ---- linear1 + leaky_relu ----------------------------------------------
    h1 = jnp.dot(x_ref[...].astype(jnp.bfloat16), w1t_ref[...],
                 preferred_element_type=jnp.float32) + b1_ref[...]
    seq_buf[...] = _leaky_relu(h1).astype(seq_buf.dtype)

    # ---- stacked LSTM layers (static Python loop; L is small) --------------
    for layer in range(L):
        w_ih_t = wih_t_ref[layer]            # (H, 4H) bf16, static index
        w_hh_t = whh_t_ref[layer]            # (H, 4H) bf16
        b = blstm_ref[layer]                 # (1, 4H) f32

        # Input projection for the whole sequence in one MXU matmul.
        gates_buf[...] = jnp.dot(seq_buf[...].astype(jnp.bfloat16), w_ih_t,
                                 preferred_element_type=jnp.float32) + b

        def cell(t, h, c, w_hh_t=w_hh_t):
            # h, c: (1, H) f32 — gate/cell math kept in f32.
            g = gates_buf[pl.ds(t, 1), :] + jnp.dot(
                h.astype(jnp.bfloat16), w_hh_t,
                preferred_element_type=jnp.float32)
            # Gate columns permuted to [i, f, o, g] in the wrapper:
            # one sigmoid over a contiguous 3H slice, one tanh over H.
            sig = jax.nn.sigmoid(g[:, 0:3 * H])
            i_g = sig[:, 0:H]
            f_g = sig[:, H:2 * H]
            o_g = sig[:, 2 * H:3 * H]
            g_g = jnp.tanh(g[:, 3 * H:4 * H])
            c_new = f_g * c + i_g * g_g
            h_new = o_g * jnp.tanh(c_new)
            seq_buf[pl.ds(t, 1), :] = h_new.astype(seq_buf.dtype)
            return h_new, c_new

        h = jnp.zeros((1, H), jnp.float32)   # init_hidden(): zeros
        c = jnp.zeros((1, H), jnp.float32)
        if static_time_loop:
            # Static indices -> clean packed bf16 stores, full unroll.
            for t in range(T):
                h, c = cell(t, h, c)
        else:
            # Guarded partial unroll for long sequences (f32 seq_buf).
            def body(t, carry):
                return cell(t, carry[0], carry[1])
            lax.fori_loop(0, T, body, (h, c), unroll=8)

    # ---- leaky_relu + linear2 (lane-dense output) ---------------------------
    y = _leaky_relu(seq_buf[...].astype(jnp.float32))
    out_ref[...] = jnp.dot(y.astype(jnp.bfloat16), w2t_ref[...],
                           preferred_element_type=jnp.float32) + b2_ref[...]


def _reorder_gates(a, axis):
    """Permute LSTM gate blocks from PyTorch's [i, f, g, o] to [i, f, o, g]."""
    i, f, g, o = jnp.split(a, 4, axis=axis)
    return jnp.concatenate([i, f, o, g], axis=axis)


def model_lstm_forward(params, data_in):
    """data_in = (state_sim, state_real, actions), each (1, T, feat)."""
    sim, real, act = data_in
    x = jnp.concatenate([sim, real, act], axis=2)         # (1, T, D_in)
    assert x.shape[0] == 1, "module hidden state implies batch == 1"
    # TODO(synk): if batch > 1 ever appears, add a leading 'parallel' grid axis
    # over batch so v7x's second TensorCore is used.
    x2d = x[0].astype(jnp.float32)                        # (T, D_in)
    T, d_in = x2d.shape

    nodes = params["w1"].shape[0]
    layers = params["w_ih"].shape[0]
    n_out = params["w2"].shape[0]

    static_time_loop = T <= STATIC_TIME_LOOP_MAX_T
    seq_dtype = jnp.bfloat16 if static_time_loop else jnp.float32

    # glue: permute gate columns, transpose / reshape / cast parameters
    w1t = params["w1"].T.astype(jnp.bfloat16)             # (D_in, H)
    b1 = params["b1"].reshape(1, nodes).astype(jnp.float32)
    wih_t = jnp.transpose(_reorder_gates(params["w_ih"], 1),
                          (0, 2, 1)).astype(jnp.bfloat16)  # (L, H, 4H)
    whh_t = jnp.transpose(_reorder_gates(params["w_hh"], 1),
                          (0, 2, 1)).astype(jnp.bfloat16)  # (L, H, 4H)
    blstm = _reorder_gates(params["b_ih"] + params["b_hh"], 1)
    blstm = blstm.reshape(layers, 1, 4 * nodes).astype(jnp.float32)
    # lane-dense output: pad linear2 to LANE columns, slice back outside
    w2t = jnp.zeros((nodes, LANE), jnp.bfloat16).at[:, :n_out].set(
        params["w2"].T.astype(jnp.bfloat16))
    b2 = jnp.zeros((1, LANE), jnp.float32).at[:, :n_out].set(
        params["b2"].reshape(1, n_out).astype(jnp.float32))

    grid_spec = pltpu.PrefetchScalarGridSpec(
        num_scalar_prefetch=0,
        grid=(1,),   # single step: all weights resident in VMEM (~1 MB total)
        in_specs=[
            pl.BlockSpec((T, d_in), lambda i: (0, 0)),                      # x
            pl.BlockSpec((d_in, nodes), lambda i: (0, 0)),                  # w1t
            pl.BlockSpec((1, nodes), lambda i: (0, 0)),                     # b1
            pl.BlockSpec((layers, nodes, 4 * nodes), lambda i: (0, 0, 0)),  # wih_t
            pl.BlockSpec((layers, nodes, 4 * nodes), lambda i: (0, 0, 0)),  # whh_t
            pl.BlockSpec((layers, 1, 4 * nodes), lambda i: (0, 0, 0)),      # blstm
            pl.BlockSpec((nodes, LANE), lambda i: (0, 0)),                  # w2t
            pl.BlockSpec((1, LANE), lambda i: (0, 0)),                      # b2
        ],
        out_specs=pl.BlockSpec((T, LANE), lambda i: (0, 0)),
        scratch_shapes=[
            pltpu.VMEM((T, nodes), seq_dtype),          # seq_buf
            pltpu.VMEM((T, 4 * nodes), jnp.float32),    # gates_buf
        ],
    )
    out_pad = pl.pallas_call(
        model_lstm_kernel,
        out_shape=jax.ShapeDtypeStruct((T, LANE), jnp.float32),
        grid_spec=grid_spec,
        compiler_params=pltpu.CompilerParams(
            dimension_semantics=("arbitrary",)),
    )(x2d, w1t, b1, wih_t, whh_t, blstm, w2t, b2)
    return out_pad[None, :, :n_out]                       # (1, T, D_out)


# ---------------- pure-JAX reference (for correctness check) ----------------
def reference_forward(params, data_in):
    sim, real, act = data_in
    x = jnp.concatenate([sim, real, act], axis=2)[0].astype(jnp.float32)
    H = params["w1"].shape[0]
    T = x.shape[0]
    seq = _leaky_relu(x @ params["w1"].T + params["b1"])
    for l in range(params["w_ih"].shape[0]):
        wih, whh = params["w_ih"][l], params["w_hh"][l]
        b = params["b_ih"][l] + params["b_hh"][l]
        h = jnp.zeros((H,), jnp.float32)
        c = jnp.zeros((H,), jnp.float32)
        outs = []
        for t in range(T):
            g = seq[t] @ wih.T + h @ whh.T + b
            i_g = jax.nn.sigmoid(g[0:H])
            f_g = jax.nn.sigmoid(g[H:2 * H])
            g_g = jnp.tanh(g[2 * H:3 * H])
            o_g = jax.nn.sigmoid(g[3 * H:4 * H])
            c = f_g * c + i_g * g_g
            h = o_g * jnp.tanh(c)
            outs.append(h)
        seq = jnp.stack(outs)
    y = _leaky_relu(seq)
    return (y @ params["w2"].T + params["b2"])[None]


def make_params(key, n_sim, n_real, n_act, nodes, layers):
    d_in = n_sim + n_real + n_act
    ks = jax.random.split(key, 4 + 4 * layers)
    s = 0.1
    params = {
        "w1": jax.random.normal(ks[0], (nodes, d_in), jnp.float32) * s,
        "b1": jax.random.normal(ks[1], (nodes,), jnp.float32) * s,
        "w2": jax.random.normal(ks[2], (n_real, nodes), jnp.float32) * s,
        "b2": jax.random.normal(ks[3], (n_real,), jnp.float32) * s,
    }
    w_ih, w_hh, b_ih, b_hh = [], [], [], []
    for l in range(layers):
        base = 4 + 4 * l
        w_ih.append(jax.random.normal(ks[base + 0], (4 * nodes, nodes), jnp.float32) * s)
        w_hh.append(jax.random.normal(ks[base + 1], (4 * nodes, nodes), jnp.float32) * s)
        b_ih.append(jax.random.normal(ks[base + 2], (4 * nodes,), jnp.float32) * s)
        b_hh.append(jax.random.normal(ks[base + 3], (4 * nodes,), jnp.float32) * s)
    params["w_ih"] = jnp.stack(w_ih)
    params["w_hh"] = jnp.stack(w_hh)
    params["b_ih"] = jnp.stack(b_ih)
    params["b_hh"] = jnp.stack(b_hh)
    return params


if __name__ == "__main__":
    # Small shapes consistent with the module: batch=1 (hidden is (L,1,H)),
    # seq=8, state_sim=12, state_real=12, actions=6; nodes=128, layers=2.
    n_sim, n_real, n_act = 12, 12, 6
    nodes, layers, T = 128, 2, 8

    key = jax.random.PRNGKey(0)
    kp, k1, k2, k3 = jax.random.split(key, 4)
    params = make_params(kp, n_sim, n_real, n_act, nodes, layers)

    state_sim = jax.random.normal(k1, (1, T, n_sim), jnp.float32)
    state_real = jax.random.normal(k2, (1, T, n_real), jnp.float32)
    actions = jax.random.normal(k3, (1, T, n_act), jnp.float32)
    data_in = (state_sim, state_real, actions)

    out = model_lstm_forward(params, data_in)
    out = jax.block_until_ready(out)

    ref = jax.block_until_ready(reference_forward(params, data_in))
    assert out.shape == (1, T, n_real), out.shape
    assert jnp.allclose(out, ref, rtol=2e-2, atol=2e-2), float(
        jnp.max(jnp.abs(out - ref)))

    print("KERNEL_OK")
</pallas_src>

<mosaic_0001>
module attributes {stable_mosaic.version = 11 : i64} {
  func.func @model_lstm_kernel(%arg0: i32, %arg1: memref<8x30xf32, #tpu.memory_space<vmem>>, %arg2: memref<30x128xbf16, #tpu.memory_space<vmem>>, %arg3: memref<1x128xf32, #tpu.memory_space<vmem>>, %arg4: memref<2x128x512xbf16, #tpu.memory_space<vmem>>, %arg5: memref<2x128x512xbf16, #tpu.memory_space<vmem>>, %arg6: memref<2x1x512xf32, #tpu.memory_space<vmem>>, %arg7: memref<128x128xbf16, #tpu.memory_space<vmem>>, %arg8: memref<1x128xf32, #tpu.memory_space<vmem>>, %arg9: memref<8x128xf32, #tpu.memory_space<vmem>>, %arg10: memref<8x128xbf16, #tpu.memory_space<vmem>>, %arg11: memref<8x512xf32, #tpu.memory_space<vmem>>) attributes {dimension_semantics = [#tpu.dimension_semantics<arbitrary>], iteration_bounds = array<i64: 1>, scalar_prefetch = 0 : i64, scratch_operands = 2 : i64, tpu.core_type = #tpu.core_type<tc>, window_params = [{pipeline_mode = #tpu.pipeline_mode<synchronous>, transform_indices = @transform_0, window_bounds = array<i64: 8, 30>}, {pipeline_mode = #tpu.pipeline_mode<synchronous>, transform_indices = @transform_1, window_bounds = array<i64: 30, 128>}, {pipeline_mode = #tpu.pipeline_mode<synchronous>, transform_indices = @transform_2, window_bounds = array<i64: 1, 128>}, {pipeline_mode = #tpu.pipeline_mode<synchronous>, transform_indices = @transform_3, window_bounds = array<i64: 2, 128, 512>}, {pipeline_mode = #tpu.pipeline_mode<synchronous>, transform_indices = @transform_4, window_bounds = array<i64: 2, 128, 512>}, {pipeline_mode = #tpu.pipeline_mode<synchronous>, transform_indices = @transform_5, window_bounds = array<i64: 2, 1, 512>}, {pipeline_mode = #tpu.pipeline_mode<synchronous>, transform_indices = @transform_6, window_bounds = array<i64: 128, 128>}, {pipeline_mode = #tpu.pipeline_mode<synchronous>, transform_indices = @transform_7, window_bounds = array<i64: 1, 128>}, {pipeline_mode = #tpu.pipeline_mode<synchronous>, transform_indices = @transform_8, window_bounds = array<i64: 8, 128>}]} {
    %c0 = arith.constant 0 : index
    %c0_0 = arith.constant 0 : index
    %0 = vector.load %arg1[%c0, %c0_0] : memref<8x30xf32, #tpu.memory_space<vmem>>, vector<8x30xf32>
    %1 = arith.truncf %0 : vector<8x30xf32> to vector<8x30xbf16>
    %c0_1 = arith.constant 0 : index
    %c0_2 = arith.constant 0 : index
    %2 = vector.load %arg2[%c0_1, %c0_2] : memref<30x128xbf16, #tpu.memory_space<vmem>>, vector<30x128xbf16>
    %cst = arith.constant dense<0.000000e+00> : vector<8x128xf32>
    %3 = tpu.matmul %1, %2, %cst {dimension_numbers = #tpu.dot_dimension_numbers<[1], [0], [0], [1], [0, 0, 1, 1], [], []>} : vector<8x30xbf16>, vector<30x128xbf16>, vector<8x128xf32> -> vector<8x128xf32>
    %c0_3 = arith.constant 0 : index
    %c0_4 = arith.constant 0 : index
    %4 = vector.load %arg3[%c0_3, %c0_4] : memref<1x128xf32, #tpu.memory_space<vmem>>, vector<1x128xf32>
    %5 = vector.broadcast %4 : vector<1x128xf32> to vector<8x128xf32>
    %6 = arith.addf %3, %5 : vector<8x128xf32>
    %cst_5 = arith.constant 0.000000e+00 : f32
    %7 = vector.broadcast %cst_5 : f32 to vector<8x128xf32>
    %8 = arith.cmpf ogt, %6, %7 : vector<8x128xf32>
    %cst_6 = arith.constant 0.00999999977 : f32
    %9 = vector.broadcast %cst_6 : f32 to vector<8x128xf32>
    %10 = arith.mulf %9, %6 : vector<8x128xf32>
    %11 = arith.select %8, %6, %10 : vector<8x128xi1>, vector<8x128xf32>
    %12 = arith.truncf %11 : vector<8x128xf32> to vector<8x128xbf16>
    %c0_7 = arith.constant 0 : index
    %c0_8 = arith.constant 0 : index
    %13 = vector.load %arg10[%c0_7, %c0_8] : memref<8x128xbf16, #tpu.memory_space<vmem>>, vector<8x128xbf16>
    tpu.vector_store %arg10[%c0_7, %c0_8], %12 {strides = array<i32>} : memref<8x128xbf16, #tpu.memory_space<vmem>>, vector<8x128xbf16>,
    %c0_9 = arith.constant 0 : index
    %c0_10 = arith.constant 0 : index
    %c0_11 = arith.constant 0 : index
    %14 = vector.load %arg4[%c0_9, %c0_10, %c0_11] : memref<2x128x512xbf16, #tpu.memory_space<vmem>>, vector<1x128x512xbf16>
    %15 = vector.shape_cast %14 : vector<1x128x512xbf16> to vector<128x512xbf16>
    %c0_12 = arith.constant 0 : index
    %c0_13 = arith.constant 0 : index
    %c0_14 = arith.constant 0 : index
    %16 = vector.load %arg5[%c0_12, %c0_13, %c0_14] : memref<2x128x512xbf16, #tpu.memory_space<vmem>>, vector<1x128x512xbf16>
    %17 = vector.shape_cast %16 : vector<1x128x512xbf16> to vector<128x512xbf16>
    %c0_15 = arith.constant 0 : index
    %c0_16 = arith.constant 0 : index
    %c0_17 = arith.constant 0 : index
    %18 = vector.load %arg6[%c0_15, %c0_16, %c0_17] : memref<2x1x512xf32, #tpu.memory_space<vmem>>, vector<1x1x512xf32>
    %19 = vector.shape_cast %18 : vector<1x1x512xf32> to vector<1x512xf32>
    %c0_18 = arith.constant 0 : index
    %c0_19 = arith.constant 0 : index
    %20 = vector.load %arg10[%c0_18, %c0_19] : memref<8x128xbf16, #tpu.memory_space<vmem>>, vector<8x128xbf16>
    %cst_20 = arith.constant dense<0.000000e+00> : vector<8x512xf32>
    %21 = tpu.matmul %20, %15, %cst_20 {dimension_numbers = #tpu.dot_dimension_numbers<[1], [0], [0], [1], [0, 0, 1, 1], [], []>} : vector<8x128xbf16>, vector<128x512xbf16>, vector<8x512xf32> -> vector<8x512xf32>
    %22 = vector.broadcast %19 : vector<1x512xf32> to vector<8x512xf32>
    %23 = arith.addf %21, %22 : vector<8x512xf32>
    %c0_21 = arith.constant 0 : index
    %c0_22 = arith.constant 0 : index
    %24 = vector.load %arg11[%c0_21, %c0_22] : memref<8x512xf32, #tpu.memory_space<vmem>>, vector<8x512xf32>
    tpu.vector_store %arg11[%c0_21, %c0_22], %23 {strides = array<i32>} : memref<8x512xf32, #tpu.memory_space<vmem>>, vector<8x512xf32>,
    %cst_23 = arith.constant 0.000000e+00 : f32
    %25 = vector.broadcast %cst_23 : f32 to vector<1x128xf32>
    %cst_24 = arith.constant 0.000000e+00 : f32
    %26 = vector.broadcast %cst_24 : f32 to vector<1x128xf32>
    %c0_25 = arith.constant 0 : index
    %c0_26 = arith.constant 0 : index
    %27 = vector.load %arg11[%c0_25, %c0_26] : memref<8x512xf32, #tpu.memory_space<vmem>>, vector<1x512xf32>
    %28 = arith.truncf %25 : vector<1x128xf32> to vector<1x128xbf16>
    %cst_27 = arith.constant dense<0.000000e+00> : vector<1x512xf32>
    %29 = tpu.matmul %28, %17, %cst_27 {dimension_numbers = #tpu.dot_dimension_numbers<[1], [0], [0], [1], [0, 0, 1, 1], [], []>} : vector<1x128xbf16>, vector<128x512xbf16>, vector<1x512xf32> -> vector<1x512xf32>
    %30 = arith.addf %27, %29 : vector<1x512xf32>
    %31 = vector.extract_strided_slice %30 {offsets = [0, 0], sizes = [1, 384], strides = [1, 1]} : vector<1x512xf32> to vector<1x384xf32>
    %32 = arith.negf %31 : vector<1x384xf32>
    %33 = math.exp %32 : vector<1x384xf32>
    %cst_28 = arith.constant 1.000000e+00 : f32
    %34 = vector.broadcast %cst_28 : f32 to vector<1x384xf32>
    %35 = arith.addf %34, %33 : vector<1x384xf32>
    %36 = arith.divf %34, %35 : vector<1x384xf32>
    %37 = vector.extract_strided_slice %36 {offsets = [0, 0], sizes = [1, 128], strides = [1, 1]} : vector<1x384xf32> to vector<1x128xf32>
    %38 = vector.extract_strided_slice %36 {offsets = [0, 128], sizes = [1, 128], strides = [1, 1]} : vector<1x384xf32> to vector<1x128xf32>
    %39 = vector.extract_strided_slice %36 {offsets = [0, 256], sizes = [1, 128], strides = [1, 1]} : vector<1x384xf32> to vector<1x128xf32>
    %40 = vector.extract_strided_slice %30 {offsets = [0, 384], sizes = [1, 128], strides = [1, 1]} : vector<1x512xf32> to vector<1x128xf32>
    %41 = math.tanh %40 : vector<1x128xf32>
    %42 = arith.mulf %38, %26 : vector<1x128xf32>
    %43 = arith.mulf %37, %41 : vector<1x128xf32>
    %44 = arith.addf %42, %43 : vector<1x128xf32>
    %45 = math.tanh %44 : vector<1x128xf32>
    %46 = arith.mulf %39, %45 : vector<1x128xf32>
    %47 = arith.truncf %46 : vector<1x128xf32> to vector<1x128xbf16>
    %c0_29 = arith.constant 0 : index
    %c0_30 = arith.constant 0 : index
    %48 = vector.load %arg10[%c0_29, %c0_30] : memref<8x128xbf16, #tpu.memory_space<vmem>>, vector<1x128xbf16>
    tpu.vector_store %arg10[%c0_29, %c0_30], %47 {strides = array<i32>} : memref<8x128xbf16, #tpu.memory_space<vmem>>, vector<1x128xbf16>,
    %c1 = arith.constant 1 : index
    %c0_31 = arith.constant 0 : index
    %49 = vector.load %arg11[%c1, %c0_31] : memref<8x512xf32, #tpu.memory_space<vmem>>, vector<1x512xf32>
    %50 = arith.truncf %46 : vector<1x128xf32> to vector<1x128xbf16>
    %cst_32 = arith.constant dense<0.000000e+00> : vector<1x512xf32>
    %51 = tpu.matmul %50, %17, %cst_32 {dimension_numbers = #tpu.dot_dimension_numbers<[1], [0], [0], [1], [0, 0, 1, 1], [], []>} : vector<1x128xbf16>, vector<128x512xbf16>, vector<1x512xf32> -> vector<1x512xf32>
    %52 = arith.addf %49, %51 : vector<1x512xf32>
    %53 = vector.extract_strided_slice %52 {offsets = [0, 0], sizes = [1, 384], strides = [1, 1]} : vector<1x512xf32> to vector<1x384xf32>
    %54 = arith.negf %53 : vector<1x384xf32>
    %55 = math.exp %54 : vector<1x384xf32>
    %cst_33 = arith.constant 1.000000e+00 : f32
    %56 = vector.broadcast %cst_33 : f32 to vector<1x384xf32>
    %57 = arith.addf %56, %55 : vector<1x384xf32>
    %58 = arith.divf %56, %57 : vector<1x384xf32>
    %59 = vector.extract_strided_slice %58 {offsets = [0, 0], sizes = [1, 128], strides = [1, 1]} : vector<1x384xf32> to vector<1x128xf32>
    %60 = vector.extract_strided_slice %58 {offsets = [0, 128], sizes = [1, 128], strides = [1, 1]} : vector<1x384xf32> to vector<1x128xf32>
    %61 = vector.extract_strided_slice %58 {offsets = [0, 256], sizes = [1, 128], strides = [1, 1]} : vector<1x384xf32> to vector<1x128xf32>
    %62 = vector.extract_strided_slice %52 {offsets = [0, 384], sizes = [1, 128], strides = [1, 1]} : vector<1x512xf32> to vector<1x128xf32>
    %63 = math.tanh %62 : vector<1x128xf32>
    %64 = arith.mulf %60, %44 : vector<1x128xf32>
    %65 = arith.mulf %59, %63 : vector<1x128xf32>
    %66 = arith.addf %64, %65 : vector<1x128xf32>
    %67 = math.tanh %66 : vector<1x128xf32>
    %68 = arith.mulf %61, %67 : vector<1x128xf32>
    %69 = arith.truncf %68 : vector<1x128xf32> to vector<1x128xbf16>
    %c1_34 = arith.constant 1 : index
    %c0_35 = arith.constant 0 : index
    %70 = vector.load %arg10[%c1_34, %c0_35] : memref<8x128xbf16, #tpu.memory_space<vmem>>, vector<1x128xbf16>
    tpu.vector_store %arg10[%c1_34, %c0_35], %69 {strides = array<i32>} : memref<8x128xbf16, #tpu.memory_space<vmem>>, vector<1x128xbf16>,
    %c2 = arith.constant 2 : index
    %c0_36 = arith.constant 0 : index
    %71 = vector.load %arg11[%c2, %c0_36] : memref<8x512xf32, #tpu.memory_space<vmem>>, vector<1x512xf32>
    %72 = arith.truncf %68 : vector<1x128xf32> to vector<1x128xbf16>
    %cst_37 = arith.constant dense<0.000000e+00> : vector<1x512xf32>
    %73 = tpu.matmul %72, %17, %cst_37 {dimension_numbers = #tpu.dot_dimension_numbers<[1], [0], [0], [1], [0, 0, 1, 1], [], []>} : vector<1x128xbf16>, vector<128x512xbf16>, vector<1x512xf32> -> vector<1x512xf32>
    %74 = arith.addf %71, %73 : vector<1x512xf32>
    %75 = vector.extract_strided_slice %74 {offsets = [0, 0], sizes = [1, 384], strides = [1, 1]} : vector<1x512xf32> to vector<1x384xf32>
    %76 = arith.negf %75 : vector<1x384xf32>
    %77 = math.exp %76 : vector<1x384xf32>
    %cst_38 = arith.constant 1.000000e+00 : f32
    %78 = vector.broadcast %cst_38 : f32 to vector<1x384xf32>
    %79 = arith.addf %78, %77 : vector<1x384xf32>
    %80 = arith.divf %78, %79 : vector<1x384xf32>
    %81 = vector.extract_strided_slice %80 {offsets = [0, 0], sizes = [1, 128], strides = [1, 1]} : vector<1x384xf32> to vector<1x128xf32>
    %82 = vector.extract_strided_slice %80 {offsets = [0, 128], sizes = [1, 128], strides = [1, 1]} : vector<1x384xf32> to vector<1x128xf32>
    %83 = vector.extract_strided_slice %80 {offsets = [0, 256], sizes = [1, 128], strides = [1, 1]} : vector<1x384xf32> to vector<1x128xf32>
    %84 = vector.extract_strided_slice %74 {offsets = [0, 384], sizes = [1, 128], strides = [1, 1]} : vector<1x512xf32> to vector<1x128xf32>
    %85 = math.tanh %84 : vector<1x128xf32>
    %86 = arith.mulf %82, %66 : vector<1x128xf32>
    %87 = arith.mulf %81, %85 : vector<1x128xf32>
    %88 = arith.addf %86, %87 : vector<1x128xf32>
    %89 = math.tanh %88 : vector<1x128xf32>
    %90 = arith.mulf %83, %89 : vector<1x128xf32>
    %91 = arith.truncf %90 : vector<1x128xf32> to vector<1x128xbf16>
    %c2_39 = arith.constant 2 : index
    %c0_40 = arith.constant 0 : index
    %92 = vector.load %arg10[%c2_39, %c0_40] : memref<8x128xbf16, #tpu.memory_space<vmem>>, vector<1x128xbf16>
    tpu.vector_store %arg10[%c2_39, %c0_40], %91 {strides = array<i32>} : memref<8x128xbf16, #tpu.memory_space<vmem>>, vector<1x128xbf16>,
    %c3 = arith.constant 3 : index
    %c0_41 = arith.constant 0 : index
    %93 = vector.load %arg11[%c3, %c0_41] : memref<8x512xf32, #tpu.memory_space<vmem>>, vector<1x512xf32>
    %94 = arith.truncf %90 : vector<1x128xf32> to vector<1x128xbf16>
    %cst_42 = arith.constant dense<0.000000e+00> : vector<1x512xf32>
    %95 = tpu.matmul %94, %17, %cst_42 {dimension_numbers = #tpu.dot_dimension_numbers<[1], [0], [0], [1], [0, 0, 1, 1], [], []>} : vector<1x128xbf16>, vector<128x512xbf16>, vector<1x512xf32> -> vector<1x512xf32>
    %96 = arith.addf %93, %95 : vector<1x512xf32>
    %97 = vector.extract_strided_slice %96 {offsets = [0, 0], sizes = [1, 384], strides = [1, 1]} : vector<1x512xf32> to vector<1x384xf32>
    %98 = arith.negf %97 : vector<1x384xf32>
    %99 = math.exp %98 : vector<1x384xf32>
    %cst_43 = arith.constant 1.000000e+00 : f32
    %100 = vector.broadcast %cst_43 : f32 to vector<1x384xf32>
    %101 = arith.addf %100, %99 : vector<1x384xf32>
    %102 = arith.divf %100, %101 : vector<1x384xf32>
    %103 = vector.extract_strided_slice %102 {offsets = [0, 0], sizes = [1, 128], strides = [1, 1]} : vector<1x384xf32> to vector<1x128xf32>
    %104 = vector.extract_strided_slice %102 {offsets = [0, 128], sizes = [1, 128], strides = [1, 1]} : vector<1x384xf32> to vector<1x128xf32>
    %105 = vector.extract_strided_slice %102 {offsets = [0, 256], sizes = [1, 128], strides = [1, 1]} : vector<1x384xf32> to vector<1x128xf32>
    %106 = vector.extract_strided_slice %96 {offsets = [0, 384], sizes = [1, 128], strides = [1, 1]} : vector<1x512xf32> to vector<1x128xf32>
    %107 = math.tanh %106 : vector<1x128xf32>
    %108 = arith.mulf %104, %88 : vector<1x128xf32>
    %109 = arith.mulf %103, %107 : vector<1x128xf32>
    %110 = arith.addf %108, %109 : vector<1x128xf32>
    %111 = math.tanh %110 : vector<1x128xf32>
    %112 = arith.mulf %105, %111 : vector<1x128xf32>
    %113 = arith.truncf %112 : vector<1x128xf32> to vector<1x128xbf16>
    %c3_44 = arith.constant 3 : index
    %c0_45 = arith.constant 0 : index
    %114 = vector.load %arg10[%c3_44, %c0_45] : memref<8x128xbf16, #tpu.memory_space<vmem>>, vector<1x128xbf16>
    tpu.vector_store %arg10[%c3_44, %c0_45], %113 {strides = array<i32>} : memref<8x128xbf16, #tpu.memory_space<vmem>>, vector<1x128xbf16>,
    %c4 = arith.constant 4 : index
    %c0_46 = arith.constant 0 : index
    %115 = vector.load %arg11[%c4, %c0_46] : memref<8x512xf32, #tpu.memory_space<vmem>>, vector<1x512xf32>
    %116 = arith.truncf %112 : vector<1x128xf32> to vector<1x128xbf16>
    %cst_47 = arith.constant dense<0.000000e+00> : vector<1x512xf32>
    %117 = tpu.matmul %116, %17, %cst_47 {dimension_numbers = #tpu.dot_dimension_numbers<[1], [0], [0], [1], [0, 0, 1, 1], [], []>} : vector<1x128xbf16>, vector<128x512xbf16>, vector<1x512xf32> -> vector<1x512xf32>
    %118 = arith.addf %115, %117 : vector<1x512xf32>
    %119 = vector.extract_strided_slice %118 {offsets = [0, 0], sizes = [1, 384], strides = [1, 1]} : vector<1x512xf32> to vector<1x384xf32>
    %120 = arith.negf %119 : vector<1x384xf32>
    %121 = math.exp %120 : vector<1x384xf32>
    %cst_48 = arith.constant 1.000000e+00 : f32
    %122 = vector.broadcast %cst_48 : f32 to vector<1x384xf32>
    %123 = arith.addf %122, %121 : vector<1x384xf32>
    %124 = arith.divf %122, %123 : vector<1x384xf32>
    %125 = vector.extract_strided_slice %124 {offsets = [0, 0], sizes = [1, 128], strides = [1, 1]} : vector<1x384xf32> to vector<1x128xf32>
    %126 = vector.extract_strided_slice %124 {offsets = [0, 128], sizes = [1, 128], strides = [1, 1]} : vector<1x384xf32> to vector<1x128xf32>
    %127 = vector.extract_strided_slice %124 {offsets = [0, 256], sizes = [1, 128], strides = [1, 1]} : vector<1x384xf32> to vector<1x128xf32>
    %128 = vector.extract_strided_slice %118 {offsets = [0, 384], sizes = [1, 128], strides = [1, 1]} : vector<1x512xf32> to vector<1x128xf32>
    %129 = math.tanh %128 : vector<1x128xf32>
    %130 = arith.mulf %126, %110 : vector<1x128xf32>
    %131 = arith.mulf %125, %129 : vector<1x128xf32>
    %132 = arith.addf %130, %131 : vector<1x128xf32>
    %133 = math.tanh %132 : vector<1x128xf32>
    %134 = arith.mulf %127, %133 : vector<1x128xf32>
    %135 = arith.truncf %134 : vector<1x128xf32> to vector<1x128xbf16>
    %c4_49 = arith.constant 4 : index
    %c0_50 = arith.constant 0 : index
    %136 = vector.load %arg10[%c4_49, %c0_50] : memref<8x128xbf16, #tpu.memory_space<vmem>>, vector<1x128xbf16>
    tpu.vector_store %arg10[%c4_49, %c0_50], %135 {strides = array<i32>} : memref<8x128xbf16, #tpu.memory_space<vmem>>, vector<1x128xbf16>,
    %c5 = arith.constant 5 : index
    %c0_51 = arith.constant 0 : index
    %137 = vector.load %arg11[%c5, %c0_51] : memref<8x512xf32, #tpu.memory_space<vmem>>, vector<1x512xf32>
    %138 = arith.truncf %134 : vector<1x128xf32> to vector<1x128xbf16>
    %cst_52 = arith.constant dense<0.000000e+00> : vector<1x512xf32>
    %139 = tpu.matmul %138, %17, %cst_52 {dimension_numbers = #tpu.dot_dimension_numbers<[1], [0], [0], [1], [0, 0, 1, 1], [], []>} : vector<1x128xbf16>, vector<128x512xbf16>, vector<1x512xf32> -> vector<1x512xf32>
    %140 = arith.addf %137, %139 : vector<1x512xf32>
    %141 = vector.extract_strided_slice %140 {offsets = [0, 0], sizes = [1, 384], strides = [1, 1]} : vector<1x512xf32> to vector<1x384xf32>
    %142 = arith.negf %141 : vector<1x384xf32>
    %143 = math.exp %142 : vector<1x384xf32>
    %cst_53 = arith.constant 1.000000e+00 : f32
    %144 = vector.broadcast %cst_53 : f32 to vector<1x384xf32>
    %145 = arith.addf %144, %143 : vector<1x384xf32>
    %146 = arith.divf %144, %145 : vector<1x384xf32>
    %147 = vector.extract_strided_slice %146 {offsets = [0, 0], sizes = [1, 128], strides = [1, 1]} : vector<1x384xf32> to vector<1x128xf32>
    %148 = vector.extract_strided_slice %146 {offsets = [0, 128], sizes = [1, 128], strides = [1, 1]} : vector<1x384xf32> to vector<1x128xf32>
    %149 = vector.extract_strided_slice %146 {offsets = [0, 256], sizes = [1, 128], strides = [1, 1]} : vector<1x384xf32> to vector<1x128xf32>
    %150 = vector.extract_strided_slice %140 {offsets = [0, 384], sizes = [1, 128], strides = [1, 1]} : vector<1x512xf32> to vector<1x128xf32>
    %151 = math.tanh %150 : vector<1x128xf32>
    %152 = arith.mulf %148, %132 : vector<1x128xf32>
    %153 = arith.mulf %147, %151 : vector<1x128xf32>
    %154 = arith.addf %152, %153 : vector<1x128xf32>
    %155 = math.tanh %154 : vector<1x128xf32>
    %156 = arith.mulf %149, %155 : vector<1x128xf32>
    %157 = arith.truncf %156 : vector<1x128xf32> to vector<1x128xbf16>
    %c5_54 = arith.constant 5 : index
    %c0_55 = arith.constant 0 : index
    %158 = vector.load %arg10[%c5_54, %c0_55] : memref<8x128xbf16, #tpu.memory_space<vmem>>, vector<1x128xbf16>
    tpu.vector_store %arg10[%c5_54, %c0_55], %157 {strides = array<i32>} : memref<8x128xbf16, #tpu.memory_space<vmem>>, vector<1x128xbf16>,
    %c6 = arith.constant 6 : index
    %c0_56 = arith.constant 0 : index
    %159 = vector.load %arg11[%c6, %c0_56] : memref<8x512xf32, #tpu.memory_space<vmem>>, vector<1x512xf32>
    %160 = arith.truncf %156 : vector<1x128xf32> to vector<1x128xbf16>
    %cst_57 = arith.constant dense<0.000000e+00> : vector<1x512xf32>
    %161 = tpu.matmul %160, %17, %cst_57 {dimension_numbers = #tpu.dot_dimension_numbers<[1], [0], [0], [1], [0, 0, 1, 1], [], []>} : vector<1x128xbf16>, vector<128x512xbf16>, vector<1x512xf32> -> vector<1x512xf32>
    %162 = arith.addf %159, %161 : vector<1x512xf32>
    %163 = vector.extract_strided_slice %162 {offsets = [0, 0], sizes = [1, 384], strides = [1, 1]} : vector<1x512xf32> to vector<1x384xf32>
    %164 = arith.negf %163 : vector<1x384xf32>
    %165 = math.exp %164 : vector<1x384xf32>
    %cst_58 = arith.constant 1.000000e+00 : f32
    %166 = vector.broadcast %cst_58 : f32 to vector<1x384xf32>
    %167 = arith.addf %166, %165 : vector<1x384xf32>
    %168 = arith.divf %166, %167 : vector<1x384xf32>
    %169 = vector.extract_strided_slice %168 {offsets = [0, 0], sizes = [1, 128], strides = [1, 1]} : vector<1x384xf32> to vector<1x128xf32>
    %170 = vector.extract_strided_slice %168 {offsets = [0, 128], sizes = [1, 128], strides = [1, 1]} : vector<1x384xf32> to vector<1x128xf32>
    %171 = vector.extract_strided_slice %168 {offsets = [0, 256], sizes = [1, 128], strides = [1, 1]} : vector<1x384xf32> to vector<1x128xf32>
    %172 = vector.extract_strided_slice %162 {offsets = [0, 384], sizes = [1, 128], strides = [1, 1]} : vector<1x512xf32> to vector<1x128xf32>
    %173 = math.tanh %172 : vector<1x128xf32>
    %174 = arith.mulf %170, %154 : vector<1x128xf32>
    %175 = arith.mulf %169, %173 : vector<1x128xf32>
    %176 = arith.addf %174, %175 : vector<1x128xf32>
    %177 = math.tanh %176 : vector<1x128xf32>
    %178 = arith.mulf %171, %177 : vector<1x128xf32>
    %179 = arith.truncf %178 : vector<1x128xf32> to vector<1x128xbf16>
    %c6_59 = arith.constant 6 : index
    %c0_60 = arith.constant 0 : index
    %180 = vector.load %arg10[%c6_59, %c0_60] : memref<8x128xbf16, #tpu.memory_space<vmem>>, vector<1x128xbf16>
    tpu.vector_store %arg10[%c6_59, %c0_60], %179 {strides = array<i32>} : memref<8x128xbf16, #tpu.memory_space<vmem>>, vector<1x128xbf16>,
    %c7 = arith.constant 7 : index
    %c0_61 = arith.constant 0 : index
    %181 = vector.load %arg11[%c7, %c0_61] : memref<8x512xf32, #tpu.memory_space<vmem>>, vector<1x512xf32>
    %182 = arith.truncf %178 : vector<1x128xf32> to vector<1x128xbf16>
    %cst_62 = arith.constant dense<0.000000e+00> : vector<1x512xf32>
    %183 = tpu.matmul %182, %17, %cst_62 {dimension_numbers = #tpu.dot_dimension_numbers<[1], [0], [0], [1], [0, 0, 1, 1], [], []>} : vector<1x128xbf16>, vector<128x512xbf16>, vector<1x512xf32> -> vector<1x512xf32>
    %184 = arith.addf %181, %183 : vector<1x512xf32>
    %185 = vector.extract_strided_slice %184 {offsets = [0, 0], sizes = [1, 384], strides = [1, 1]} : vector<1x512xf32> to vector<1x384xf32>
    %186 = arith.negf %185 : vector<1x384xf32>
    %187 = math.exp %186 : vector<1x384xf32>
    %cst_63 = arith.constant 1.000000e+00 : f32
    %188 = vector.broadcast %cst_63 : f32 to vector<1x384xf32>
    %189 = arith.addf %188, %187 : vector<1x384xf32>
    %190 = arith.divf %188, %189 : vector<1x384xf32>
    %191 = vector.extract_strided_slice %190 {offsets = [0, 0], sizes = [1, 128], strides = [1, 1]} : vector<1x384xf32> to vector<1x128xf32>
    %192 = vector.extract_strided_slice %190 {offsets = [0, 128], sizes = [1, 128], strides = [1, 1]} : vector<1x384xf32> to vector<1x128xf32>
    %193 = vector.extract_strided_slice %190 {offsets = [0, 256], sizes = [1, 128], strides = [1, 1]} : vector<1x384xf32> to vector<1x128xf32>
    %194 = vector.extract_strided_slice %184 {offsets = [0, 384], sizes = [1, 128], strides = [1, 1]} : vector<1x512xf32> to vector<1x128xf32>
    %195 = math.tanh %194 : vector<1x128xf32>
    %196 = arith.mulf %192, %176 : vector<1x128xf32>
    %197 = arith.mulf %191, %195 : vector<1x128xf32>
    %198 = arith.addf %196, %197 : vector<1x128xf32>
    %199 = math.tanh %198 : vector<1x128xf32>
    %200 = arith.mulf %193, %199 : vector<1x128xf32>
    %201 = arith.truncf %200 : vector<1x128xf32> to vector<1x128xbf16>
    %c7_64 = arith.constant 7 : index
    %c0_65 = arith.constant 0 : index
    %202 = vector.load %arg10[%c7_64, %c0_65] : memref<8x128xbf16, #tpu.memory_space<vmem>>, vector<1x128xbf16>
    tpu.vector_store %arg10[%c7_64, %c0_65], %201 {strides = array<i32>} : memref<8x128xbf16, #tpu.memory_space<vmem>>, vector<1x128xbf16>,
    %c1_66 = arith.constant 1 : index
    %c0_67 = arith.constant 0 : index
    %c0_68 = arith.constant 0 : index
    %203 = vector.load %arg4[%c1_66, %c0_67, %c0_68] : memref<2x128x512xbf16, #tpu.memory_space<vmem>>, vector<1x128x512xbf16>
    %204 = vector.shape_cast %203 : vector<1x128x512xbf16> to vector<128x512xbf16>
    %c1_69 = arith.constant 1 : index
    %c0_70 = arith.constant 0 : index
    %c0_71 = arith.constant 0 : index
    %205 = vector.load %arg5[%c1_69, %c0_70, %c0_71] : memref<2x128x512xbf16, #tpu.memory_space<vmem>>, vector<1x128x512xbf16>
    %206 = vector.shape_cast %205 : vector<1x128x512xbf16> to vector<128x512xbf16>
    %c1_72 = arith.constant 1 : index
    %c0_73 = arith.constant 0 : index
    %c0_74 = arith.constant 0 : index
    %207 = vector.load %arg6[%c1_72, %c0_73, %c0_74] : memref<2x1x512xf32, #tpu.memory_space<vmem>>, vector<1x1x512xf32>
    %208 = vector.shape_cast %207 : vector<1x1x512xf32> to vector<1x512xf32>
    %c0_75 = arith.constant 0 : index
    %c0_76 = arith.constant 0 : index
    %209 = vector.load %arg10[%c0_75, %c0_76] : memref<8x128xbf16, #tpu.memory_space<vmem>>, vector<8x128xbf16>
    %cst_77 = arith.constant dense<0.000000e+00> : vector<8x512xf32>
    %210 = tpu.matmul %209, %204, %cst_77 {dimension_numbers = #tpu.dot_dimension_numbers<[1], [0], [0], [1], [0, 0, 1, 1], [], []>} : vector<8x128xbf16>, vector<128x512xbf16>, vector<8x512xf32> -> vector<8x512xf32>
    %211 = vector.broadcast %208 : vector<1x512xf32> to vector<8x512xf32>
    %212 = arith.addf %210, %211 : vector<8x512xf32>
    %c0_78 = arith.constant 0 : index
    %c0_79 = arith.constant 0 : index
    %213 = vector.load %arg11[%c0_78, %c0_79] : memref<8x512xf32, #tpu.memory_space<vmem>>, vector<8x512xf32>
    tpu.vector_store %arg11[%c0_78, %c0_79], %212 {strides = array<i32>} : memref<8x512xf32, #tpu.memory_space<vmem>>, vector<8x512xf32>,
    %cst_80 = arith.constant 0.000000e+00 : f32
    %214 = vector.broadcast %cst_80 : f32 to vector<1x128xf32>
    %cst_81 = arith.constant 0.000000e+00 : f32
    %215 = vector.broadcast %cst_81 : f32 to vector<1x128xf32>
    %c0_82 = arith.constant 0 : index
    %c0_83 = arith.constant 0 : index
    %216 = vector.load %arg11[%c0_82, %c0_83] : memref<8x512xf32, #tpu.memory_space<vmem>>, vector<1x512xf32>
    %217 = arith.truncf %214 : vector<1x128xf32> to vector<1x128xbf16>
    %cst_84 = arith.constant dense<0.000000e+00> : vector<1x512xf32>
    %218 = tpu.matmul %217, %206, %cst_84 {dimension_numbers = #tpu.dot_dimension_numbers<[1], [0], [0], [1], [0, 0, 1, 1], [], []>} : vector<1x128xbf16>, vector<128x512xbf16>, vector<1x512xf32> -> vector<1x512xf32>
    %219 = arith.addf %216, %218 : vector<1x512xf32>
    %220 = vector.extract_strided_slice %219 {offsets = [0, 0], sizes = [1, 384], strides = [1, 1]} : vector<1x512xf32> to vector<1x384xf32>
    %221 = arith.negf %220 : vector<1x384xf32>
    %222 = math.exp %221 : vector<1x384xf32>
    %cst_85 = arith.constant 1.000000e+00 : f32
    %223 = vector.broadcast %cst_85 : f32 to vector<1x384xf32>
    %224 = arith.addf %223, %222 : vector<1x384xf32>
    %225 = arith.divf %223, %224 : vector<1x384xf32>
    %226 = vector.extract_strided_slice %225 {offsets = [0, 0], sizes = [1, 128], strides = [1, 1]} : vector<1x384xf32> to vector<1x128xf32>
    %227 = vector.extract_strided_slice %225 {offsets = [0, 128], sizes = [1, 128], strides = [1, 1]} : vector<1x384xf32> to vector<1x128xf32>
    %228 = vector.extract_strided_slice %225 {offsets = [0, 256], sizes = [1, 128], strides = [1, 1]} : vector<1x384xf32> to vector<1x128xf32>
    %229 = vector.extract_strided_slice %219 {offsets = [0, 384], sizes = [1, 128], strides = [1, 1]} : vector<1x512xf32> to vector<1x128xf32>
    %230 = math.tanh %229 : vector<1x128xf32>
    %231 = arith.mulf %227, %215 : vector<1x128xf32>
    %232 = arith.mulf %226, %230 : vector<1x128xf32>
    %233 = arith.addf %231, %232 : vector<1x128xf32>
    %234 = math.tanh %233 : vector<1x128xf32>
    %235 = arith.mulf %228, %234 : vector<1x128xf32>
    %236 = arith.truncf %235 : vector<1x128xf32> to vector<1x128xbf16>
    %c0_86 = arith.constant 0 : index
    %c0_87 = arith.constant 0 : index
    %237 = vector.load %arg10[%c0_86, %c0_87] : memref<8x128xbf16, #tpu.memory_space<vmem>>, vector<1x128xbf16>
    tpu.vector_store %arg10[%c0_86, %c0_87], %236 {strides = array<i32>} : memref<8x128xbf16, #tpu.memory_space<vmem>>, vector<1x128xbf16>,
    %c1_88 = arith.constant 1 : index
    %c0_89 = arith.constant 0 : index
    %238 = vector.load %arg11[%c1_88, %c0_89] : memref<8x512xf32, #tpu.memory_space<vmem>>, vector<1x512xf32>
    %239 = arith.truncf %235 : vector<1x128xf32> to vector<1x128xbf16>
    %cst_90 = arith.constant dense<0.000000e+00> : vector<1x512xf32>
    %240 = tpu.matmul %239, %206, %cst_90 {dimension_numbers = #tpu.dot_dimension_numbers<[1], [0], [0], [1], [0, 0, 1, 1], [], []>} : vector<1x128xbf16>, vector<128x512xbf16>, vector<1x512xf32> -> vector<1x512xf32>
    %241 = arith.addf %238, %240 : vector<1x512xf32>
    %242 = vector.extract_strided_slice %241 {offsets = [0, 0], sizes = [1, 384], strides = [1, 1]} : vector<1x512xf32> to vector<1x384xf32>
    %243 = arith.negf %242 : vector<1x384xf32>
    %244 = math.exp %243 : vector<1x384xf32>
    %cst_91 = arith.constant 1.000000e+00 : f32
    %245 = vector.broadcast %cst_91 : f32 to vector<1x384xf32>
    %246 = arith.addf %245, %244 : vector<1x384xf32>
    %247 = arith.divf %245, %246 : vector<1x384xf32>
    %248 = vector.extract_strided_slice %247 {offsets = [0, 0], sizes = [1, 128], strides = [1, 1]} : vector<1x384xf32> to vector<1x128xf32>
    %249 = vector.extract_strided_slice %247 {offsets = [0, 128], sizes = [1, 128], strides = [1, 1]} : vector<1x384xf32> to vector<1x128xf32>
    %250 = vector.extract_strided_slice %247 {offsets = [0, 256], sizes = [1, 128], strides = [1, 1]} : vector<1x384xf32> to vector<1x128xf32>
    %251 = vector.extract_strided_slice %241 {offsets = [0, 384], sizes = [1, 128], strides = [1, 1]} : vector<1x512xf32> to vector<1x128xf32>
    %252 = math.tanh %251 : vector<1x128xf32>
    %253 = arith.mulf %249, %233 : vector<1x128xf32>
    %254 = arith.mulf %248, %252 : vector<1x128xf32>
    %255 = arith.addf %253, %254 : vector<1x128xf32>
    %256 = math.tanh %255 : vector<1x128xf32>
    %257 = arith.mulf %250, %256 : vector<1x128xf32>
    %258 = arith.truncf %257 : vector<1x128xf32> to vector<1x128xbf16>
    %c1_92 = arith.constant 1 : index
    %c0_93 = arith.constant 0 : index
    %259 = vector.load %arg10[%c1_92, %c0_93] : memref<8x128xbf16, #tpu.memory_space<vmem>>, vector<1x128xbf16>
    tpu.vector_store %arg10[%c1_92, %c0_93], %258 {strides = array<i32>} : memref<8x128xbf16, #tpu.memory_space<vmem>>, vector<1x128xbf16>,
    %c2_94 = arith.constant 2 : index
    %c0_95 = arith.constant 0 : index
    %260 = vector.load %arg11[%c2_94, %c0_95] : memref<8x512xf32, #tpu.memory_space<vmem>>, vector<1x512xf32>
    %261 = arith.truncf %257 : vector<1x128xf32> to vector<1x128xbf16>
    %cst_96 = arith.constant dense<0.000000e+00> : vector<1x512xf32>
    %262 = tpu.matmul %261, %206, %cst_96 {dimension_numbers = #tpu.dot_dimension_numbers<[1], [0], [0], [1], [0, 0, 1, 1], [], []>} : vector<1x128xbf16>, vector<128x512xbf16>, vector<1x512xf32> -> vector<1x512xf32>
    %263 = arith.addf %260, %262 : vector<1x512xf32>
    %264 = vector.extract_strided_slice %263 {offsets = [0, 0], sizes = [1, 384], strides = [1, 1]} : vector<1x512xf32> to vector<1x384xf32>
    %265 = arith.negf %264 : vector<1x384xf32>
    %266 = math.exp %265 : vector<1x384xf32>
    %cst_97 = arith.constant 1.000000e+00 : f32
    %267 = vector.broadcast %cst_97 : f32 to vector<1x384xf32>
    %268 = arith.addf %267, %266 : vector<1x384xf32>
    %269 = arith.divf %267, %268 : vector<1x384xf32>
    %270 = vector.extract_strided_slice %269 {offsets = [0, 0], sizes = [1, 128], strides = [1, 1]} : vector<1x384xf32> to vector<1x128xf32>
    %271 = vector.extract_strided_slice %269 {offsets = [0, 128], sizes = [1, 128], strides = [1, 1]} : vector<1x384xf32> to vector<1x128xf32>
    %272 = vector.extract_strided_slice %269 {offsets = [0, 256], sizes = [1, 128], strides = [1, 1]} : vector<1x384xf32> to vector<1x128xf32>
    %273 = vector.extract_strided_slice %263 {offsets = [0, 384], sizes = [1, 128], strides = [1, 1]} : vector<1x512xf32> to vector<1x128xf32>
    %274 = math.tanh %273 : vector<1x128xf32>
    %275 = arith.mulf %271, %255 : vector<1x128xf32>
    %276 = arith.mulf %270, %274 : vector<1x128xf32>
    %277 = arith.addf %275, %276 : vector<1x128xf32>
    %278 = math.tanh %277 : vector<1x128xf32>
    %279 = arith.mulf %272, %278 : vector<1x128xf32>
    %280 = arith.truncf %279 : vector<1x128xf32> to vector<1x128xbf16>
    %c2_98 = arith.constant 2 : index
    %c0_99 = arith.constant 0 : index
    %281 = vector.load %arg10[%c2_98, %c0_99] : memref<8x128xbf16, #tpu.memory_space<vmem>>, vector<1x128xbf16>
    tpu.vector_store %arg10[%c2_98, %c0_99], %280 {strides = array<i32>} : memref<8x128xbf16, #tpu.memory_space<vmem>>, vector<1x128xbf16>,
    %c3_100 = arith.constant 3 : index
    %c0_101 = arith.constant 0 : index
    %282 = vector.load %arg11[%c3_100, %c0_101] : memref<8x512xf32, #tpu.memory_space<vmem>>, vector<1x512xf32>
    %283 = arith.truncf %279 : vector<1x128xf32> to vector<1x128xbf16>
    %cst_102 = arith.constant dense<0.000000e+00> : vector<1x512xf32>
    %284 = tpu.matmul %283, %206, %cst_102 {dimension_numbers = #tpu.dot_dimension_numbers<[1], [0], [0], [1], [0, 0, 1, 1], [], []>} : vector<1x128xbf16>, vector<128x512xbf16>, vector<1x512xf32> -> vector<1x512xf32>
    %285 = arith.addf %282, %284 : vector<1x512xf32>
    %286 = vector.extract_strided_slice %285 {offsets = [0, 0], sizes = [1, 384], strides = [1, 1]} : vector<1x512xf32> to vector<1x384xf32>
    %287 = arith.negf %286 : vector<1x384xf32>
    %288 = math.exp %287 : vector<1x384xf32>
    %cst_103 = arith.constant 1.000000e+00 : f32
    %289 = vector.broadcast %cst_103 : f32 to vector<1x384xf32>
    %290 = arith.addf %289, %288 : vector<1x384xf32>
    %291 = arith.divf %289, %290 : vector<1x384xf32>
    %292 = vector.extract_strided_slice %291 {offsets = [0, 0], sizes = [1, 128], strides = [1, 1]} : vector<1x384xf32> to vector<1x128xf32>
    %293 = vector.extract_strided_slice %291 {offsets = [0, 128], sizes = [1, 128], strides = [1, 1]} : vector<1x384xf32> to vector<1x128xf32>
    %294 = vector.extract_strided_slice %291 {offsets = [0, 256], sizes = [1, 128], strides = [1, 1]} : vector<1x384xf32> to vector<1x128xf32>
    %295 = vector.extract_strided_slice %285 {offsets = [0, 384], sizes = [1, 128], strides = [1, 1]} : vector<1x512xf32> to vector<1x128xf32>
    %296 = math.tanh %295 : vector<1x128xf32>
    %297 = arith.mulf %293, %277 : vector<1x128xf32>
    %298 = arith.mulf %292, %296 : vector<1x128xf32>
    %299 = arith.addf %297, %298 : vector<1x128xf32>
    %300 = math.tanh %299 : vector<1x128xf32>
    %301 = arith.mulf %294, %300 : vector<1x128xf32>
    %302 = arith.truncf %301 : vector<1x128xf32> to vector<1x128xbf16>
    %c3_104 = arith.constant 3 : index
    %c0_105 = arith.constant 0 : index
    %303 = vector.load %arg10[%c3_104, %c0_105] : memref<8x128xbf16, #tpu.memory_space<vmem>>, vector<1x128xbf16>
    tpu.vector_store %arg10[%c3_104, %c0_105], %302 {strides = array<i32>} : memref<8x128xbf16, #tpu.memory_space<vmem>>, vector<1x128xbf16>,
    %c4_106 = arith.constant 4 : index
    %c0_107 = arith.constant 0 : index
    %304 = vector.load %arg11[%c4_106, %c0_107] : memref<8x512xf32, #tpu.memory_space<vmem>>, vector<1x512xf32>
    %305 = arith.truncf %301 : vector<1x128xf32> to vector<1x128xbf16>
    %cst_108 = arith.constant dense<0.000000e+00> : vector<1x512xf32>
    %306 = tpu.matmul %305, %206, %cst_108 {dimension_numbers = #tpu.dot_dimension_numbers<[1], [0], [0], [1], [0, 0, 1, 1], [], []>} : vector<1x128xbf16>, vector<128x512xbf16>, vector<1x512xf32> -> vector<1x512xf32>
    %307 = arith.addf %304, %306 : vector<1x512xf32>
    %308 = vector.extract_strided_slice %307 {offsets = [0, 0], sizes = [1, 384], strides = [1, 1]} : vector<1x512xf32> to vector<1x384xf32>
    %309 = arith.negf %308 : vector<1x384xf32>
    %310 = math.exp %309 : vector<1x384xf32>
    %cst_109 = arith.constant 1.000000e+00 : f32
    %311 = vector.broadcast %cst_109 : f32 to vector<1x384xf32>
    %312 = arith.addf %311, %310 : vector<1x384xf32>
    %313 = arith.divf %311, %312 : vector<1x384xf32>
    %314 = vector.extract_strided_slice %313 {offsets = [0, 0], sizes = [1, 128], strides = [1, 1]} : vector<1x384xf32> to vector<1x128xf32>
    %315 = vector.extract_strided_slice %313 {offsets = [0, 128], sizes = [1, 128], strides = [1, 1]} : vector<1x384xf32> to vector<1x128xf32>
    %316 = vector.extract_strided_slice %313 {offsets = [0, 256], sizes = [1, 128], strides = [1, 1]} : vector<1x384xf32> to vector<1x128xf32>
    %317 = vector.extract_strided_slice %307 {offsets = [0, 384], sizes = [1, 128], strides = [1, 1]} : vector<1x512xf32> to vector<1x128xf32>
    %318 = math.tanh %317 : vector<1x128xf32>
    %319 = arith.mulf %315, %299 : vector<1x128xf32>
    %320 = arith.mulf %314, %318 : vector<1x128xf32>
    %321 = arith.addf %319, %320 : vector<1x128xf32>
    %322 = math.tanh %321 : vector<1x128xf32>
    %323 = arith.mulf %316, %322 : vector<1x128xf32>
    %324 = arith.truncf %323 : vector<1x128xf32> to vector<1x128xbf16>
    %c4_110 = arith.constant 4 : index
    %c0_111 = arith.constant 0 : index
    %325 = vector.load %arg10[%c4_110, %c0_111] : memref<8x128xbf16, #tpu.memory_space<vmem>>, vector<1x128xbf16>
    tpu.vector_store %arg10[%c4_110, %c0_111], %324 {strides = array<i32>} : memref<8x128xbf16, #tpu.memory_space<vmem>>, vector<1x128xbf16>,
    %c5_112 = arith.constant 5 : index
    %c0_113 = arith.constant 0 : index
    %326 = vector.load %arg11[%c5_112, %c0_113] : memref<8x512xf32, #tpu.memory_space<vmem>>, vector<1x512xf32>
    %327 = arith.truncf %323 : vector<1x128xf32> to vector<1x128xbf16>
    %cst_114 = arith.constant dense<0.000000e+00> : vector<1x512xf32>
    %328 = tpu.matmul %327, %206, %cst_114 {dimension_numbers = #tpu.dot_dimension_numbers<[1], [0], [0], [1], [0, 0, 1, 1], [], []>} : vector<1x128xbf16>, vector<128x512xbf16>, vector<1x512xf32> -> vector<1x512xf32>
    %329 = arith.addf %326, %328 : vector<1x512xf32>
    %330 = vector.extract_strided_slice %329 {offsets = [0, 0], sizes = [1, 384], strides = [1, 1]} : vector<1x512xf32> to vector<1x384xf32>
    %331 = arith.negf %330 : vector<1x384xf32>
    %332 = math.exp %331 : vector<1x384xf32>
    %cst_115 = arith.constant 1.000000e+00 : f32
    %333 = vector.broadcast %cst_115 : f32 to vector<1x384xf32>
    %334 = arith.addf %333, %332 : vector<1x384xf32>
    %335 = arith.divf %333, %334 : vector<1x384xf32>
    %336 = vector.extract_strided_slice %335 {offsets = [0, 0], sizes = [1, 128], strides = [1, 1]} : vector<1x384xf32> to vector<1x128xf32>
    %337 = vector.extract_strided_slice %335 {offsets = [0, 128], sizes = [1, 128], strides = [1, 1]} : vector<1x384xf32> to vector<1x128xf32>
    %338 = vector.extract_strided_slice %335 {offsets = [0, 256], sizes = [1, 128], strides = [1, 1]} : vector<1x384xf32> to vector<1x128xf32>
    %339 = vector.extract_strided_slice %329 {offsets = [0, 384], sizes = [1, 128], strides = [1, 1]} : vector<1x512xf32> to vector<1x128xf32>
    %340 = math.tanh %339 : vector<1x128xf32>
    %341 = arith.mulf %337, %321 : vector<1x128xf32>
    %342 = arith.mulf %336, %340 : vector<1x128xf32>
    %343 = arith.addf %341, %342 : vector<1x128xf32>
    %344 = math.tanh %343 : vector<1x128xf32>
    %345 = arith.mulf %338, %344 : vector<1x128xf32>
    %346 = arith.truncf %345 : vector<1x128xf32> to vector<1x128xbf16>
    %c5_116 = arith.constant 5 : index
    %c0_117 = arith.constant 0 : index
    %347 = vector.load %arg10[%c5_116, %c0_117] : memref<8x128xbf16, #tpu.memory_space<vmem>>, vector<1x128xbf16>
    tpu.vector_store %arg10[%c5_116, %c0_117], %346 {strides = array<i32>} : memref<8x128xbf16, #tpu.memory_space<vmem>>, vector<1x128xbf16>,
    %c6_118 = arith.constant 6 : index
    %c0_119 = arith.constant 0 : index
    %348 = vector.load %arg11[%c6_118, %c0_119] : memref<8x512xf32, #tpu.memory_space<vmem>>, vector<1x512xf32>
    %349 = arith.truncf %345 : vector<1x128xf32> to vector<1x128xbf16>
    %cst_120 = arith.constant dense<0.000000e+00> : vector<1x512xf32>
    %350 = tpu.matmul %349, %206, %cst_120 {dimension_numbers = #tpu.dot_dimension_numbers<[1], [0], [0], [1], [0, 0, 1, 1], [], []>} : vector<1x128xbf16>, vector<128x512xbf16>, vector<1x512xf32> -> vector<1x512xf32>
    %351 = arith.addf %348, %350 : vector<1x512xf32>
    %352 = vector.extract_strided_slice %351 {offsets = [0, 0], sizes = [1, 384], strides = [1, 1]} : vector<1x512xf32> to vector<1x384xf32>
    %353 = arith.negf %352 : vector<1x384xf32>
    %354 = math.exp %353 : vector<1x384xf32>
    %cst_121 = arith.constant 1.000000e+00 : f32
    %355 = vector.broadcast %cst_121 : f32 to vector<1x384xf32>
    %356 = arith.addf %355, %354 : vector<1x384xf32>
    %357 = arith.divf %355, %356 : vector<1x384xf32>
    %358 = vector.extract_strided_slice %357 {offsets = [0, 0], sizes = [1, 128], strides = [1, 1]} : vector<1x384xf32> to vector<1x128xf32>
    %359 = vector.extract_strided_slice %357 {offsets = [0, 128], sizes = [1, 128], strides = [1, 1]} : vector<1x384xf32> to vector<1x128xf32>
    %360 = vector.extract_strided_slice %357 {offsets = [0, 256], sizes = [1, 128], strides = [1, 1]} : vector<1x384xf32> to vector<1x128xf32>
    %361 = vector.extract_strided_slice %351 {offsets = [0, 384], sizes = [1, 128], strides = [1, 1]} : vector<1x512xf32> to vector<1x128xf32>
    %362 = math.tanh %361 : vector<1x128xf32>
    %363 = arith.mulf %359, %343 : vector<1x128xf32>
    %364 = arith.mulf %358, %362 : vector<1x128xf32>
    %365 = arith.addf %363, %364 : vector<1x128xf32>
    %366 = math.tanh %365 : vector<1x128xf32>
    %367 = arith.mulf %360, %366 : vector<1x128xf32>
    %368 = arith.truncf %367 : vector<1x128xf32> to vector<1x128xbf16>
    %c6_122 = arith.constant 6 : index
    %c0_123 = arith.constant 0 : index
    %369 = vector.load %arg10[%c6_122, %c0_123] : memref<8x128xbf16, #tpu.memory_space<vmem>>, vector<1x128xbf16>
    tpu.vector_store %arg10[%c6_122, %c0_123], %368 {strides = array<i32>} : memref<8x128xbf16, #tpu.memory_space<vmem>>, vector<1x128xbf16>,
    %c7_124 = arith.constant 7 : index
    %c0_125 = arith.constant 0 : index
    %370 = vector.load %arg11[%c7_124, %c0_125] : memref<8x512xf32, #tpu.memory_space<vmem>>, vector<1x512xf32>
    %371 = arith.truncf %367 : vector<1x128xf32> to vector<1x128xbf16>
    %cst_126 = arith.constant dense<0.000000e+00> : vector<1x512xf32>
    %372 = tpu.matmul %371, %206, %cst_126 {dimension_numbers = #tpu.dot_dimension_numbers<[1], [0], [0], [1], [0, 0, 1, 1], [], []>} : vector<1x128xbf16>, vector<128x512xbf16>, vector<1x512xf32> -> vector<1x512xf32>
    %373 = arith.addf %370, %372 : vector<1x512xf32>
    %374 = vector.extract_strided_slice %373 {offsets = [0, 0], sizes = [1, 384], strides = [1, 1]} : vector<1x512xf32> to vector<1x384xf32>
    %375 = arith.negf %374 : vector<1x384xf32>
    %376 = math.exp %375 : vector<1x384xf32>
    %cst_127 = arith.constant 1.000000e+00 : f32
    %377 = vector.broadcast %cst_127 : f32 to vector<1x384xf32>
    %378 = arith.addf %377, %376 : vector<1x384xf32>
    %379 = arith.divf %377, %378 : vector<1x384xf32>
    %380 = vector.extract_strided_slice %379 {offsets = [0, 0], sizes = [1, 128], strides = [1, 1]} : vector<1x384xf32> to vector<1x128xf32>
    %381 = vector.extract_strided_slice %379 {offsets = [0, 128], sizes = [1, 128], strides = [1, 1]} : vector<1x384xf32> to vector<1x128xf32>
    %382 = vector.extract_strided_slice %379 {offsets = [0, 256], sizes = [1, 128], strides = [1, 1]} : vector<1x384xf32> to vector<1x128xf32>
    %383 = vector.extract_strided_slice %373 {offsets = [0, 384], sizes = [1, 128], strides = [1, 1]} : vector<1x512xf32> to vector<1x128xf32>
    %384 = math.tanh %383 : vector<1x128xf32>
    %385 = arith.mulf %381, %365 : vector<1x128xf32>
    %386 = arith.mulf %380, %384 : vector<1x128xf32>
    %387 = arith.addf %385, %386 : vector<1x128xf32>
    %388 = math.tanh %387 : vector<1x128xf32>
    %389 = arith.mulf %382, %388 : vector<1x128xf32>
    %390 = arith.truncf %389 : vector<1x128xf32> to vector<1x128xbf16>
    %c7_128 = arith.constant 7 : index
    %c0_129 = arith.constant 0 : index
    %391 = vector.load %arg10[%c7_128, %c0_129] : memref<8x128xbf16, #tpu.memory_space<vmem>>, vector<1x128xbf16>
    tpu.vector_store %arg10[%c7_128, %c0_129], %390 {strides = array<i32>} : memref<8x128xbf16, #tpu.memory_space<vmem>>, vector<1x128xbf16>,
    %c0_130 = arith.constant 0 : index
    %c0_131 = arith.constant 0 : index
    %392 = vector.load %arg10[%c0_130, %c0_131] : memref<8x128xbf16, #tpu.memory_space<vmem>>, vector<8x128xbf16>
    %393 = arith.extf %392 : vector<8x128xbf16> to vector<8x128xf32>
    %cst_132 = arith.constant 0.000000e+00 : f32
    %394 = vector.broadcast %cst_132 : f32 to vector<8x128xf32>
    %395 = arith.cmpf ogt, %393, %394 : vector<8x128xf32>
    %cst_133 = arith.constant 0.00999999977 : f32
    %396 = vector.broadcast %cst_133 : f32 to vector<8x128xf32>
    %397 = arith.mulf %396, %393 : vector<8x128xf32>
    %398 = arith.select %395, %393, %397 : vector<8x128xi1>, vector<8x128xf32>
    %399 = arith.truncf %398 : vector<8x128xf32> to vector<8x128xbf16>
    %c0_134 = arith.constant 0 : index
    %c0_135 = arith.constant 0 : index
    %400 = vector.load %arg7[%c0_134, %c0_135] : memref<128x128xbf16, #tpu.memory_space<vmem>>, vector<128x128xbf16>
    %cst_136 = arith.constant dense<0.000000e+00> : vector<8x128xf32>
    %401 = tpu.matmul %399, %400, %cst_136 {dimension_numbers = #tpu.dot_dimension_numbers<[1], [0], [0], [1], [0, 0, 1, 1], [], []>} : vector<8x128xbf16>, vector<128x128xbf16>, vector<8x128xf32> -> vector<8x128xf32>
    %c0_137 = arith.constant 0 : index
    %c0_138 = arith.constant 0 : index
    %402 = vector.load %arg8[%c0_137, %c0_138] : memref<1x128xf32, #tpu.memory_space<vmem>>, vector<1x128xf32>
    %403 = vector.broadcast %402 : vector<1x128xf32> to vector<8x128xf32>
    %404 = arith.addf %401, %403 : vector<8x128xf32>
    %c0_139 = arith.constant 0 : index
    %c0_140 = arith.constant 0 : index
    %405 = vector.load %arg9[%c0_139, %c0_140] : memref<8x128xf32, #tpu.memory_space<vmem>>, vector<8x128xf32>
    tpu.vector_store %arg9[%c0_139, %c0_140], %404 {strides = array<i32>} : memref<8x128xf32, #tpu.memory_space<vmem>>, vector<8x128xf32>,
    return
  }
  func.func @transform_0(%arg0: i32) -> (i32, i32) {
    %c0_i32 = arith.constant 0 : i32
    %c0_i32_0 = arith.constant 0 : i32
    %c0_i32_1 = arith.constant 0 : i32
    return %c0_i32, %c0_i32_0 : i32, i32
  }
  func.func @transform_1(%arg0: i32) -> (i32, i32) {
    %c0_i32 = arith.constant 0 : i32
    %c0_i32_0 = arith.constant 0 : i32
    %c0_i32_1 = arith.constant 0 : i32
    return %c0_i32, %c0_i32_0 : i32, i32
  }
  func.func @transform_2(%arg0: i32) -> (i32, i32) {
    %c0_i32 = arith.constant 0 : i32
    %c0_i32_0 = arith.constant 0 : i32
    %c0_i32_1 = arith.constant 0 : i32
    return %c0_i32, %c0_i32_0 : i32, i32
  }
  func.func @transform_3(%arg0: i32) -> (i32, i32, i32) {
    %c0_i32 = arith.constant 0 : i32
    %c0_i32_0 = arith.constant 0 : i32
    %c0_i32_1 = arith.constant 0 : i32
    %c0_i32_2 = arith.constant 0 : i32
    return %c0_i32, %c0_i32_0, %c0_i32_1 : i32, i32, i32
  }
  func.func @transform_4(%arg0: i32) -> (i32, i32, i32) {
    %c0_i32 = arith.constant 0 : i32
    %c0_i32_0 = arith.constant 0 : i32
    %c0_i32_1 = arith.constant 0 : i32
    %c0_i32_2 = arith.constant 0 : i32
    return %c0_i32, %c0_i32_0, %c0_i32_1 : i32, i32, i32
  }
  func.func @transform_5(%arg0: i32) -> (i32, i32, i32) {
    %c0_i32 = arith.constant 0 : i32
    %c0_i32_0 = arith.constant 0 : i32
    %c0_i32_1 = arith.constant 0 : i32
    %c0_i32_2 = arith.constant 0 : i32
    return %c0_i32, %c0_i32_0, %c0_i32_1 : i32, i32, i32
  }
  func.func @transform_6(%arg0: i32) -> (i32, i32) {
    %c0_i32 = arith.constant 0 : i32
    %c0_i32_0 = arith.constant 0 : i32
    %c0_i32_1 = arith.constant 0 : i32
    return %c0_i32, %c0_i32_0 : i32, i32
  }
  func.func @transform_7(%arg0: i32) -> (i32, i32) {
    %c0_i32 = arith.constant 0 : i32
    %c0_i32_0 = arith.constant 0 : i32
    %c0_i32_1 = arith.constant 0 : i32
    return %c0_i32, %c0_i32_0 : i32, i32
  }
  func.func @transform_8(%arg0: i32) -> (i32, i32) {
    %c0_i32 = arith.constant 0 : i32
    %c0_i32_0 = arith.constant 0 : i32
    %c0_i32_1 = arith.constant 0 : i32
    return %c0_i32, %c0_i32_0 : i32, i32
  }
}

</mosaic_0001>

<bundles_post_ra>
// kernel: tpu_custom_call.1
= control target key start
LH: loop header
LB: loop body
LE: loop exit
PB: predicated region body
PF: predicated region fallthrough
CT: control target
= control target key end

     0   :  { %13 = vsyncpa [#allocation5], 0  ;;  %s4855_s0 = inlined_call_operand.hbm [shape: f32[8,30], index: 0, kind: input, shape index: {}]   ;;  %s4856_s1 = inlined_call_operand.hbm [shape: bf16[30,128], index: 1, kind: input, shape index: {}]   ;;  %s4857_s2 = inlined_call_operand.vmem [shape: f32[1,128], index: 2, kind: input, shape index: {}]   ;;  %s4858_s3 = inlined_call_operand.hbm [shape: bf16[2,128,512], index: 3, kind: input, shape index: {}]   ;;  %s4859_s4 = inlined_call_operand.hbm [shape: bf16[2,128,512], index: 4, kind: input, shape index: {}]   ;;  %s4860_s5 = inlined_call_operand.hbm [shape: f32[2,1,512], index: 5, kind: input, shape index: {}]   ;;  %s4861_s6 = inlined_call_operand.hbm [shape: bf16[128,128], index: 6, kind: input, shape index: {}]   ;;  %s4862_s7 = inlined_call_operand.vmem [shape: f32[1,128], index: 7, kind: input, shape index: {}]   ;;  %s4863_s8 = inlined_call_operand.hbm [shape: f32[8,128], index: 8, kind: output, shape index: {}]  }
   0x1   :  { %14 = vsyncpa [#allocation8], 0 }
   0x2   :  { %15 = vsyncpa [#allocation11], 0 }
   0x3   :  { %16 = vsyncpa [#allocation14], 0  ;;  %s33_s29 = sshll.u32 %s4856_s1, 4  ;;  %s34_s29 = int_to_ptr.hbm [resolvable:$true] %s33_s29 }
   0x4   :  { %17 = vsyncpa [#allocation6], 0  ;;  %s3928_s30 = smov [#allocation7]   ;;  %s3929_s10 = smov 64  }
   0x5   :  { %s35_s9 = sshll.u32 %s3928_s30, 4  ;;  %s3930_s11 = smov 4   ;;  %s36_s9 = int_to_ptr.vmem [resolvable:$true] %s35_s9 }
   0x6   :  { %41 = dma.hbm_to_vmem [thread:$0]  %s34_s29, 256, %s36_s9, [#allocation8], %s3929_s10, %s3929_s10, %s3930_s11  }
   0x7   :  { %s61_s14 = sshll.u32 %s4859_s4, 4  ;;  %s3931_s15 = smov [#allocation10]   ;;  %s62_s14 = int_to_ptr.hbm [resolvable:$true] %s61_s14 }
   0x8   :  { %s63_s16 = sshll.u32 %s3931_s15, 4  ;;  %s23_s18 = sshll.u32 %s4855_s0, 4  ;;  %s64_s16 = int_to_ptr.vmem [resolvable:$true] %s63_s16  ;;  %s24_s18 = int_to_ptr.hbm [resolvable:$true] %s23_s18 }
   0x9   :  { %s3932_s19 = smov 256   ;;  %s3933_s20 = smov 16  }
   0xa   :  { %69 = dma.hbm_to_vmem [thread:$0]  %s62_s14, 8192, %s64_s16, [#allocation11], %s3932_s19, %s3932_s19, %s3933_s20  }
   0xb   :  { %s48_s23 = sshll.u32 %s4858_s3, 4  ;;  %s3934_s24 = smov [#allocation4]   ;;  %s49_s23 = int_to_ptr.hbm [resolvable:$true] %s48_s23 }
   0xc   :  { %s25_s25 = sshll.u32 %s3934_s24, 4  ;;  %s3935_s4 = smov [#allocation9]   ;;  %s26_s25 = int_to_ptr.vmem [resolvable:$true] %s25_s25 }
   0xd   :  { %28 = dma.hbm_to_vmem [thread:$0]  %s24_s18, 128, %s26_s25, [#allocation5]  }
   0xe   :  { %s50_s26 = sshll.u32 %s3935_s4, 4  ;;  %s74_s0 = sshll.u32 %s4860_s5, 4  ;;  %s51_s26 = int_to_ptr.vmem [resolvable:$true] %s50_s26  ;;  %s75_s0 = int_to_ptr.hbm [resolvable:$true] %s74_s0 }
   0xf   :  { %56 = dma.hbm_to_vmem [thread:$0]  %s49_s23, 8192, %s51_s26, [#allocation8], %s3932_s19, %s3932_s19, %s3933_s20  }
  0x10   :  { %s87_s9 = sshll.u32 %s4861_s6, 4  ;;  %s3936_s12 = smov [#allocation12]   ;;  %s88_s9 = int_to_ptr.hbm [resolvable:$true] %s87_s9 }
  0x11   :  { %s76_s3 = sshll.u32 %s3936_s12, 4  ;;  %s3937_s13 = smov [#allocation13]   ;;  %s77_s3 = int_to_ptr.vmem [resolvable:$true] %s76_s3 }
  0x12   :  { %82 = dma.hbm_to_vmem [thread:$0]  %s75_s0, 128, %s77_s3, [#allocation11], %s3929_s10, %s3929_s10, %s3930_s11  }
  0x13   :  { %s89_s14 = sshll.u32 %s3937_s13, 4  ;;  %s90_s14 = int_to_ptr.vmem [resolvable:$true] %s89_s14 }
  0x14   :  { %95 = dma.hbm_to_vmem [thread:$0]  %s88_s9, 1024, %s90_s14, [#allocation14], %s3929_s10, %s3929_s10, %s3930_s11  }
  0x15   :  { %3918 = dma.done.wait [#allocation5], 128  }
  0x16   :  { %3919 = vsyncadd [#allocation5], 4294967168 }
  0x17   :  { %3920 = dma.done.wait [#allocation8], 8448  }
  0x18   :  { %3921 = vsyncadd [#allocation8], 4294958848 }
  0x19   :  { %3922 = dma.done.wait [#allocation11], 8320  }
  0x1a   :  { %3923 = vsyncadd [#allocation11], 4294958976 }
  0x1b   :  { %3924 = dma.done.wait [#allocation14], 1024  }
  0x1c   :  { %3925 = vsyncadd [#allocation14], 4294966272  ;;  %v2907_v0 = vld [vmem:[#allocation7 + $0x8] sm:$0xf]  ;;  %v3471_v1 = vld [vmem:[#allocation7 + $0x8] sm:$0x70] }
  0x1d   :  { %vm148_vm0 = vcmask 1046528   ;;  %v2908_v2 = vor.u32 %v3471_v1, %v2907_v0  ;;  %vm144_vm1 = vcmask 244736   ;;  %v3024_v3 = vld [vmem:[#allocation9 + $0xe0] sm:$0xf]  ;;  %v3502_v4 = vld [vmem:[#allocation9 + $0xec] sm:$0xf0] }
  0x1e   :  { %v3470_v5 = vld [vmem:[#allocation7] sm:$0xff]  ;;  %v3025_v6 = vor.u32 %v3502_v4, %v3024_v3  ;;  %v3500_v7 = vld [vmem:[#allocation9 + $0xe4] sm:$0xf]  ;;  %v3032_v9 = vld [vmem:[#allocation9 + $0xe8] sm:$0xf]  ;;  %vm681_vm3 = vcmask 1040384  }
  0x1f   :  { %v3026_v8 = vld [vmem:[#allocation9 + $0xf0] sm:$0xf0]  ;;  %v150_v10 = vsel %vm148_vm0, %v2908_v2, 0  ;;  %v123_v11 = vld [vmem:[#allocation4] sm:$0xff]  ;;  %v3503_v13 = vld [vmem:[#allocation9 + $0xf4] sm:$0xf0] }
  0x20   :  { %v3029_v12 = vor.u32 %v3500_v7, %v3026_v8  ;;  %v3501_v14 = vld [vmem:[#allocation9 + $0xec] sm:$0xf]  ;;  %158 = vmatpush.bf16.msra.mxu0 %v150_v10  ;;  %405 = vmatpush.bf16.msra.mxu1 %v3025_v6  ;;  %v3033_v15 = vor.u32 %v3503_v13, %v3032_v9  ;;  %v3034_v16 = vld [vmem:[#allocation9 + $0xf8] sm:$0xf0]  ;;  %v3008_v17 = vld [vmem:[#allocation9 + $0xc0] sm:$0xf]  ;;  %v124_v28 = vpack.c.bf16 %v123_v11, %v123_v11 }
  0x21   :  { %v3498_v18 = vld [vmem:[#allocation9 + $0xcc] sm:$0xf0]  ;;  %v3037_v19 = vor.u32 %v3501_v14, %v3034_v16  ;;  %v3496_v21 = vld [vmem:[#allocation9 + $0xc4] sm:$0xf]  ;;  %v3010_v22 = vld [vmem:[#allocation9 + $0xd0] sm:$0xf0] }
  0x22   :  { %418 = vmatpush.bf16.msra.mxu2 %v3029_v12  ;;  %v3009_v20 = vor.u32 %v3498_v18, %v3008_v17  ;;  %v3016_v23 = vld [vmem:[#allocation9 + $0xc8] sm:$0xf]  ;;  %431 = vmatpush.bf16.msra.mxu3 %v3033_v15  ;;  %v3013_v24 = vor.u32 %v3496_v21, %v3010_v22  ;;  %v3499_v25 = vld [vmem:[#allocation9 + $0xd4] sm:$0xf0]  ;;  %v3497_v26 = vld [vmem:[#allocation9 + $0xcc] sm:$0xf] }
  0x23   :  { %v3018_v27 = vld [vmem:[#allocation9 + $0xd8] sm:$0xf0]  ;;  %v3017_v29 = vor.u32 %v3499_v25, %v3016_v23  ;;  %v2992_v30 = vld [vmem:[#allocation9 + $0xa0] sm:$0xf]  ;;  %v3494_v31 = vld [vmem:[#allocation9 + $0xac] sm:$0xf0] }
  0x24   :  { %v3492_v32 = vld [vmem:[#allocation9 + $0xa4] sm:$0xf]  ;;  %159 = vmatpush.bf16.msra.mxu0 %v3470_v5  ;;  %406 = vmatpush.bf16.msra.mxu1 %v3009_v20  ;;  %v2993_v33 = vor.u32 %v3494_v31, %v2992_v30  ;;  %v2994_v34 = vld [vmem:[#allocation9 + $0xb0] sm:$0xf0]  ;;  %v3000_v35 = vld [vmem:[#allocation9 + $0xa8] sm:$0xf]  ;;  %v3021_v37 = vor.u32 %v3497_v26, %v3018_v27 }
  0x25   :  { %v3495_v36 = vld [vmem:[#allocation9 + $0xb4] sm:$0xf0]  ;;  %v2997_v38 = vor.u32 %v3492_v32, %v2994_v34  ;;  %v3493_v39 = vld [vmem:[#allocation9 + $0xac] sm:$0xf]  ;;  %v3002_v40 = vld [vmem:[#allocation9 + $0xb8] sm:$0xf0] }
  0x26   :  { %419 = vmatpush.bf16.msra.mxu2 %v3013_v24  ;;  %v2976_v41 = vld [vmem:[#allocation9 + $0x80] sm:$0xf]  ;;  %432 = vmatpush.bf16.msra.mxu3 %v3017_v29  ;;  %v3001_v42 = vor.u32 %v3495_v36, %v3000_v35  ;;  %v3490_v43 = vld [vmem:[#allocation9 + $0x8c] sm:$0xf0]  ;;  %v3488_v44 = vld [vmem:[#allocation9 + $0x84] sm:$0xf]  ;;  %v3005_v49 = vor.u32 %v3493_v39, %v3002_v40 }
  0x27   :  { %v2978_v45 = vld [vmem:[#allocation9 + $0x90] sm:$0xf0]  ;;  %2909 = vmatmul.msk.bf16.vlgmr.msra.gmra.mxu0 %vm144_vm1, %v124_v28  ;;  %v2984_v46 = vld [vmem:[#allocation9 + $0x88] sm:$0xf]  ;;  %v3491_v47 = vld [vmem:[#allocation9 + $0x94] sm:$0xf0]  ;;  %v2977_v48 = vor.u32 %v3490_v43, %v2976_v41 }
  0x28   :  { %444 = vmatpush.bf16.msrb.mxu0 %v3037_v19  ;;  %407 = vmatpush.bf16.msra.mxu1 %v2993_v33  ;;  %v2981_v50 = vor.u32 %v3488_v44, %v2978_v45  ;;  %v3489_v51 = vld [vmem:[#allocation9 + $0x8c] sm:$0xf]  ;;  %v2960_v52 = vld [vmem:[#allocation9 + $0x60] sm:$0xf]  ;;  %v3486_v53 = vld [vmem:[#allocation9 + $0x6c] sm:$0xf0]  ;;  %v2985_v54 = vor.u32 %v3491_v47, %v2984_v46 }
  0x29   :  { %v2986_v55 = vld [vmem:[#allocation9 + $0x98] sm:$0xf0]  ;;  %v3484_v56 = vld [vmem:[#allocation9 + $0x64] sm:$0xf]  ;;  %v2962_v57 = vld [vmem:[#allocation9 + $0x70] sm:$0xf0]  ;;  %v2961_v60 = vor.u32 %v3486_v53, %v2960_v52 }
  0x2a   :  { %420 = vmatpush.bf16.msra.mxu2 %v2997_v38  ;;  %433 = vmatpush.bf16.msra.mxu3 %v3001_v42  ;;  %v2968_v58 = vld [vmem:[#allocation9 + $0x68] sm:$0xf]  ;;  %v3487_v59 = vld [vmem:[#allocation9 + $0x74] sm:$0xf0]  ;;  %v2989_v61 = vor.u32 %v3489_v51, %v2986_v55  ;;  %v2965_v62 = vor.u32 %v3484_v56, %v2962_v57  ;;  %v3485_v63 = vld [vmem:[#allocation9 + $0x6c] sm:$0xf] }
  0x2b   :  { %v2944_v0 = vld [vmem:[#allocation9 + $0x40] sm:$0xf]  ;;  %v3482_v1 = vld [vmem:[#allocation9 + $0x4c] sm:$0xf0]  ;;  %v2969_v2 = vor.u32 %v3487_v59, %v2968_v58  ;;  %v2970_v3 = vld [vmem:[#allocation9 + $0x78] sm:$0xf0] }
  0x2c   :  { %445 = vmatpush.bf16.msrb.mxu0 %v3021_v37  ;;  %408 = vmatpush.bf16.msra.mxu1 %v2977_v48  ;;  %v3480_v4 = vld [vmem:[#allocation9 + $0x44] sm:$0xf]  ;;  %v2946_v5 = vld [vmem:[#allocation9 + $0x50] sm:$0xf0]  ;;  %v2952_v6 = vld [vmem:[#allocation9 + $0x48] sm:$0xf]  ;;  %v2945_v8 = vor.u32 %v3482_v1, %v2944_v0  ;;  %v2973_v10 = vor.u32 %v3485_v63, %v2970_v3 }
  0x2d   :  { %v3483_v7 = vld [vmem:[#allocation9 + $0x54] sm:$0xf0]  ;;  %v3481_v9 = vld [vmem:[#allocation9 + $0x4c] sm:$0xf]  ;;  %v2949_v11 = vor.u32 %v3480_v4, %v2946_v5  ;;  %v2928_v12 = vld [vmem:[#allocation9 + $0x20] sm:$0xf] }
  0x2e   :  { %421 = vmatpush.bf16.msra.mxu2 %v2981_v50  ;;  %434 = vmatpush.bf16.msra.mxu3 %v2985_v54  ;;  %v3478_v13 = vld [vmem:[#allocation9 + $0x2c] sm:$0xf0]  ;;  %v2953_v14 = vor.u32 %v3483_v7, %v2952_v6  ;;  %v2954_v15 = vld [vmem:[#allocation9 + $0x58] sm:$0xf0]  ;;  %v3476_v16 = vld [vmem:[#allocation9 + $0x24] sm:$0xf] }
  0x2f   :  { %v2930_v17 = vld [vmem:[#allocation9 + $0x30] sm:$0xf0]  ;;  %v2936_v18 = vld [vmem:[#allocation9 + $0x28] sm:$0xf]  ;;  %v3479_v19 = vld [vmem:[#allocation9 + $0x34] sm:$0xf0]  ;;  %v2929_v20 = vor.u32 %v3478_v13, %v2928_v12  ;;  %v2957_v21 = vor.u32 %v3481_v9, %v2954_v15 }
  0x30   :  { %446 = vmatpush.bf16.msrb.mxu0 %v3005_v49  ;;  %409 = vmatpush.bf16.msra.mxu1 %v2961_v60  ;;  %v2933_v22 = vor.u32 %v3476_v16, %v2930_v17  ;;  %v2937_v23 = vor.u32 %v3479_v19, %v2936_v18  ;;  %v3477_v24 = vld [vmem:[#allocation9 + $0x2c] sm:$0xf]  ;;  %v2938_v25 = vld [vmem:[#allocation9 + $0x38] sm:$0xf0]  ;;  %v2912_v27 = vld [vmem:[#allocation9] sm:$0xf] }
  0x31   :  { %v2941_v26 = vor.u32 %v3477_v24, %v2938_v25  ;;  %v3474_v28 = vld [vmem:[#allocation9 + $0xc] sm:$0xf0]  ;;  %v3472_v29 = vld [vmem:[#allocation9 + $0x4] sm:$0xf]  ;;  %v2914_v31 = vld [vmem:[#allocation9 + $0x10] sm:$0xf0] }
  0x32   :  { %422 = vmatpush.bf16.msra.mxu2 %v2965_v62  ;;  %435 = vmatpush.bf16.msra.mxu3 %v2969_v2  ;;  %v2913_v30 = vor.u32 %v3474_v28, %v2912_v27  ;;  %v2920_v32 = vld [vmem:[#allocation9 + $0x8] sm:$0xf]  ;;  %v3475_v33 = vld [vmem:[#allocation9 + $0x14] sm:$0xf0]  ;;  %v2917_v34 = vor.u32 %v3472_v29, %v2914_v31  ;;  %v3473_v36 = vld [vmem:[#allocation9 + $0xc] sm:$0xf] }
  0x33   :  { %v2921_v35 = vor.u32 %v3475_v33, %v2920_v32  ;;  %v2922_v37 = vld [vmem:[#allocation9 + $0x18] sm:$0xf0]  ;;  %v3152_v38 = vld [vmem:[#allocation10 + $0xe0] sm:$0xf]  ;;  %v3534_v40 = vld [vmem:[#allocation10 + $0xec] sm:$0xf0] }
  0x34   :  { %447 = vmatpush.bf16.msrb.mxu0 %v2989_v61  ;;  %410 = vmatpush.bf16.msra.mxu1 %v2945_v8  ;;  %v2925_v39 = vor.u32 %v3473_v36, %v2922_v37  ;;  %v3532_v41 = vld [vmem:[#allocation10 + $0xe4] sm:$0xf]  ;;  %v3154_v42 = vld [vmem:[#allocation10 + $0xf0] sm:$0xf0]  ;;  %v4013_v43 = vor.u32 %v3534_v40, %v3152_v38  ;;  %v3160_v45 = vld [vmem:[#allocation10 + $0xe8] sm:$0xf] }
  0x35   :  { %v4015_v44 = vor.u32 %v3532_v41, %v3154_v42  ;;  %v3535_v46 = vld [vmem:[#allocation10 + $0xf4] sm:$0xf0]  ;;  %v3533_v47 = vld [vmem:[#allocation10 + $0xec] sm:$0xf]  ;;  %v3162_v49 = vld [vmem:[#allocation10 + $0xf8] sm:$0xf0] }
  0x36   :  { %423 = vmatpush.bf16.msra.mxu2 %v2949_v11  ;;  %436 = vmatpush.bf16.msra.mxu3 %v2953_v14  ;;  %v4017_v48 = vor.u32 %v3535_v46, %v3160_v45  ;;  %v3136_v50 = vld [vmem:[#allocation10 + $0xc0] sm:$0xf]  ;;  %v3530_v51 = vld [vmem:[#allocation10 + $0xcc] sm:$0xf0]  ;;  %v4021_v52 = vor.u32 %v3533_v47, %v3162_v49  ;;  %v3528_v54 = vld [vmem:[#allocation10 + $0xc4] sm:$0xf] }
  0x37   :  { %v4023_v53 = vor.u32 %v3530_v51, %v3136_v50  ;;  %v3138_v55 = vld [vmem:[#allocation10 + $0xd0] sm:$0xf0]  ;;  %v3144_v56 = vld [vmem:[#allocation10 + $0xc8] sm:$0xf]  ;;  %v3531_v58 = vld [vmem:[#allocation10 + $0xd4] sm:$0xf0] }
  0x38   :  { %448 = vmatpush.bf16.msrb.mxu0 %v2973_v10  ;;  %411 = vmatpush.bf16.msra.mxu1 %v2929_v20  ;;  %v4026_v57 = vor.u32 %v3528_v54, %v3138_v55  ;;  %v3529_v59 = vld [vmem:[#allocation10 + $0xcc] sm:$0xf]  ;;  %v3146_v60 = vld [vmem:[#allocation10 + $0xd8] sm:$0xf0]  ;;  %v4029_v61 = vor.u32 %v3531_v58, %v3144_v56  ;;  %v3120_v63 = vld [vmem:[#allocation10 + $0xa0] sm:$0xf] }
  0x39   :  { %v4031_v62 = vor.u32 %v3529_v59, %v3146_v60  ;;  %v3526_v0 = vld [vmem:[#allocation10 + $0xac] sm:$0xf0]  ;;  %v3524_v1 = vld [vmem:[#allocation10 + $0xa4] sm:$0xf]  ;;  %v3122_v3 = vld [vmem:[#allocation10 + $0xb0] sm:$0xf0] }
  0x3a   :  { %424 = vmatpush.bf16.msra.mxu2 %v2933_v22  ;;  %437 = vmatpush.bf16.msra.mxu3 %v2937_v23  ;;  %v4035_v2 = vor.u32 %v3526_v0, %v3120_v63  ;;  %v3128_v4 = vld [vmem:[#allocation10 + $0xa8] sm:$0xf]  ;;  %v3527_v5 = vld [vmem:[#allocation10 + $0xb4] sm:$0xf0]  ;;  %v4038_v6 = vor.u32 %v3524_v1, %v3122_v3  ;;  %v3525_v8 = vld [vmem:[#allocation10 + $0xac] sm:$0xf] }
  0x3b   :  { %v4040_v7 = vor.u32 %v3527_v5, %v3128_v4  ;;  %v3130_v9 = vld [vmem:[#allocation10 + $0xb8] sm:$0xf0]  ;;  %v3104_v11 = vld [vmem:[#allocation10 + $0x80] sm:$0xf]  ;;  %v3522_v12 = vld [vmem:[#allocation10 + $0x8c] sm:$0xf0] }
  0x3c   :  { %449 = vmatpush.bf16.msrb.mxu0 %v2957_v21  ;;  %412 = vmatpush.bf16.msra.mxu1 %v2913_v30  ;;  %v4043_v10 = vor.u32 %v3525_v8, %v3130_v9  ;;  %v3520_v13 = vld [vmem:[#allocation10 + $0x84] sm:$0xf]  ;;  %v4047_v14 = vor.u32 %v3522_v12, %v3104_v11  ;;  %v3106_v15 = vld [vmem:[#allocation10 + $0x90] sm:$0xf0]  ;;  %v3112_v16 = vld [vmem:[#allocation10 + $0x88] sm:$0xf] }
  0x3d   :  { %v3523_v17 = vld [vmem:[#allocation10 + $0x94] sm:$0xf0]  ;;  %v4050_v18 = vor.u32 %v3520_v13, %v3106_v15  ;;  %v3521_v20 = vld [vmem:[#allocation10 + $0x8c] sm:$0xf]  ;;  %v3114_v21 = vld [vmem:[#allocation10 + $0x98] sm:$0xf0] }
  0x3e   :  { %425 = vmatpush.bf16.msra.mxu2 %v2917_v34  ;;  %438 = vmatpush.bf16.msra.mxu3 %v2921_v35  ;;  %v4052_v19 = vor.u32 %v3523_v17, %v3112_v16  ;;  %v4055_v22 = vor.u32 %v3521_v20, %v3114_v21  ;;  %v3088_v23 = vld [vmem:[#allocation10 + $0x60] sm:$0xf]  ;;  %v3518_v24 = vld [vmem:[#allocation10 + $0x6c] sm:$0xf0]  ;;  %v3516_v25 = vld [vmem:[#allocation10 + $0x64] sm:$0xf] }
  0x3f   :  { %v3090_v27 = vld [vmem:[#allocation10 + $0x70] sm:$0xf0]  ;;  %v3096_v28 = vld [vmem:[#allocation10 + $0x68] sm:$0xf]  ;;  %v3519_v29 = vld [vmem:[#allocation10 + $0x74] sm:$0xf0] }
  0x40   :  { %450 = vmatpush.bf16.msrb.mxu0 %v2941_v26  ;;  %622 = vmatpush.bf16.msrb.mxu1 %v4013_v43  ;;  %v4060_v26 = vor.u32 %v3518_v24, %v3088_v23  ;;  %v4063_v30 = vor.u32 %v3516_v25, %v3090_v27  ;;  %v4065_v31 = vor.u32 %v3519_v29, %v3096_v28  ;;  %v3517_v32 = vld [vmem:[#allocation10 + $0x6c] sm:$0xf]  ;;  %v3098_v33 = vld [vmem:[#allocation10 + $0x78] sm:$0xf0]  ;;  %v3072_v34 = vld [vmem:[#allocation10 + $0x40] sm:$0xf] }
  0x41   :  { %v4067_v35 = vor.u32 %v3517_v32, %v3098_v33  ;;  %v3514_v36 = vld [vmem:[#allocation10 + $0x4c] sm:$0xf0]  ;;  %v3512_v37 = vld [vmem:[#allocation10 + $0x44] sm:$0xf]  ;;  %v3074_v38 = vld [vmem:[#allocation10 + $0x50] sm:$0xf0] }
  0x42   :  { %635 = vmatpush.bf16.msrb.mxu2 %v4015_v44  ;;  %648 = vmatpush.bf16.msrb.mxu3 %v4017_v48  ;;  %v4073_v40 = vor.u32 %v3512_v37, %v3074_v38  ;;  %v3080_v41 = vld [vmem:[#allocation10 + $0x48] sm:$0xf]  ;;  %v3515_v42 = vld [vmem:[#allocation10 + $0x54] sm:$0xf0]  ;;  %v3513_v45 = vld [vmem:[#allocation10 + $0x4c] sm:$0xf] }
  0x43   :  { %v4076_v46 = vor.u32 %v3515_v42, %v3080_v41  ;;  %v3082_v47 = vld [vmem:[#allocation10 + $0x58] sm:$0xf0]  ;;  %v3056_v49 = vld [vmem:[#allocation10 + $0x20] sm:$0xf]  ;;  %v3510_v50 = vld [vmem:[#allocation10 + $0x2c] sm:$0xf0] }
  0x44   :  { %451 = vmatpush.bf16.msrb.mxu0 %v2925_v39  ;;  %623 = vmatpush.bf16.msrb.mxu1 %v4023_v53  ;;  %v4071_v39 = vor.u32 %v3514_v36, %v3072_v34  ;;  %v4079_v51 = vor.u32 %v3513_v45, %v3082_v47  ;;  %v3508_v54 = vld [vmem:[#allocation10 + $0x24] sm:$0xf]  ;;  %v3058_v55 = vld [vmem:[#allocation10 + $0x30] sm:$0xf0]  ;;  %v3064_v56 = vld [vmem:[#allocation10 + $0x28] sm:$0xf]  ;;  %v4083_v63 = vor.u32 %v3510_v50, %v3056_v49 }
  0x45   :  { %v3511_v58 = vld [vmem:[#allocation10 + $0x34] sm:$0xf0]  ;;  %v3509_v59 = vld [vmem:[#allocation10 + $0x2c] sm:$0xf]  ;;  %v3066_v60 = vld [vmem:[#allocation10 + $0x38] sm:$0xf0]  ;;  %v4085_v0 = vor.u32 %v3508_v54, %v3058_v55 }
  0x46   :  { %636 = vmatpush.bf16.msrb.mxu2 %v4026_v57  ;;  %649 = vmatpush.bf16.msrb.mxu3 %v4029_v61  ;;  %v3040_v1 = vld [vmem:[#allocation10] sm:$0xf]  ;;  %v4088_v3 = vor.u32 %v3511_v58, %v3064_v56  ;;  %v3506_v4 = vld [vmem:[#allocation10 + $0xc] sm:$0xf0]  ;;  %v3504_v5 = vld [vmem:[#allocation10 + $0x4] sm:$0xf]  ;;  %v4091_v9 = vor.u32 %v3509_v59, %v3066_v60 }
  0x47   :  { %v3042_v8 = vld [vmem:[#allocation10 + $0x10] sm:$0xf0]  ;;  %v3048_v11 = vld [vmem:[#allocation10 + $0x8] sm:$0xf]  ;;  %v3507_v12 = vld [vmem:[#allocation10 + $0x14] sm:$0xf0]  ;;  %v4095_v16 = vor.u32 %v3506_v4, %v3040_v1 }
  0x48   :  { %661 = vmatpush.bf16.msra.mxu0 %v4021_v52  ;;  %624 = vmatpush.bf16.msrb.mxu1 %v4035_v2  ;;  %v3505_v13 = vld [vmem:[#allocation10 + $0xc] sm:$0xf]  ;;  %v3050_v15 = vld [vmem:[#allocation10 + $0x18] sm:$0xf0]  ;;  %v4097_v17 = vor.u32 %v3504_v5, %v3042_v8  ;;  %v4100_v20 = vor.u32 %v3507_v12, %v3048_v11  ;;  %v3620_v21 = vld [vmem:[%s4857_s2] ss:$0 sm:$0xff] }
  0x49   :  { %v4106_v23 = vor.u32 %v3505_v13, %v3050_v15  ;;  %v3938_v34 = vmov 0   ;;  %v234_v36 = vld [vmem:[#allocation12] sm:$0xf]  ;;  %vm683_vm4 = vcmask 1042434   ;;  %vm685_vm5 = vcmask 1041408   ;;  %s3939_s11 = smov [#allocation15]  }
  0x4a   :  { %637 = vmatpush.bf16.msrb.mxu2 %v4038_v6  ;;  %650 = vmatpush.bf16.msrb.mxu3 %v4040_v7  ;;  %v237_v37 = vperm.slane %v234_v36, 0  ;;  %v240_v38 = vperm.slane %v234_v36, 3  ;;  %v238_v49 = vperm.slane %v234_v36, 1  ;;  %v239_v50 = vperm.slane %v234_v36, 2  ;;  %s2886_s15 = sshll.u32 %s3939_s11, 4  ;;  %s2888_s1 = sshll.u32 %s4863_s8, 4  ;;  %s2887_s15 = int_to_ptr.vmem [resolvable:$true] %s2886_s15  ;;  %s2889_s1 = int_to_ptr.hbm [resolvable:$true] %s2888_s1 }
  0x4b   :  { %vm724_vm10 = vsmask.f32 256  ;;  %vm833_vm0 = vsmask.f32 7938 }
  0x4c   :  { %662 = vmatpush.bf16.msra.mxu0 %v4031_v62  ;;  %625 = vmatpush.bf16.msrb.mxu1 %v4047_v14  ;;  %vm4187_vm11 = vmand %vm681_vm3, %vm724_vm10  ;;  %vm942_vm10 = vsmask.f32 1280 }
  0x4d   :  { %vm4233_vm1 = vmand %vm681_vm3, %vm833_vm0 }
  0x4e   :  { %638 = vmatpush.bf16.msrb.mxu2 %v4050_v18  ;;  %651 = vmatpush.bf16.msrb.mxu3 %v4052_v19 }
  0x50   :  { %663 = vmatpush.bf16.msra.mxu0 %v4043_v10  ;;  %626 = vmatpush.bf16.msrb.mxu1 %v4060_v26 }
  0x52   :  { %639 = vmatpush.bf16.msrb.mxu2 %v4063_v30  ;;  %652 = vmatpush.bf16.msrb.mxu3 %v4065_v31 }
  0x54   :  { %664 = vmatpush.bf16.msra.mxu0 %v4055_v22  ;;  %627 = vmatpush.bf16.msrb.mxu1 %v4071_v39 }
  0x56   :  { %640 = vmatpush.bf16.msrb.mxu2 %v4073_v40  ;;  %653 = vmatpush.bf16.msrb.mxu3 %v4076_v46 }
  0x58   :  { %665 = vmatpush.bf16.msra.mxu0 %v4067_v35  ;;  %628 = vmatpush.bf16.msrb.mxu1 %v4083_v63 }
  0x5a   :  { %641 = vmatpush.bf16.msrb.mxu2 %v4085_v0  ;;  %654 = vmatpush.bf16.msrb.mxu3 %v4088_v3 }
  0x5c   :  { %666 = vmatpush.bf16.msra.mxu0 %v4079_v51  ;;  %629 = vmatpush.bf16.msrb.mxu1 %v4095_v16 }
  0x5e   :  { %642 = vmatpush.bf16.msrb.mxu2 %v4097_v17  ;;  %655 = vmatpush.bf16.msrb.mxu3 %v4100_v20 }
  0x60   :  { %667 = vmatpush.bf16.msra.mxu0 %v4091_v9 }
  0x64   :  { %668 = vmatpush.bf16.msra.mxu0 %v4106_v23 }
  0xa4   :  { %v161_v24 = vpop.f32.mrf.mxu0 }
  0xa5   :  { %v162_v25 = vadd.f32 %v3620_v21, %v161_v24 }
  0xa7   :  { %vm165_vm2 = vcmp.gt.f32.partialorder %v162_v25, 0.0  ;;  %v166_v27 = vmul.f32 0.01, %v162_v25 }
  0xa9   :  { %v167_v28 = vsel %vm165_vm2, %v162_v25, %v166_v27 }
  0xaa   :  { %v168_v29 = vpack.c.bf16 %v167_v28, %v167_v28 }
  0xac   :  { %169 = vst [vmem:[#allocation2] sm:$0xf] %v168_v29  ;;  %v163_v32 = vpop.f32.mrf.mxu0 }
  0xb3   :  { %v235_v33 = vld [vmem:[#allocation2] sm:$0xf] }
  0xb4   :  { %413 = vmatmul.bf16.vlgmr.msra.gmra.mxu1 %v235_v33  ;;  %426 = vmatmul.bf16.vlgmr.msra.gmra.mxu2 %v235_v33 }
  0xb5   :  { %439 = vmatmul.bf16.vlgmr.msra.gmra.mxu3 %v235_v33  ;;  %452 = vmatmul.bf16.vlgmr.msrb.gmra.mxu0 %v235_v33 }
  0xb6   :  { %731 = vmatpush.bf16.msra.mxu1 %v4013_v43  ;;  %744 = vmatpush.bf16.msra.mxu2 %v4015_v44 }
  0xb7   :  { %757 = vmatpush.bf16.msra.mxu3 %v4017_v48  ;;  %770 = vmatpush.bf16.msrb.mxu0 %v4021_v52 }
  0xba   :  { %732 = vmatpush.bf16.msra.mxu1 %v4023_v53  ;;  %745 = vmatpush.bf16.msra.mxu2 %v4026_v57 }
  0xbb   :  { %758 = vmatpush.bf16.msra.mxu3 %v4029_v61  ;;  %771 = vmatpush.bf16.msrb.mxu0 %v4031_v62 }
  0xbe   :  { %733 = vmatpush.bf16.msra.mxu1 %v4035_v2  ;;  %746 = vmatpush.bf16.msra.mxu2 %v4038_v6 }
  0xbf   :  { %759 = vmatpush.bf16.msra.mxu3 %v4040_v7  ;;  %772 = vmatpush.bf16.msrb.mxu0 %v4043_v10 }
  0xc2   :  { %734 = vmatpush.bf16.msra.mxu1 %v4047_v14  ;;  %747 = vmatpush.bf16.msra.mxu2 %v4050_v18 }
  0xc3   :  { %760 = vmatpush.bf16.msra.mxu3 %v4052_v19  ;;  %773 = vmatpush.bf16.msrb.mxu0 %v4055_v22 }
  0xc4   :  { %630 = vmatmul.bf16.vlgmr.msrb.gmra.mxu1 %v3938_v34  ;;  %643 = vmatmul.bf16.vlgmr.msrb.gmra.mxu2 %v3938_v34 }
  0xc5   :  { %656 = vmatmul.bf16.vlgmr.msrb.gmra.mxu3 %v3938_v34  ;;  %669 = vmatmul.bf16.vlgmr.msra.gmra.mxu0 %v3938_v34 }
  0xc6   :  { %735 = vmatpush.bf16.msra.mxu1 %v4060_v26  ;;  %748 = vmatpush.bf16.msra.mxu2 %v4063_v30 }
  0xc7   :  { %761 = vmatpush.bf16.msra.mxu3 %v4065_v31  ;;  %774 = vmatpush.bf16.msrb.mxu0 %v4067_v35 }
  0xca   :  { %736 = vmatpush.bf16.msra.mxu1 %v4071_v39  ;;  %749 = vmatpush.bf16.msra.mxu2 %v4073_v40 }
  0xcb   :  { %762 = vmatpush.bf16.msra.mxu3 %v4076_v46  ;;  %775 = vmatpush.bf16.msrb.mxu0 %v4079_v51 }
  0xce   :  { %737 = vmatpush.bf16.msra.mxu1 %v4083_v63  ;;  %750 = vmatpush.bf16.msra.mxu2 %v4085_v0 }
  0xcf   :  { %763 = vmatpush.bf16.msra.mxu3 %v4088_v3  ;;  %776 = vmatpush.bf16.msrb.mxu0 %v4091_v9 }
  0xd2   :  { %738 = vmatpush.bf16.msra.mxu1 %v4095_v16  ;;  %751 = vmatpush.bf16.msra.mxu2 %v4097_v17 }
  0xd3   :  { %764 = vmatpush.bf16.msra.mxu3 %v4100_v20  ;;  %777 = vmatpush.bf16.msrb.mxu0 %v4106_v23 }
  0xd6   :  { %840 = vmatpush.bf16.msrb.mxu1 %v4013_v43  ;;  %853 = vmatpush.bf16.msrb.mxu2 %v4015_v44 }
  0xd7   :  { %866 = vmatpush.bf16.msrb.mxu3 %v4017_v48  ;;  %879 = vmatpush.bf16.msra.mxu0 %v4021_v52 }
  0xda   :  { %841 = vmatpush.bf16.msrb.mxu1 %v4023_v53  ;;  %854 = vmatpush.bf16.msrb.mxu2 %v4026_v57 }
  0xdb   :  { %867 = vmatpush.bf16.msrb.mxu3 %v4029_v61  ;;  %880 = vmatpush.bf16.msra.mxu0 %v4031_v62 }
  0xde   :  { %842 = vmatpush.bf16.msrb.mxu1 %v4035_v2  ;;  %855 = vmatpush.bf16.msrb.mxu2 %v4038_v6 }
  0xdf   :  { %868 = vmatpush.bf16.msrb.mxu3 %v4040_v7  ;;  %881 = vmatpush.bf16.msra.mxu0 %v4043_v10 }
  0xe2   :  { %843 = vmatpush.bf16.msrb.mxu1 %v4047_v14  ;;  %856 = vmatpush.bf16.msrb.mxu2 %v4050_v18 }
  0xe3   :  { %869 = vmatpush.bf16.msrb.mxu3 %v4052_v19  ;;  %882 = vmatpush.bf16.msra.mxu0 %v4055_v22 }
  0xe6   :  { %844 = vmatpush.bf16.msrb.mxu1 %v4060_v26  ;;  %857 = vmatpush.bf16.msrb.mxu2 %v4063_v30 }
  0xe7   :  { %870 = vmatpush.bf16.msrb.mxu3 %v4065_v31  ;;  %883 = vmatpush.bf16.msra.mxu0 %v4067_v35 }
  0xea   :  { %845 = vmatpush.bf16.msrb.mxu1 %v4071_v39  ;;  %858 = vmatpush.bf16.msrb.mxu2 %v4073_v40 }
  0xeb   :  { %871 = vmatpush.bf16.msrb.mxu3 %v4076_v46  ;;  %884 = vmatpush.bf16.msra.mxu0 %v4079_v51 }
  0xee   :  { %846 = vmatpush.bf16.msrb.mxu1 %v4083_v63  ;;  %859 = vmatpush.bf16.msrb.mxu2 %v4085_v0 }
  0xef   :  { %872 = vmatpush.bf16.msrb.mxu3 %v4088_v3  ;;  %885 = vmatpush.bf16.msra.mxu0 %v4091_v9 }
  0xf2   :  { %847 = vmatpush.bf16.msrb.mxu1 %v4095_v16  ;;  %860 = vmatpush.bf16.msrb.mxu2 %v4097_v17 }
  0xf3   :  { %873 = vmatpush.bf16.msrb.mxu3 %v4100_v20  ;;  %886 = vmatpush.bf16.msra.mxu0 %v4106_v23 }
 0x131   :  { %v414_v41 = vpop.f32.mrf.mxu1 }
 0x132   :  { %v415_v42 = vadd.f32 %v414_v41, %v237_v37  ;;  %v453_v45 = vpop.f32.mrf.mxu0 }
 0x133   :  { %v454_v47 = vadd.f32 %v453_v45, %v240_v38 }
 0x134   :  { %457 = vst [vmem:[#allocation3] sm:$0xff] %v415_v42 }
 0x135   :  { %460 = vst [vmem:[#allocation3 + $0x18] sm:$0xff] %v454_v47 }
 0x137   :  { %v427_v54 = vpop.f32.mrf.mxu2 }
 0x138   :  { %v428_v55 = vadd.f32 %v427_v54, %v238_v49  ;;  %v440_v56 = vpop.f32.mrf.mxu3 }
 0x139   :  { %v441_v58 = vadd.f32 %v440_v56, %v239_v50  ;;  %v416_v59 = vpop.f32.mrf.mxu1 }
 0x13a   :  { %458 = vst [vmem:[#allocation3 + $0x8] sm:$0xff] %v428_v55  ;;  %v455_v60 = vpop.f32.mrf.mxu0 }
 0x13b   :  { %459 = vst [vmem:[#allocation3 + $0x10] sm:$0xff] %v441_v58 }
 0x13f   :  { %v429_v1 = vpop.f32.mrf.mxu2 }
 0x140   :  { %v442_v4 = vpop.f32.mrf.mxu3 }
 0x141   :  { %v631_v5 = vpop.f32.mrf.mxu1 }
 0x142   :  { %v670_v8 = vpop.f32.mrf.mxu0  ;;  %v461_v29 = vld [vmem:[#allocation3] ss:$8 sm:$0xf] }
 0x143   :  { %v680_v11 = vrot.slane %v670_v8, 5 }
 0x147   :  { %v644_v12 = vpop.f32.mrf.mxu2 }
 0x148   :  { %v678_v13 = vrot.slane %v644_v12, 7  ;;  %v657_v15 = vpop.f32.mrf.mxu3 }
 0x149   :  { %v679_v21 = vrot.slane %v657_v15, 6  ;;  %v633_v24 = vpop.f32.mrf.mxu1 }
 0x14a   :  { %v682_v25 = vsel %vm681_vm3, %v631_v5, %v678_v13  ;;  %v672_v27 = vpop.f32.mrf.mxu0 }
 0x14b   :  { %v684_v28 = vsel %vm683_vm4, %v679_v21, %v680_v11  ;;  %v726_v27 = vld [vmem:[#allocation2] sm:$0x1] }
 0x14c   :  { %v686_v32 = vsel %vm685_vm5, %v682_v25, %v684_v28 }
 0x14d   :  { %v688_v33 = vadd.f32 %v686_v32, %v461_v29 }
 0x14f   :  { %v3166_v36 = vmul.f32 -1.442695, %v688_v33  ;;  %v646_v37 = vpop.f32.mrf.mxu2  ;;  %v709_v49 = vrot.slane %v688_v33, 3 }
 0x150   :  { %v659_v38 = vpop.f32.mrf.mxu3 }
 0x151   :  { %3622 = vpow2.f32 %v3166_v36 }
 0x157   :  { %v3623_v41 = vpop.eup %3622 }
 0x158   :  { %v692_v42 = vadd.f32 1.0, %v3623_v41 }
 0x15a   :  { %3624 = vrcp.f32 %v692_v42  ;;  %v704_v54 = vand.u32 2147483648, %v692_v42  ;;  %v702_v56 = vand.u32 2147483647, %v692_v42  ;;  %vm698_vm7 = vweird.f32 %v692_v42 }
 0x15b   :  { %3626 = vtanh.f32 %v709_v49 }
 0x15c   :  { %v705_v59 = vor.u32 1.1754944e-38, %v704_v54  ;;  %vm703_vm9 = vcmp.eq.f32.partialorder %v702_v56, 8.507059e+37 }
 0x160   :  { %v3625_v45 = vpop.eup %3624 }
 0x161   :  { %v694_v47 = vmul.f32 %v3625_v45, %v692_v42  ;;  %vm699_vm6 = vweird.f32 %v3625_v45  ;;  %v3627_v5 = vpop.eup %3626 }
 0x162   :  { %vm700_vm8 = vmor %vm698_vm7, %vm699_vm6 }
 0x163   :  { %v695_v50 = vsub.f32 1.0, %v694_v47 }
 0x165   :  { %v696_v55 = vmul.f32 %v3625_v45, %v695_v50  ;;  %v730_v50 = vld [vmem:[#allocation3 + $0x1] ss:$8 sm:$0xf] }
 0x167   :  { %v697_v58 = vadd.f32 %v3625_v45, %v696_v55 }
 0x169   :  { %v701_v60 = vsel %vm700_vm8, %v3625_v45, %v697_v58 }
 0x16a   :  { %v706_v1 = vsel %vm703_vm9, %v705_v59, %v701_v60  ;;  %vm941_vm9 = vcmask 1041409  }
 0x16b   :  { %v713_v4 = vrot.slane %v706_v1, 1  ;;  %v716_v11 = vmul.f32 %v3627_v5, %v706_v1  ;;  %v719_v13 = vrot.slane %v706_v1, 2 }
 0x16d   :  { %v715_v8 = vmul.f32 0.0, %v713_v4 }
 0x16f   :  { %v4183_v12 = vadd.f32 %v716_v11, %v715_v8 }
 0x171   :  { %3628 = vtanh.f32 %v4183_v12 }
 0x177   :  { %v3629_v15 = vpop.eup %3628 }
 0x178   :  { %v721_v21 = vmul.f32 %v3629_v15, %v719_v13 }
 0x17a   :  { %v722_v25 = vpack.c.bf16 %v721_v21, %v721_v21 }
 0x17c   :  { %v727_v28 = vsel %vm4187_vm11, %v722_v25, %v726_v27  ;;  %739 = vmatmul.bf16.vlgmr.msra.gmra.mxu1 %v722_v25  ;;  %752 = vmatmul.bf16.vlgmr.msra.gmra.mxu2 %v722_v25 }
 0x17d   :  { %728 = vst [vmem:[#allocation2] sm:$0x1] %v727_v28  ;;  %765 = vmatmul.bf16.vlgmr.msra.gmra.mxu3 %v722_v25  ;;  %778 = vmatmul.bf16.vlgmr.msrb.gmra.mxu0 %v722_v25 }
 0x17e   :  { %949 = vmatpush.bf16.msra.mxu1 %v4013_v43  ;;  %962 = vmatpush.bf16.msra.mxu2 %v4015_v44 }
 0x17f   :  { %975 = vmatpush.bf16.msra.mxu3 %v4017_v48  ;;  %988 = vmatpush.bf16.msrb.mxu0 %v4021_v52 }
 0x182   :  { %950 = vmatpush.bf16.msra.mxu1 %v4023_v53  ;;  %963 = vmatpush.bf16.msra.mxu2 %v4026_v57 }
 0x183   :  { %976 = vmatpush.bf16.msra.mxu3 %v4029_v61  ;;  %989 = vmatpush.bf16.msrb.mxu0 %v4031_v62 }
 0x186   :  { %951 = vmatpush.bf16.msra.mxu1 %v4035_v2  ;;  %964 = vmatpush.bf16.msra.mxu2 %v4038_v6 }
 0x187   :  { %977 = vmatpush.bf16.msra.mxu3 %v4040_v7  ;;  %990 = vmatpush.bf16.msrb.mxu0 %v4043_v10 }
 0x18a   :  { %952 = vmatpush.bf16.msra.mxu1 %v4047_v14  ;;  %965 = vmatpush.bf16.msra.mxu2 %v4050_v18 }
 0x18b   :  { %978 = vmatpush.bf16.msra.mxu3 %v4052_v19  ;;  %991 = vmatpush.bf16.msrb.mxu0 %v4055_v22 }
 0x18e   :  { %953 = vmatpush.bf16.msra.mxu1 %v4060_v26  ;;  %966 = vmatpush.bf16.msra.mxu2 %v4063_v30 }
 0x18f   :  { %979 = vmatpush.bf16.msra.mxu3 %v4065_v31  ;;  %992 = vmatpush.bf16.msrb.mxu0 %v4067_v35 }
 0x192   :  { %954 = vmatpush.bf16.msra.mxu1 %v4071_v39  ;;  %967 = vmatpush.bf16.msra.mxu2 %v4073_v40 }
 0x193   :  { %980 = vmatpush.bf16.msra.mxu3 %v4076_v46  ;;  %993 = vmatpush.bf16.msrb.mxu0 %v4079_v51 }
 0x196   :  { %955 = vmatpush.bf16.msra.mxu1 %v4083_v63  ;;  %968 = vmatpush.bf16.msra.mxu2 %v4085_v0 }
 0x197   :  { %981 = vmatpush.bf16.msra.mxu3 %v4088_v3  ;;  %994 = vmatpush.bf16.msrb.mxu0 %v4091_v9 }
 0x19a   :  { %956 = vmatpush.bf16.msra.mxu1 %v4095_v16  ;;  %969 = vmatpush.bf16.msra.mxu2 %v4097_v17 }
 0x19b   :  { %982 = vmatpush.bf16.msra.mxu3 %v4100_v20  ;;  %995 = vmatpush.bf16.msrb.mxu0 %v4106_v23 }
 0x1f9   :  { %v740_v29 = vpop.f32.mrf.mxu1 }
 0x1fa   :  { %v779_v32 = vpop.f32.mrf.mxu0 }
 0x1fb   :  { %v789_v38 = vrot.slane %v779_v32, 5 }
 0x1ff   :  { %v753_v33 = vpop.f32.mrf.mxu2 }
 0x200   :  { %v787_v36 = vrot.slane %v753_v33, 7  ;;  %v766_v37 = vpop.f32.mrf.mxu3 }
 0x201   :  { %v788_v41 = vrot.slane %v766_v37, 6  ;;  %v742_v42 = vpop.f32.mrf.mxu1 }
 0x202   :  { %v790_v45 = vsel %vm681_vm3, %v740_v29, %v787_v36  ;;  %v781_v47 = vpop.f32.mrf.mxu0 }
 0x203   :  { %v791_v49 = vsel %vm683_vm4, %v788_v41, %v789_v38 }
 0x204   :  { %v792_v54 = vsel %vm685_vm5, %v790_v45, %v791_v49 }
 0x205   :  { %v794_v55 = vadd.f32 %v792_v54, %v730_v50  ;;  %v835_v54 = vld [vmem:[#allocation2] sm:$0x1] }
 0x207   :  { %v3167_v56 = vmul.f32 -1.442695, %v794_v55  ;;  %v755_v58 = vpop.f32.mrf.mxu2  ;;  %v815_v8 = vrot.slane %v794_v55, 3 }
 0x208   :  { %v768_v59 = vpop.f32.mrf.mxu3 }
 0x209   :  { %3630 = vpow2.f32 %v3167_v56 }
 0x20f   :  { %v3631_v60 = vpop.eup %3630 }
 0x210   :  { %v798_v1 = vadd.f32 1.0, %v3631_v60 }
 0x212   :  { %3632 = vrcp.f32 %v798_v1  ;;  %v810_v13 = vand.u32 2147483648, %v798_v1  ;;  %v808_v21 = vand.u32 2147483647, %v798_v1  ;;  %vm804_vm13 = vweird.f32 %v798_v1 }
 0x213   :  { %3634 = vtanh.f32 %v815_v8 }
 0x214   :  { %v811_v27 = vor.u32 1.1754944e-38, %v810_v13  ;;  %vm809_vm15 = vcmp.eq.f32.partialorder %v808_v21, 8.507059e+37 }
 0x218   :  { %v3633_v4 = vpop.eup %3632 }
 0x219   :  { %v800_v5 = vmul.f32 %v3633_v4, %v798_v1  ;;  %vm805_vm12 = vweird.f32 %v3633_v4  ;;  %v3635_v33 = vpop.eup %3634 }
 0x21a   :  { %vm806_vm14 = vmor %vm804_vm13, %vm805_vm12 }
 0x21b   :  { %v801_v11 = vsub.f32 1.0, %v800_v5  ;;  %vm4279_vm12 = vmand %vm941_vm9, %vm942_vm10 }
 0x21d   :  { %v802_v15 = vmul.f32 %v3633_v4, %v801_v11 }
 0x21f   :  { %v803_v25 = vadd.f32 %v3633_v4, %v802_v15  ;;  %v839_v15 = vld [vmem:[#allocation3 + $0x2] ss:$8 sm:$0xf] }
 0x221   :  { %v807_v28 = vsel %vm806_vm14, %v3633_v4, %v803_v25 }
 0x222   :  { %v812_v29 = vsel %vm809_vm15, %v811_v27, %v807_v28 }
 0x223   :  { %v819_v32 = vrot.slane %v812_v29, 1  ;;  %v822_v37 = vmul.f32 %v3635_v33, %v812_v29  ;;  %v825_v41 = vrot.slane %v812_v29, 2 }
 0x225   :  { %v821_v36 = vmul.f32 %v819_v32, %v4183_v12 }
 0x227   :  { %v4229_v38 = vadd.f32 %v822_v37, %v821_v36 }
 0x229   :  { %3636 = vtanh.f32 %v4229_v38 }
 0x22f   :  { %v3637_v42 = vpop.eup %3636 }
 0x230   :  { %v827_v45 = vmul.f32 %v3637_v42, %v825_v41 }
 0x232   :  { %v828_v47 = vpack.c.bf16 %v827_v45, %v827_v45 }
 0x234   :  { %v830_v50 = vshll.u32 %v828_v47, 16  ;;  %848 = vmatmul.bf16.vlgmr.msrb.gmra.mxu1 %v828_v47  ;;  %861 = vmatmul.bf16.vlgmr.msrb.gmra.mxu2 %v828_v47 }
 0x235   :  { %874 = vmatmul.bf16.vlgmr.msrb.gmra.mxu3 %v828_v47  ;;  %887 = vmatmul.bf16.vlgmr.msra.gmra.mxu0 %v828_v47 }
 0x236   :  { %v836_v12 = vsel %vm4233_vm1, %v830_v50, %v835_v54  ;;  %1059 = vmatpush.bf16.msrb.mxu1 %v4013_v43  ;;  %1072 = vmatpush.bf16.msrb.mxu2 %v4015_v44 }
 0x237   :  { %837 = vst [vmem:[#allocation2] sm:$0x1] %v836_v12  ;;  %1085 = vmatpush.bf16.msrb.mxu3 %v4017_v48  ;;  %1098 = vmatpush.bf16.msra.mxu0 %v4021_v52 }
 0x23a   :  { %1060 = vmatpush.bf16.msrb.mxu1 %v4023_v53  ;;  %1073 = vmatpush.bf16.msrb.mxu2 %v4026_v57 }
 0x23b   :  { %1086 = vmatpush.bf16.msrb.mxu3 %v4029_v61  ;;  %1099 = vmatpush.bf16.msra.mxu0 %v4031_v62 }
 0x23e   :  { %1061 = vmatpush.bf16.msrb.mxu1 %v4035_v2  ;;  %1074 = vmatpush.bf16.msrb.mxu2 %v4038_v6 }
 0x23f   :  { %1087 = vmatpush.bf16.msrb.mxu3 %v4040_v7  ;;  %1100 = vmatpush.bf16.msra.mxu0 %v4043_v10 }
 0x242   :  { %1062 = vmatpush.bf16.msrb.mxu1 %v4047_v14  ;;  %1075 = vmatpush.bf16.msrb.mxu2 %v4050_v18 }
 0x243   :  { %1088 = vmatpush.bf16.msrb.mxu3 %v4052_v19  ;;  %1101 = vmatpush.bf16.msra.mxu0 %v4055_v22 }
 0x246   :  { %1063 = vmatpush.bf16.msrb.mxu1 %v4060_v26  ;;  %1076 = vmatpush.bf16.msrb.mxu2 %v4063_v30 }
 0x247   :  { %1089 = vmatpush.bf16.msrb.mxu3 %v4065_v31  ;;  %1102 = vmatpush.bf16.msra.mxu0 %v4067_v35 }
 0x24a   :  { %1064 = vmatpush.bf16.msrb.mxu1 %v4071_v39  ;;  %1077 = vmatpush.bf16.msrb.mxu2 %v4073_v40 }
 0x24b   :  { %1090 = vmatpush.bf16.msrb.mxu3 %v4076_v46  ;;  %1103 = vmatpush.bf16.msra.mxu0 %v4079_v51 }
 0x24e   :  { %1065 = vmatpush.bf16.msrb.mxu1 %v4083_v63  ;;  %1078 = vmatpush.bf16.msrb.mxu2 %v4085_v0 }
 0x24f   :  { %1091 = vmatpush.bf16.msrb.mxu3 %v4088_v3  ;;  %1104 = vmatpush.bf16.msra.mxu0 %v4091_v9 }
 0x252   :  { %1066 = vmatpush.bf16.msrb.mxu1 %v4095_v16  ;;  %1079 = vmatpush.bf16.msrb.mxu2 %v4097_v17 }
 0x253   :  { %1092 = vmatpush.bf16.msrb.mxu3 %v4100_v20  ;;  %1105 = vmatpush.bf16.msra.mxu0 %v4106_v23 }
 0x2b1   :  { %v849_v55 = vpop.f32.mrf.mxu1 }
 0x2b2   :  { %v888_v56 = vpop.f32.mrf.mxu0 }
 0x2b3   :  { %v898_v1 = vrot.slane %v888_v56, 5 }
 0x2b7   :  { %v862_v58 = vpop.f32.mrf.mxu2 }
 0x2b8   :  { %v896_v59 = vrot.slane %v862_v58, 7  ;;  %v875_v60 = vpop.f32.mrf.mxu3 }
 0x2b9   :  { %v897_v4 = vrot.slane %v875_v60, 6  ;;  %v851_v5 = vpop.f32.mrf.mxu1 }
 0x2ba   :  { %v899_v8 = vsel %vm681_vm3, %v849_v55, %v896_v59  ;;  %v890_v11 = vpop.f32.mrf.mxu0 }
 0x2bb   :  { %v900_v13 = vsel %vm683_vm4, %v897_v4, %v898_v1 }
 0x2bc   :  { %v901_v21 = vsel %vm685_vm5, %v899_v8, %v900_v13 }
 0x2bd   :  { %v903_v25 = vadd.f32 %v901_v21, %v839_v15 }
 0x2bf   :  { %v3168_v27 = vmul.f32 -1.442695, %v903_v25  ;;  %v864_v28 = vpop.f32.mrf.mxu2  ;;  %v924_v41 = vrot.slane %v903_v25, 3 }
 0x2c0   :  { %v877_v29 = vpop.f32.mrf.mxu3 }
 0x2c1   :  { %3638 = vpow2.f32 %v3168_v27 }
 0x2c7   :  { %v3639_v32 = vpop.eup %3638 }
 0x2c8   :  { %v907_v33 = vadd.f32 1.0, %v3639_v32 }
 0x2ca   :  { %3640 = vrcp.f32 %v907_v33  ;;  %v919_v45 = vand.u32 2147483648, %v907_v33  ;;  %v917_v50 = vand.u32 2147483647, %v907_v33  ;;  %vm913_vm6 = vweird.f32 %v907_v33 }
 0x2cb   :  { %3642 = vtanh.f32 %v924_v41 }
 0x2cc   :  { %v920_v12 = vor.u32 1.1754944e-38, %v919_v45  ;;  %vm918_vm8 = vcmp.eq.f32.partialorder %v917_v50, 8.507059e+37  ;;  %v948_v50 = vld [vmem:[#allocation3 + $0x3] ss:$8 sm:$0xf] }
 0x2d0   :  { %v3641_v36 = vpop.eup %3640 }
 0x2d1   :  { %v909_v37 = vmul.f32 %v3641_v36, %v907_v33  ;;  %vm914_vm2 = vweird.f32 %v3641_v36  ;;  %v3643_v59 = vpop.eup %3642 }
 0x2d2   :  { %vm915_vm7 = vmor %vm913_vm6, %vm914_vm2  ;;  %vm1052_vm2 = vsmask.f32 7942 }
 0x2d3   :  { %v910_v42 = vsub.f32 1.0, %v909_v37  ;;  %vm4325_vm6 = vmand %vm941_vm9, %vm1052_vm2 }
 0x2d5   :  { %v911_v47 = vmul.f32 %v3641_v36, %v910_v42 }
 0x2d7   :  { %v912_v54 = vadd.f32 %v3641_v36, %v911_v47 }
 0x2d9   :  { %v916_v55 = vsel %vm915_vm7, %v3641_v36, %v912_v54 }
 0x2da   :  { %v921_v56 = vsel %vm918_vm8, %v920_v12, %v916_v55 }
 0x2db   :  { %v928_v58 = vrot.slane %v921_v56, 1  ;;  %v931_v1 = vmul.f32 %v3643_v59, %v921_v56  ;;  %v934_v5 = vrot.slane %v921_v56, 2 }
 0x2dd   :  { %v930_v60 = vmul.f32 %v928_v58, %v4229_v38  ;;  %v944_v38 = vld [vmem:[#allocation2] sm:$0x2] }
 0x2df   :  { %v4275_v4 = vadd.f32 %v931_v1, %v930_v60 }
 0x2e1   :  { %3644 = vtanh.f32 %v4275_v4 }
 0x2e7   :  { %v3645_v8 = vpop.eup %3644 }
 0x2e8   :  { %v936_v11 = vmul.f32 %v3645_v8, %v934_v5 }
 0x2ea   :  { %v937_v13 = vpack.c.bf16 %v936_v11, %v936_v11 }
 0x2ec   :  { %v939_v21 = vrot.slane %v937_v13, 7  ;;  %957 = vmatmul.bf16.vlgmr.msra.gmra.mxu1 %v937_v13  ;;  %970 = vmatmul.bf16.vlgmr.msra.gmra.mxu2 %v937_v13 }
 0x2ed   :  { %983 = vmatmul.bf16.vlgmr.msra.gmra.mxu3 %v937_v13  ;;  %996 = vmatmul.bf16.vlgmr.msrb.gmra.mxu0 %v937_v13 }
 0x2ee   :  { %v945_v25 = vsel %vm4279_vm12, %v939_v21, %v944_v38  ;;  %1168 = vmatpush.bf16.msra.mxu1 %v4013_v43  ;;  %1181 = vmatpush.bf16.msra.mxu2 %v4015_v44 }
 0x2ef   :  { %946 = vst [vmem:[#allocation2] sm:$0x2] %v945_v25  ;;  %1194 = vmatpush.bf16.msra.mxu3 %v4017_v48  ;;  %1207 = vmatpush.bf16.msrb.mxu0 %v4021_v52 }
 0x2f2   :  { %1169 = vmatpush.bf16.msra.mxu1 %v4023_v53  ;;  %1182 = vmatpush.bf16.msra.mxu2 %v4026_v57 }
 0x2f3   :  { %1195 = vmatpush.bf16.msra.mxu3 %v4029_v61  ;;  %1208 = vmatpush.bf16.msrb.mxu0 %v4031_v62 }
 0x2f6   :  { %1170 = vmatpush.bf16.msra.mxu1 %v4035_v2  ;;  %1183 = vmatpush.bf16.msra.mxu2 %v4038_v6 }
 0x2f7   :  { %1196 = vmatpush.bf16.msra.mxu3 %v4040_v7  ;;  %1209 = vmatpush.bf16.msrb.mxu0 %v4043_v10 }
 0x2fa   :  { %1171 = vmatpush.bf16.msra.mxu1 %v4047_v14  ;;  %1184 = vmatpush.bf16.msra.mxu2 %v4050_v18 }
 0x2fb   :  { %1197 = vmatpush.bf16.msra.mxu3 %v4052_v19  ;;  %1210 = vmatpush.bf16.msrb.mxu0 %v4055_v22 }
 0x2fe   :  { %1172 = vmatpush.bf16.msra.mxu1 %v4060_v26  ;;  %1185 = vmatpush.bf16.msra.mxu2 %v4063_v30 }
 0x2ff   :  { %1198 = vmatpush.bf16.msra.mxu3 %v4065_v31  ;;  %1211 = vmatpush.bf16.msrb.mxu0 %v4067_v35 }
 0x302   :  { %1173 = vmatpush.bf16.msra.mxu1 %v4071_v39  ;;  %1186 = vmatpush.bf16.msra.mxu2 %v4073_v40 }
 0x303   :  { %1199 = vmatpush.bf16.msra.mxu3 %v4076_v46  ;;  %1212 = vmatpush.bf16.msrb.mxu0 %v4079_v51 }
 0x306   :  { %1174 = vmatpush.bf16.msra.mxu1 %v4083_v63  ;;  %1187 = vmatpush.bf16.msra.mxu2 %v4085_v0 }
 0x307   :  { %1200 = vmatpush.bf16.msra.mxu3 %v4088_v3  ;;  %1213 = vmatpush.bf16.msrb.mxu0 %v4091_v9 }
 0x30a   :  { %1175 = vmatpush.bf16.msra.mxu1 %v4095_v16  ;;  %1188 = vmatpush.bf16.msra.mxu2 %v4097_v17 }
 0x30b   :  { %1201 = vmatpush.bf16.msra.mxu3 %v4100_v20  ;;  %1214 = vmatpush.bf16.msrb.mxu0 %v4106_v23 }
 0x369   :  { %v958_v27 = vpop.f32.mrf.mxu1 }
 0x36a   :  { %v997_v28 = vpop.f32.mrf.mxu0 }
 0x36b   :  { %v1007_v36 = vrot.slane %v997_v28, 5 }
 0x36f   :  { %v971_v29 = vpop.f32.mrf.mxu2 }
 0x370   :  { %v1005_v32 = vrot.slane %v971_v29, 7  ;;  %v984_v33 = vpop.f32.mrf.mxu3 }
 0x371   :  { %v1006_v37 = vrot.slane %v984_v33, 6  ;;  %v960_v41 = vpop.f32.mrf.mxu1 }
 0x372   :  { %v1008_v42 = vsel %vm681_vm3, %v958_v27, %v1005_v32  ;;  %v999_v45 = vpop.f32.mrf.mxu0 }
 0x373   :  { %v1009_v47 = vsel %vm683_vm4, %v1006_v37, %v1007_v36 }
 0x374   :  { %v1010_v54 = vsel %vm685_vm5, %v1008_v42, %v1009_v47 }
 0x375   :  { %v1012_v12 = vadd.f32 %v1010_v54, %v948_v50 }
 0x377   :  { %v3169_v55 = vmul.f32 -1.442695, %v1012_v12  ;;  %v973_v56 = vpop.f32.mrf.mxu2  ;;  %v1033_v8 = vrot.slane %v1012_v12, 3 }
 0x378   :  { %v986_v58 = vpop.f32.mrf.mxu3 }
 0x379   :  { %3646 = vpow2.f32 %v3169_v55  ;;  %v1054_v55 = vld [vmem:[#allocation2] sm:$0x2] }
 0x37f   :  { %v3647_v59 = vpop.eup %3646 }
 0x380   :  { %v1016_v60 = vadd.f32 1.0, %v3647_v59 }
 0x382   :  { %3648 = vrcp.f32 %v1016_v60  ;;  %v1028_v13 = vand.u32 2147483648, %v1016_v60  ;;  %v1026_v38 = vand.u32 2147483647, %v1016_v60  ;;  %vm1022_vm14 = vweird.f32 %v1016_v60 }
 0x383   :  { %3650 = vtanh.f32 %v1033_v8 }
 0x384   :  { %v1029_v27 = vor.u32 1.1754944e-38, %v1028_v13  ;;  %vm1027_vm0 = vcmp.eq.f32.partialorder %v1026_v38, 8.507059e+37 }
 0x388   :  { %v3649_v1 = vpop.eup %3648 }
 0x389   :  { %v1018_v5 = vmul.f32 %v3649_v1, %v1016_v60  ;;  %vm1023_vm13 = vweird.f32 %v3649_v1  ;;  %v3651_v33 = vpop.eup %3650 }
 0x38a   :  { %vm1024_vm15 = vmor %vm1022_vm14, %vm1023_vm13  ;;  %vm1161_vm13 = vsmask.f32 2304 }
 0x38b   :  { %v1019_v11 = vsub.f32 1.0, %v1018_v5  ;;  %vm4371_vm14 = vmand %vm683_vm4, %vm1161_vm13 }
 0x38d   :  { %v1020_v21 = vmul.f32 %v3649_v1, %v1019_v11 }
 0x38f   :  { %v1021_v25 = vadd.f32 %v3649_v1, %v1020_v21 }
 0x391   :  { %v1025_v28 = vsel %vm1024_vm15, %v3649_v1, %v1021_v25 }
 0x392   :  { %v1030_v29 = vsel %vm1027_vm0, %v1029_v27, %v1025_v28  ;;  %v1058_v27 = vld [vmem:[#allocation3 + $0x4] ss:$8 sm:$0xf] }
 0x393   :  { %v1037_v32 = vrot.slane %v1030_v29, 1  ;;  %v1040_v37 = vmul.f32 %v3651_v33, %v1030_v29  ;;  %v1043_v42 = vrot.slane %v1030_v29, 2 }
 0x395   :  { %v1039_v36 = vmul.f32 %v1037_v32, %v4275_v4 }
 0x397   :  { %v4321_v41 = vadd.f32 %v1040_v37, %v1039_v36 }
 0x399   :  { %3652 = vtanh.f32 %v4321_v41 }
 0x39f   :  { %v3653_v45 = vpop.eup %3652 }
 0x3a0   :  { %v1045_v47 = vmul.f32 %v3653_v45, %v1043_v42 }
 0x3a2   :  { %v1046_v50 = vpack.c.bf16 %v1045_v47, %v1045_v47 }
 0x3a4   :  { %v1048_v54 = vshll.u32 %v1046_v50, 16  ;;  %1067 = vmatmul.bf16.vlgmr.msrb.gmra.mxu1 %v1046_v50  ;;  %1080 = vmatmul.bf16.vlgmr.msrb.gmra.mxu2 %v1046_v50 }
 0x3a5   :  { %1093 = vmatmul.bf16.vlgmr.msrb.gmra.mxu3 %v1046_v50  ;;  %1106 = vmatmul.bf16.vlgmr.msra.gmra.mxu0 %v1046_v50 }
 0x3a6   :  { %v1050_v4 = vrot.slane %v1048_v54, 7  ;;  %1278 = vmatpush.bf16.msrb.mxu1 %v4013_v43  ;;  %1291 = vmatpush.bf16.msrb.mxu2 %v4015_v44 }
 0x3a7   :  { %1304 = vmatpush.bf16.msrb.mxu3 %v4017_v48  ;;  %1317 = vmatpush.bf16.msra.mxu0 %v4021_v52 }
 0x3a8   :  { %v1055_v56 = vsel %vm4325_vm6, %v1050_v4, %v1054_v55 }
 0x3a9   :  { %1056 = vst [vmem:[#allocation2] sm:$0x2] %v1055_v56 }
 0x3aa   :  { %1279 = vmatpush.bf16.msrb.mxu1 %v4023_v53  ;;  %1292 = vmatpush.bf16.msrb.mxu2 %v4026_v57 }
 0x3ab   :  { %1305 = vmatpush.bf16.msrb.mxu3 %v4029_v61  ;;  %1318 = vmatpush.bf16.msra.mxu0 %v4031_v62 }
 0x3ae   :  { %1280 = vmatpush.bf16.msrb.mxu1 %v4035_v2  ;;  %1293 = vmatpush.bf16.msrb.mxu2 %v4038_v6 }
 0x3af   :  { %1306 = vmatpush.bf16.msrb.mxu3 %v4040_v7  ;;  %1319 = vmatpush.bf16.msra.mxu0 %v4043_v10 }
 0x3b2   :  { %1281 = vmatpush.bf16.msrb.mxu1 %v4047_v14  ;;  %1294 = vmatpush.bf16.msrb.mxu2 %v4050_v18 }
 0x3b3   :  { %1307 = vmatpush.bf16.msrb.mxu3 %v4052_v19  ;;  %1320 = vmatpush.bf16.msra.mxu0 %v4055_v22 }
 0x3b6   :  { %1282 = vmatpush.bf16.msrb.mxu1 %v4060_v26  ;;  %1295 = vmatpush.bf16.msrb.mxu2 %v4063_v30 }
 0x3b7   :  { %1308 = vmatpush.bf16.msrb.mxu3 %v4065_v31  ;;  %1321 = vmatpush.bf16.msra.mxu0 %v4067_v35 }
 0x3ba   :  { %1283 = vmatpush.bf16.msrb.mxu1 %v4071_v39  ;;  %1296 = vmatpush.bf16.msrb.mxu2 %v4073_v40 }
 0x3bb   :  { %1309 = vmatpush.bf16.msrb.mxu3 %v4076_v46  ;;  %1322 = vmatpush.bf16.msra.mxu0 %v4079_v51 }
 0x3be   :  { %1284 = vmatpush.bf16.msrb.mxu1 %v4083_v63  ;;  %1297 = vmatpush.bf16.msrb.mxu2 %v4085_v0 }
 0x3bf   :  { %1310 = vmatpush.bf16.msrb.mxu3 %v4088_v3  ;;  %1323 = vmatpush.bf16.msra.mxu0 %v4091_v9 }
 0x3c2   :  { %1285 = vmatpush.bf16.msrb.mxu1 %v4095_v16  ;;  %1298 = vmatpush.bf16.msrb.mxu2 %v4097_v17 }
 0x3c3   :  { %1311 = vmatpush.bf16.msrb.mxu3 %v4100_v20  ;;  %1324 = vmatpush.bf16.msra.mxu0 %v4106_v23 }
 0x421   :  { %v1068_v58 = vpop.f32.mrf.mxu1 }
 0x422   :  { %v1107_v59 = vpop.f32.mrf.mxu0 }
 0x423   :  { %v1117_v8 = vrot.slane %v1107_v59, 5 }
 0x427   :  { %v1081_v60 = vpop.f32.mrf.mxu2 }
 0x428   :  { %v1115_v1 = vrot.slane %v1081_v60, 7  ;;  %v1094_v5 = vpop.f32.mrf.mxu3 }
 0x429   :  { %v1116_v11 = vrot.slane %v1094_v5, 6  ;;  %v1070_v13 = vpop.f32.mrf.mxu1 }
 0x42a   :  { %v1118_v21 = vsel %vm681_vm3, %v1068_v58, %v1115_v1  ;;  %v1109_v38 = vpop.f32.mrf.mxu0 }
 0x42b   :  { %v1119_v25 = vsel %vm683_vm4, %v1116_v11, %v1117_v8 }
 0x42c   :  { %v1120_v28 = vsel %vm685_vm5, %v1118_v21, %v1119_v25 }
 0x42d   :  { %v1122_v29 = vadd.f32 %v1120_v28, %v1058_v27 }
 0x42f   :  { %v3170_v32 = vmul.f32 -1.442695, %v1122_v29  ;;  %v1083_v33 = vpop.f32.mrf.mxu2  ;;  %v1143_v50 = vrot.slane %v1122_v29, 3 }
 0x430   :  { %v1096_v36 = vpop.f32.mrf.mxu3  ;;  %v1163_v33 = vld [vmem:[#allocation2] sm:$0x4] }
 0x431   :  { %3654 = vpow2.f32 %v3170_v32 }
 0x437   :  { %v3655_v37 = vpop.eup %3654 }
 0x438   :  { %v1126_v42 = vadd.f32 1.0, %v3655_v37 }
 0x43a   :  { %3656 = vrcp.f32 %v1126_v42  ;;  %v1138_v4 = vand.u32 2147483648, %v1126_v42  ;;  %v1136_v56 = vand.u32 2147483647, %v1126_v42  ;;  %vm1132_vm8 = vweird.f32 %v1126_v42 }
 0x43b   :  { %3658 = vtanh.f32 %v1143_v50 }
 0x43c   :  { %v1139_v59 = vor.u32 1.1754944e-38, %v1138_v4  ;;  %vm1137_vm10 = vcmp.eq.f32.partialorder %v1136_v56, 8.507059e+37 }
 0x440   :  { %v3657_v45 = vpop.eup %3656 }
 0x441   :  { %v1128_v47 = vmul.f32 %v3657_v45, %v1126_v42  ;;  %vm1133_vm7 = vweird.f32 %v3657_v45  ;;  %v3659_v8 = vpop.eup %3658 }
 0x442   :  { %vm1134_vm9 = vmor %vm1132_vm8, %vm1133_vm7  ;;  %vm1271_vm8 = vsmask.f32 7946 }
 0x443   :  { %v1129_v54 = vsub.f32 1.0, %v1128_v47 }
 0x445   :  { %v1130_v55 = vmul.f32 %v3657_v45, %v1129_v54 }
 0x447   :  { %v1131_v58 = vadd.f32 %v3657_v45, %v1130_v55 }
 0x449   :  { %v1135_v60 = vsel %vm1134_vm9, %v3657_v45, %v1131_v58  ;;  %vm4414_vm9 = vmand %vm683_vm4, %vm1271_vm8 }
 0x44a   :  { %v1140_v1 = vsel %vm1137_vm10, %v1139_v59, %v1135_v60 }
 0x44b   :  { %v1147_v5 = vrot.slane %v1140_v1, 1  ;;  %v1150_v13 = vmul.f32 %v3659_v8, %v1140_v1  ;;  %v1153_v38 = vrot.slane %v1140_v1, 2 }
 0x44d   :  { %v1149_v11 = vmul.f32 %v1147_v5, %v4321_v41 }
 0x44f   :  { %v4367_v21 = vadd.f32 %v1150_v13, %v1149_v11 }
 0x451   :  { %3660 = vtanh.f32 %v4367_v21 }
 0x457   :  { %v3661_v25 = vpop.eup %3660 }
 0x458   :  { %v1155_v27 = vmul.f32 %v3661_v25, %v1153_v38 }
 0x45a   :  { %v1156_v28 = vpack.c.bf16 %v1155_v27, %v1155_v27 }
 0x45c   :  { %v1158_v32 = vrot.slane %v1156_v28, 6  ;;  %1176 = vmatmul.bf16.vlgmr.msra.gmra.mxu1 %v1156_v28  ;;  %1189 = vmatmul.bf16.vlgmr.msra.gmra.mxu2 %v1156_v28 }
 0x45d   :  { %1202 = vmatmul.bf16.vlgmr.msra.gmra.mxu3 %v1156_v28  ;;  %1215 = vmatmul.bf16.vlgmr.msrb.gmra.mxu0 %v1156_v28 }
 0x45e   :  { %v1164_v41 = vsel %vm4371_vm14, %v1158_v32, %v1163_v33  ;;  %1387 = vmatpush.bf16.msra.mxu1 %v4013_v43  ;;  %1400 = vmatpush.bf16.msra.mxu2 %v4015_v44  ;;  %v1277_v32 = vld [vmem:[#allocation3 + $0x6] ss:$8 sm:$0xf] }
 0x45f   :  { %1165 = vst [vmem:[#allocation2] sm:$0x4] %v1164_v41  ;;  %1413 = vmatpush.bf16.msra.mxu3 %v4017_v48  ;;  %1426 = vmatpush.bf16.msrb.mxu0 %v4021_v52 }
 0x462   :  { %1388 = vmatpush.bf16.msra.mxu1 %v4023_v53  ;;  %1401 = vmatpush.bf16.msra.mxu2 %v4026_v57 }
 0x463   :  { %1414 = vmatpush.bf16.msra.mxu3 %v4029_v61  ;;  %1427 = vmatpush.bf16.msrb.mxu0 %v4031_v62 }
 0x466   :  { %1389 = vmatpush.bf16.msra.mxu1 %v4035_v2  ;;  %1402 = vmatpush.bf16.msra.mxu2 %v4038_v6  ;;  %v1273_v58 = vld [vmem:[#allocation2] sm:$0x4] }
 0x467   :  { %1415 = vmatpush.bf16.msra.mxu3 %v4040_v7  ;;  %1428 = vmatpush.bf16.msrb.mxu0 %v4043_v10  ;;  %v1167_v10 = vld [vmem:[#allocation3 + $0x5] ss:$8 sm:$0xf] }
 0x46a   :  { %1390 = vmatpush.bf16.msra.mxu1 %v4047_v14  ;;  %1403 = vmatpush.bf16.msra.mxu2 %v4050_v18 }
 0x46b   :  { %1416 = vmatpush.bf16.msra.mxu3 %v4052_v19  ;;  %1429 = vmatpush.bf16.msrb.mxu0 %v4055_v22 }
 0x46e   :  { %1391 = vmatpush.bf16.msra.mxu1 %v4060_v26  ;;  %1404 = vmatpush.bf16.msra.mxu2 %v4063_v30 }
 0x46f   :  { %1417 = vmatpush.bf16.msra.mxu3 %v4065_v31  ;;  %1430 = vmatpush.bf16.msrb.mxu0 %v4067_v35 }
 0x472   :  { %1392 = vmatpush.bf16.msra.mxu1 %v4071_v39  ;;  %1405 = vmatpush.bf16.msra.mxu2 %v4073_v40 }
 0x473   :  { %1418 = vmatpush.bf16.msra.mxu3 %v4076_v46  ;;  %1431 = vmatpush.bf16.msrb.mxu0 %v4079_v51 }
 0x476   :  { %1393 = vmatpush.bf16.msra.mxu1 %v4083_v63  ;;  %1406 = vmatpush.bf16.msra.mxu2 %v4085_v0 }
 0x477   :  { %1419 = vmatpush.bf16.msra.mxu3 %v4088_v3  ;;  %1432 = vmatpush.bf16.msrb.mxu0 %v4091_v9 }
 0x47a   :  { %1394 = vmatpush.bf16.msra.mxu1 %v4095_v16  ;;  %1407 = vmatpush.bf16.msra.mxu2 %v4097_v17 }
 0x47b   :  { %1420 = vmatpush.bf16.msra.mxu3 %v4100_v20  ;;  %1433 = vmatpush.bf16.msrb.mxu0 %v4106_v23 }
 0x4d9   :  { %v1177_v43 = vpop.f32.mrf.mxu1 }
 0x4da   :  { %v1216_v44 = vpop.f32.mrf.mxu0 }
 0x4db   :  { %v1226_v57 = vrot.slane %v1216_v44, 5 }
 0x4df   :  { %v1190_v48 = vpop.f32.mrf.mxu2 }
 0x4e0   :  { %v1224_v52 = vrot.slane %v1190_v48, 7  ;;  %v1203_v53 = vpop.f32.mrf.mxu3 }
 0x4e1   :  { %v1225_v61 = vrot.slane %v1203_v53, 6  ;;  %v1179_v62 = vpop.f32.mrf.mxu1 }
 0x4e2   :  { %v1227_v2 = vsel %vm681_vm3, %v1177_v43, %v1224_v52  ;;  %v1218_v6 = vpop.f32.mrf.mxu0 }
 0x4e3   :  { %v1228_v7 = vsel %vm683_vm4, %v1225_v61, %v1226_v57 }
 0x4e4   :  { %v1229_v14 = vsel %vm685_vm5, %v1227_v2, %v1228_v7 }
 0x4e5   :  { %v1231_v18 = vadd.f32 %v1229_v14, %v1167_v10 }
 0x4e7   :  { %v3171_v19 = vmul.f32 -1.442695, %v1231_v18  ;;  %v1192_v22 = vpop.f32.mrf.mxu2  ;;  %v1252_v40 = vrot.slane %v1231_v18, 3 }
 0x4e8   :  { %v1205_v26 = vpop.f32.mrf.mxu3 }
 0x4e9   :  { %3662 = vpow2.f32 %v3171_v19 }
 0x4ef   :  { %v3663_v30 = vpop.eup %3662 }
 0x4f0   :  { %v1235_v31 = vadd.f32 1.0, %v3663_v30 }
 0x4f2   :  { %3664 = vrcp.f32 %v1235_v31  ;;  %v1247_v51 = vand.u32 2147483648, %v1235_v31  ;;  %v1245_v0 = vand.u32 2147483647, %v1235_v31  ;;  %vm1241_vm0 = vweird.f32 %v1235_v31 }
 0x4f3   :  { %3666 = vtanh.f32 %v1252_v40 }
 0x4f4   :  { %v1248_v9 = vor.u32 1.1754944e-38, %v1247_v51  ;;  %vm1246_vm7 = vcmp.eq.f32.partialorder %v1245_v0, 8.507059e+37 }
 0x4f8   :  { %v3665_v35 = vpop.eup %3664 }
 0x4f9   :  { %v1237_v39 = vmul.f32 %v3665_v35, %v1235_v31  ;;  %vm1242_vm15 = vweird.f32 %v3665_v35  ;;  %v3667_v23 = vpop.eup %3666 }
 0x4fa   :  { %vm1243_vm2 = vmor %vm1241_vm0, %vm1242_vm15 }
 0x4fb   :  { %v1238_v46 = vsub.f32 1.0, %v1237_v39 }
 0x4fd   :  { %v1239_v63 = vmul.f32 %v3665_v35, %v1238_v46 }
 0x4ff   :  { %v1240_v3 = vadd.f32 %v3665_v35, %v1239_v63 }
 0x501   :  { %v1244_v16 = vsel %vm1243_vm2, %v3665_v35, %v1240_v3  ;;  %vm1379_vm2 = vcmask 1043459  }
 0x502   :  { %v1249_v17 = vsel %vm1246_vm7, %v1248_v9, %v1244_v16  ;;  %vm1380_vm7 = vsmask.f32 3328  ;;  %v1382_v9 = vld [vmem:[#allocation2] sm:$0x8] }
 0x503   :  { %v1256_v20 = vrot.slane %v1249_v17, 1  ;;  %v1259_v37 = vmul.f32 %v3667_v23, %v1249_v17  ;;  %v1262_v45 = vrot.slane %v1249_v17, 2  ;;  %vm4427_vm8 = vmand %vm1379_vm2, %vm1380_vm7  ;;  %v3288_v17 = vld [vmem:[#allocation9 + $0x1e0] sm:$0xf]  ;;  %v3564_v23 = vld [vmem:[#allocation9 + $0x1e4] sm:$0xf] }
 0x504   :  { %vm1490_vm7 = vsmask.f32 7950 }
 0x505   :  { %v1258_v36 = vmul.f32 %v1256_v20, %v4367_v21  ;;  %v3566_v20 = vld [vmem:[#allocation9 + $0x1ec] sm:$0xf0] }
 0x507   :  { %v1260_v42 = vadd.f32 %v1259_v37, %v1258_v36  ;;  %v3289_v36 = vor.u32 %v3566_v20, %v3288_v17  ;;  %v3290_v37 = vld [vmem:[#allocation9 + $0x1f0] sm:$0xf0] }
 0x509   :  { %3668 = vtanh.f32 %v1260_v42 }
 0x50f   :  { %v3669_v47 = vpop.eup %3668 }
 0x510   :  { %v1264_v50 = vmul.f32 %v3669_v47, %v1262_v45  ;;  %v3567_v45 = vld [vmem:[#allocation9 + $0x1f4] sm:$0xf0]  ;;  %v3293_v47 = vor.u32 %v3564_v23, %v3290_v37  ;;  %v3250_v23 = vld [vmem:[#allocation9 + $0x198] sm:$0xf0] }
 0x512   :  { %v1265_v54 = vpack.c.bf16 %v1264_v50, %v1264_v50 }
 0x514   :  { %v1267_v4 = vshll.u32 %v1265_v54, 16  ;;  %1286 = vmatmul.bf16.vlgmr.msrb.gmra.mxu1 %v1265_v54  ;;  %1299 = vmatmul.bf16.vlgmr.msrb.gmra.mxu2 %v1265_v54 }
 0x515   :  { %1312 = vmatmul.bf16.vlgmr.msrb.gmra.mxu3 %v1265_v54  ;;  %1325 = vmatmul.bf16.vlgmr.msra.gmra.mxu0 %v1265_v54  ;;  %v3565_v54 = vld [vmem:[#allocation9 + $0x1ec] sm:$0xf] }
 0x516   :  { %v1269_v56 = vrot.slane %v1267_v4, 6  ;;  %v3298_v4 = vld [vmem:[#allocation9 + $0x1f8] sm:$0xf0]  ;;  %1733 = vmatpush.bf16.msrb.mxu1 %v3289_v36  ;;  %1746 = vmatpush.bf16.msrb.mxu2 %v3293_v47  ;;  %v3548_v47 = vld [vmem:[#allocation9 + $0x164] sm:$0xf] }
 0x518   :  { %v1274_v59 = vsel %vm4414_vm9, %v1269_v56, %v1273_v58  ;;  %v3301_v56 = vor.u32 %v3565_v54, %v3298_v4  ;;  %v3272_v58 = vld [vmem:[#allocation9 + $0x1c0] sm:$0xf]  ;;  %v3226_v4 = vld [vmem:[#allocation9 + $0x170] sm:$0xf0] }
 0x519   :  { %1275 = vst [vmem:[#allocation2] sm:$0x4] %v1274_v59  ;;  %v3562_v59 = vld [vmem:[#allocation9 + $0x1cc] sm:$0xf0] }
 0x51a   :  { %1772 = vmatpush.bf16.msra.mxu0 %v3301_v56  ;;  %v3232_v56 = vld [vmem:[#allocation9 + $0x168] sm:$0xf] }
 0x591   :  { %v1287_v60 = vpop.f32.mrf.mxu1 }
 0x592   :  { %v1326_v1 = vpop.f32.mrf.mxu0 }
 0x593   :  { %v1336_v13 = vrot.slane %v1326_v1, 5  ;;  %v3273_v1 = vor.u32 %v3562_v59, %v3272_v58  ;;  %v3551_v58 = vld [vmem:[#allocation9 + $0x174] sm:$0xf0] }
 0x595   :  { %1734 = vmatpush.bf16.msrb.mxu1 %v3273_v1  ;;  %v3233_v1 = vor.u32 %v3551_v58, %v3232_v56  ;;  %v3424_v56 = vld [vmem:[#allocation10 + $0x1e8] sm:$0xf]  ;;  %v3599_v58 = vld [vmem:[#allocation10 + $0x1f4] sm:$0xf0] }
 0x597   :  { %v1300_v5 = vpop.f32.mrf.mxu2 }
 0x598   :  { %v1334_v8 = vrot.slane %v1300_v5, 7  ;;  %v1313_v11 = vpop.f32.mrf.mxu3  ;;  %v3274_v5 = vld [vmem:[#allocation9 + $0x1d0] sm:$0xf0] }
 0x599   :  { %v1335_v21 = vrot.slane %v1313_v11, 6  ;;  %v1289_v38 = vpop.f32.mrf.mxu1  ;;  %v3563_v11 = vld [vmem:[#allocation9 + $0x1d4] sm:$0xf0] }
 0x59a   :  { %v1337_v25 = vsel %vm681_vm3, %v1287_v60, %v1334_v8  ;;  %v1328_v27 = vpop.f32.mrf.mxu0  ;;  %v3560_v60 = vld [vmem:[#allocation9 + $0x1c4] sm:$0xf]  ;;  %v3280_v8 = vld [vmem:[#allocation9 + $0x1c8] sm:$0xf] }
 0x59b   :  { %v1338_v28 = vsel %vm683_vm4, %v1335_v21, %v1336_v13  ;;  %v3277_v21 = vor.u32 %v3560_v60, %v3274_v5  ;;  %v3281_v38 = vor.u32 %v3563_v11, %v3280_v8  ;;  %v3282_v27 = vld [vmem:[#allocation9 + $0x1d8] sm:$0xf0]  ;;  %v3229_v60 = vor.u32 %v3548_v47, %v3226_v4  ;;  %v3549_v5 = vld [vmem:[#allocation9 + $0x16c] sm:$0xf]  ;;  %v3596_v47 = vld [vmem:[#allocation10 + $0x1e4] sm:$0xf] }
 0x59c   :  { %v1339_v33 = vsel %vm685_vm5, %v1337_v25, %v1338_v28  ;;  %v3561_v25 = vld [vmem:[#allocation9 + $0x1cc] sm:$0xf]  ;;  %v3234_v8 = vld [vmem:[#allocation9 + $0x178] sm:$0xf0] }
 0x59d   :  { %v1341_v41 = vadd.f32 %v1339_v33, %v1277_v32  ;;  %v3285_v32 = vor.u32 %v3561_v25, %v3282_v27  ;;  %1747 = vmatpush.bf16.msrb.mxu2 %v3277_v21  ;;  %v3256_v33 = vld [vmem:[#allocation9 + $0x1a0] sm:$0xf]  ;;  %v3237_v11 = vor.u32 %v3549_v5, %v3234_v8  ;;  %v3546_v27 = vld [vmem:[#allocation9 + $0x14c] sm:$0xf0]  ;;  %v3426_v5 = vld [vmem:[#allocation10 + $0x1f8] sm:$0xf0] }
 0x59e   :  { %v3400_v8 = vld [vmem:[#allocation10 + $0x1c0] sm:$0xf] }
 0x59f   :  { %v3172_v43 = vmul.f32 -1.442695, %v1341_v41  ;;  %v1302_v44 = vpop.f32.mrf.mxu2  ;;  %v1362_v62 = vrot.slane %v1341_v41, 3  ;;  %v3558_v41 = vld [vmem:[#allocation9 + $0x1ac] sm:$0xf0]  ;;  %1773 = vmatpush.bf16.msra.mxu0 %v3285_v32 }
 0x5a0   :  { %v1315_v48 = vpop.f32.mrf.mxu3  ;;  %v3556_v44 = vld [vmem:[#allocation9 + $0x1a4] sm:$0xf]  ;;  %v3210_v32 = vld [vmem:[#allocation9 + $0x150] sm:$0xf0] }
 0x5a1   :  { %3670 = vpow2.f32 %v3172_v43  ;;  %v3257_v43 = vor.u32 %v3558_v41, %v3256_v33  ;;  %v3258_v48 = vld [vmem:[#allocation9 + $0x1b0] sm:$0xf0] }
 0x5a3   :  { %1735 = vmatpush.bf16.msrb.mxu1 %v3257_v43  ;;  %v3216_v43 = vld [vmem:[#allocation9 + $0x148] sm:$0xf] }
 0x5a7   :  { %v3671_v52 = vpop.eup %3670 }
 0x5a8   :  { %v1345_v53 = vadd.f32 1.0, %v3671_v52  ;;  %v3264_v52 = vld [vmem:[#allocation9 + $0x1a8] sm:$0xf] }
 0x5aa   :  { %3672 = vrcp.f32 %v1345_v53  ;;  %v1357_v6 = vand.u32 2147483648, %v1345_v53  ;;  %v1355_v10 = vand.u32 2147483647, %v1345_v53  ;;  %vm1351_vm13 = vweird.f32 %v1345_v53 }
 0x5ab   :  { %3674 = vtanh.f32 %v1362_v62  ;;  %v3266_v62 = vld [vmem:[#allocation9 + $0x1b8] sm:$0xf0] }
 0x5ac   :  { %v1358_v18 = vor.u32 1.1754944e-38, %v1357_v6  ;;  %vm1356_vm0 = vcmp.eq.f32.partialorder %v1355_v10, 8.507059e+37  ;;  %v3240_v10 = vld [vmem:[#allocation9 + $0x180] sm:$0xf] }
 0x5b0   :  { %v3673_v57 = vpop.eup %3672 }
 0x5b1   :  { %v1347_v61 = vmul.f32 %v3673_v57, %v1345_v53  ;;  %vm1352_vm10 = vweird.f32 %v3673_v57  ;;  %v3675_v30 = vpop.eup %3674  ;;  %v3261_v53 = vor.u32 %v3556_v44, %v3258_v48  ;;  %v3547_v44 = vld [vmem:[#allocation9 + $0x154] sm:$0xf0]  ;;  %v3545_v48 = vld [vmem:[#allocation9 + $0x14c] sm:$0xf] }
 0x5b2   :  { %vm1353_vm15 = vmor %vm1351_vm13, %vm1352_vm10 }
 0x5b3   :  { %v1348_v2 = vsub.f32 1.0, %v1347_v61  ;;  %v3557_v61 = vld [vmem:[#allocation9 + $0x1ac] sm:$0xf]  ;;  %1748 = vmatpush.bf16.msrb.mxu2 %v3261_v53  ;;  %v3218_v53 = vld [vmem:[#allocation9 + $0x158] sm:$0xf0] }
 0x5b4   :  { %v3269_v6 = vor.u32 %v3557_v61, %v3266_v62  ;;  %v3192_v61 = vld [vmem:[#allocation9 + $0x120] sm:$0xf]  ;;  %v3542_v62 = vld [vmem:[#allocation9 + $0x12c] sm:$0xf0] }
 0x5b5   :  { %v1349_v7 = vmul.f32 %v3673_v57, %v1348_v2 }
 0x5b6   :  { %1774 = vmatpush.bf16.msra.mxu0 %v3269_v6  ;;  %v3193_v6 = vor.u32 %v3542_v62, %v3192_v61  ;;  %v3588_v61 = vld [vmem:[#allocation10 + $0x1a4] sm:$0xf] }
 0x5b7   :  { %v1350_v14 = vadd.f32 %v3673_v57, %v1349_v7 }
 0x5b9   :  { %v1354_v19 = vsel %vm1353_vm15, %v3673_v57, %v1350_v14  ;;  %v3559_v57 = vld [vmem:[#allocation9 + $0x1b4] sm:$0xf0]  ;;  %v3554_v14 = vld [vmem:[#allocation9 + $0x18c] sm:$0xf0] }
 0x5ba   :  { %v1359_v22 = vsel %vm1356_vm0, %v1358_v18, %v1354_v19  ;;  %v3265_v2 = vor.u32 %v3559_v57, %v3264_v52  ;;  %v3552_v18 = vld [vmem:[#allocation9 + $0x184] sm:$0xf]  ;;  %v3217_v52 = vor.u32 %v3547_v44, %v3216_v43  ;;  %v3221_v57 = vor.u32 %v3545_v48, %v3218_v53  ;;  %v3593_v43 = vld [vmem:[#allocation10 + $0x1cc] sm:$0xf]  ;;  %v3410_v44 = vld [vmem:[#allocation10 + $0x1d8] sm:$0xf0] }
 0x5bb   :  { %v1366_v26 = vrot.slane %v1359_v22, 1  ;;  %v1369_v35 = vmul.f32 %v3675_v30, %v1359_v22  ;;  %v1372_v40 = vrot.slane %v1359_v22, 2  ;;  %v3242_v30 = vld [vmem:[#allocation9 + $0x190] sm:$0xf0]  ;;  %v4462_v53 = vor.u32 %v3593_v43, %v3410_v44  ;;  %v3578_v44 = vld [vmem:[#allocation10 + $0x14c] sm:$0xf0] }
 0x5bd   :  { %v1368_v31 = vmul.f32 %v1366_v26, %v1260_v42  ;;  %v3296_v42 = vld [vmem:[#allocation9 + $0x1e8] sm:$0xf]  ;;  %v3241_v26 = vor.u32 %v3554_v14, %v3240_v10  ;;  %v3543_v14 = vld [vmem:[#allocation9 + $0x134] sm:$0xf0] }
 0x5be   :  { %v3297_v50 = vor.u32 %v3567_v45, %v3296_v42  ;;  %v3224_v42 = vld [vmem:[#allocation9 + $0x160] sm:$0xf]  ;;  %v3550_v45 = vld [vmem:[#allocation9 + $0x16c] sm:$0xf0]  ;;  %v3200_v10 = vld [vmem:[#allocation9 + $0x128] sm:$0xf] }
 0x5bf   :  { %v4423_v39 = vadd.f32 %v1369_v35, %v1368_v31  ;;  %v3248_v31 = vld [vmem:[#allocation9 + $0x188] sm:$0xf]  ;;  %1736 = vmatpush.bf16.msrb.mxu1 %v3241_v26  ;;  %v3225_v54 = vor.u32 %v3550_v45, %v3224_v42  ;;  %v3202_v26 = vld [vmem:[#allocation9 + $0x138] sm:$0xf0]  ;;  %v3598_v45 = vld [vmem:[#allocation10 + $0x1ec] sm:$0xf0] }
 0x5c0   :  { %1759 = vmatpush.bf16.msrb.mxu3 %v3297_v50 }
 0x5c1   :  { %3676 = vtanh.f32 %v4423_v39 }
 0x5c3   :  { %1737 = vmatpush.bf16.msrb.mxu1 %v3225_v54 }
 0x5c4   :  { %1760 = vmatpush.bf16.msrb.mxu3 %v3281_v38  ;;  %v3208_v38 = vld [vmem:[#allocation9 + $0x140] sm:$0xf] }
 0x5c5   :  { %v3209_v33 = vor.u32 %v3546_v27, %v3208_v38  ;;  %v3402_v27 = vld [vmem:[#allocation10 + $0x1d0] sm:$0xf0] }
 0x5c7   :  { %v3677_v46 = vpop.eup %3676  ;;  %1738 = vmatpush.bf16.msrb.mxu1 %v3209_v33 }
 0x5c8   :  { %v1374_v51 = vmul.f32 %v3677_v46, %v1372_v40  ;;  %1761 = vmatpush.bf16.msrb.mxu3 %v3265_v2  ;;  %v3540_v2 = vld [vmem:[#allocation9 + $0x124] sm:$0xf] }
 0x5ca   :  { %v1375_v63 = vpack.c.bf16 %v1374_v51, %v1374_v51  ;;  %v3245_v51 = vor.u32 %v3552_v18, %v3242_v30 }
 0x5cb   :  { %1739 = vmatpush.bf16.msrb.mxu1 %v3193_v6  ;;  %v3386_v6 = vld [vmem:[#allocation10 + $0x1b0] sm:$0xf0] }
 0x5cc   :  { %v1377_v3 = vrot.slane %v1375_v63, 5  ;;  %1395 = vmatmul.bf16.vlgmr.msra.gmra.mxu1 %v1375_v63  ;;  %1408 = vmatmul.bf16.vlgmr.msra.gmra.mxu2 %v1375_v63 }
 0x5cd   :  { %1421 = vmatmul.bf16.vlgmr.msra.gmra.mxu3 %v1375_v63  ;;  %1434 = vmatmul.bf16.vlgmr.msrb.gmra.mxu0 %v1375_v63  ;;  %v3555_v63 = vld [vmem:[#allocation9 + $0x194] sm:$0xf0] }
 0x5ce   :  { %v1383_v16 = vsel %vm4427_vm8, %v1377_v3, %v1382_v9  ;;  %v3553_v3 = vld [vmem:[#allocation9 + $0x18c] sm:$0xf]  ;;  %v3249_v20 = vor.u32 %v3555_v63, %v3248_v31  ;;  %1749 = vmatpush.bf16.msrb.mxu2 %v3245_v51 }
 0x5cf   :  { %1384 = vst [vmem:[#allocation2] sm:$0x8] %v1383_v16  ;;  %v1386_v16 = vld [vmem:[#allocation3 + $0x7] ss:$8 sm:$0xf]  ;;  %v3253_v37 = vor.u32 %v3553_v3, %v3250_v23 }
 0x5d0   :  { %1762 = vmatpush.bf16.msrb.mxu3 %v3249_v20  ;;  %v3178_v3 = vld [vmem:[#allocation9 + $0x110] sm:$0xf0]  ;;  %v3537_v20 = vld [vmem:[#allocation9 + $0x10c] sm:$0xf]  ;;  %v3186_v23 = vld [vmem:[#allocation9 + $0x118] sm:$0xf0] }
 0x5d1   :  { %1775 = vmatpush.bf16.msra.mxu0 %v3253_v37  ;;  %v3189_v42 = vor.u32 %v3537_v20, %v3186_v23  ;;  %v3587_v20 = vld [vmem:[#allocation10 + $0x194] sm:$0xf0]  ;;  %v3585_v23 = vld [vmem:[#allocation10 + $0x18c] sm:$0xf] }
 0x5d2   :  { %1750 = vmatpush.bf16.msrb.mxu2 %v3229_v60  ;;  %v4446_v60 = vor.u32 %v3599_v58, %v3424_v56  ;;  %v3580_v56 = vld [vmem:[#allocation10 + $0x164] sm:$0xf] }
 0x5d4   :  { %1763 = vmatpush.bf16.msrb.mxu3 %v3233_v1  ;;  %v3597_v1 = vld [vmem:[#allocation10 + $0x1ec] sm:$0xf] }
 0x5d5   :  { %1776 = vmatpush.bf16.msra.mxu0 %v3237_v11  ;;  %v4450_v11 = vor.u32 %v3597_v1, %v3426_v5  ;;  %v3354_v1 = vld [vmem:[#allocation10 + $0x170] sm:$0xf0]  ;;  %v3360_v5 = vld [vmem:[#allocation10 + $0x168] sm:$0xf] }
 0x5d8   :  { %1764 = vmatpush.bf16.msrb.mxu3 %v3217_v52 }
 0x5d9   :  { %1777 = vmatpush.bf16.msra.mxu0 %v3221_v57  ;;  %v3590_v57 = vld [vmem:[#allocation10 + $0x1ac] sm:$0xf0] }
 0x649   :  { %v1396_v13 = vpop.f32.mrf.mxu1 }
 0x64a   :  { %v1435_v28 = vpop.f32.mrf.mxu0 }
 0x64b   :  { %v1445_v35 = vrot.slane %v1435_v28, 5  ;;  %v3544_v28 = vld [vmem:[#allocation9 + $0x144] sm:$0xf] }
 0x64c   :  { %v3213_v41 = vor.u32 %v3544_v28, %v3210_v32  ;;  %v3408_v28 = vld [vmem:[#allocation10 + $0x1c8] sm:$0xf] }
 0x64e   :  { %1751 = vmatpush.bf16.msrb.mxu2 %v3213_v41  ;;  %v3595_v41 = vld [vmem:[#allocation10 + $0x1d4] sm:$0xf0] }
 0x64f   :  { %v1409_v7 = vpop.f32.mrf.mxu2  ;;  %v4460_v52 = vor.u32 %v3595_v41, %v3408_v28  ;;  %v3362_v28 = vld [vmem:[#allocation10 + $0x178] sm:$0xf0]  ;;  %v3336_v41 = vld [vmem:[#allocation10 + $0x140] sm:$0xf] }
 0x650   :  { %v1443_v19 = vrot.slane %v1409_v7, 7  ;;  %v1422_v22 = vpop.f32.mrf.mxu3  ;;  %v3194_v7 = vld [vmem:[#allocation9 + $0x130] sm:$0xf0] }
 0x651   :  { %v1444_v40 = vrot.slane %v1422_v22, 6  ;;  %v1398_v46 = vpop.f32.mrf.mxu1  ;;  %v3197_v18 = vor.u32 %v3540_v2, %v3194_v7  ;;  %v3541_v22 = vld [vmem:[#allocation9 + $0x12c] sm:$0xf]  ;;  %v3392_v7 = vld [vmem:[#allocation10 + $0x1a8] sm:$0xf] }
 0x652   :  { %v1446_v9 = vsel %vm681_vm3, %v1396_v13, %v1443_v19  ;;  %v1437_v17 = vpop.f32.mrf.mxu0  ;;  %v3201_v19 = vor.u32 %v3543_v14, %v3200_v10  ;;  %v3205_v30 = vor.u32 %v3541_v22, %v3202_v26  ;;  %v3536_v46 = vld [vmem:[#allocation9 + $0x104] sm:$0xf]  ;;  %v3589_v22 = vld [vmem:[#allocation10 + $0x1ac] sm:$0xf] }
 0x653   :  { %v1447_v36 = vsel %vm683_vm4, %v1444_v40, %v1445_v35  ;;  %1752 = vmatpush.bf16.msrb.mxu2 %v3197_v18  ;;  %v3176_v35 = vld [vmem:[#allocation9 + $0x100] sm:$0xf]  ;;  %v3538_v40 = vld [vmem:[#allocation9 + $0x10c] sm:$0xf0]  ;;  %v3539_v17 = vld [vmem:[#allocation9 + $0x114] sm:$0xf0]  ;;  %v4471_v18 = vor.u32 %v3588_v61, %v3386_v6 }
 0x654   :  { %v1448_v50 = vsel %vm685_vm5, %v1446_v9, %v1447_v36  ;;  %1765 = vmatpush.bf16.msrb.mxu3 %v3201_v19  ;;  %v3177_v63 = vor.u32 %v3538_v40, %v3176_v35  ;;  %v3184_v9 = vld [vmem:[#allocation9 + $0x108] sm:$0xf]  ;;  %1778 = vmatpush.bf16.msra.mxu0 %v3205_v30  ;;  %v3416_v36 = vld [vmem:[#allocation10 + $0x1e0] sm:$0xf]  ;;  %v3591_v19 = vld [vmem:[#allocation10 + $0x1b4] sm:$0xf0] }
 0x655   :  { %v4436_v59 = vadd.f32 %v1448_v50, %v1386_v16  ;;  %v3181_v16 = vor.u32 %v3536_v46, %v3178_v3  ;;  %v3185_v37 = vor.u32 %v3539_v17, %v3184_v9  ;;  %v3418_v50 = vld [vmem:[#allocation10 + $0x1f0] sm:$0xf0]  ;;  %v4442_v54 = vor.u32 %v3598_v45, %v3416_v36  ;;  %v3394_v30 = vld [vmem:[#allocation10 + $0x1b8] sm:$0xf0]  ;;  %v3586_v35 = vld [vmem:[#allocation10 + $0x18c] sm:$0xf0] }
 0x656   :  { %1740 = vmatpush.bf16.msrb.mxu1 %v3177_v63  ;;  %v4444_v4 = vor.u32 %v3596_v47, %v3418_v50  ;;  %v4474_v26 = vor.u32 %v3591_v19, %v3392_v7  ;;  %v4476_v46 = vor.u32 %v3589_v22, %v3394_v30  ;;  %v3584_v63 = vld [vmem:[#allocation10 + $0x184] sm:$0xf]  ;;  %v3370_v3 = vld [vmem:[#allocation10 + $0x190] sm:$0xf0]  ;;  %v3376_v9 = vld [vmem:[#allocation10 + $0x188] sm:$0xf]  ;;  %v4511_v22 = vor.u32 %v3578_v44, %v3336_v41 }
 0x657   :  { %v3173_v13 = vmul.f32 -1.442695, %v4436_v59  ;;  %v1411_v21 = vpop.f32.mrf.mxu2  ;;  %1753 = vmatpush.bf16.msrb.mxu2 %v3181_v16  ;;  %v1471_v38 = vrot.slane %v4436_v59, 3  ;;  %v3384_v59 = vld [vmem:[#allocation10 + $0x1a0] sm:$0xf]  ;;  %v4483_v17 = vor.u32 %v3584_v63, %v3370_v3 }
 0x658   :  { %v1424_v25 = vpop.f32.mrf.mxu3  ;;  %1766 = vmatpush.bf16.msrb.mxu3 %v3185_v37  ;;  %1779 = vmatpush.bf16.msra.mxu0 %v3189_v42  ;;  %v3592_v21 = vld [vmem:[#allocation10 + $0x1c4] sm:$0xf]  ;;  %v4467_v2 = vor.u32 %v3590_v57, %v3384_v59  ;;  %v3378_v36 = vld [vmem:[#allocation10 + $0x198] sm:$0xf0]  ;;  %v3352_v47 = vld [vmem:[#allocation10 + $0x160] sm:$0xf] }
 0x659   :  { %3678 = vpow2.f32 %v3173_v13  ;;  %v3594_v13 = vld [vmem:[#allocation10 + $0x1cc] sm:$0xf0]  ;;  %v4457_v33 = vor.u32 %v3592_v21, %v3402_v27  ;;  %v4490_v45 = vor.u32 %v3585_v23, %v3378_v36  ;;  %v3581_v27 = vld [vmem:[#allocation10 + $0x16c] sm:$0xf]  ;;  %v3338_v61 = vld [vmem:[#allocation10 + $0x150] sm:$0xf0] }
 0x65a   :  { %1950 = vmatpush.bf16.msra.mxu1 %v4442_v54  ;;  %v4454_v25 = vor.u32 %v3594_v13, %v3400_v8  ;;  %v3582_v50 = vld [vmem:[#allocation10 + $0x16c] sm:$0xf0]  ;;  %v3583_v8 = vld [vmem:[#allocation10 + $0x174] sm:$0xf0]  ;;  %v4505_v57 = vor.u32 %v3581_v27, %v3362_v28  ;;  %v3346_v19 = vld [vmem:[#allocation10 + $0x158] sm:$0xf0] }
 0x65b   :  { %1963 = vmatpush.bf16.msra.mxu2 %v4444_v4  ;;  %v4496_v21 = vor.u32 %v3582_v50, %v3352_v47  ;;  %v3579_v6 = vld [vmem:[#allocation10 + $0x154] sm:$0xf0]  ;;  %v3574_v63 = vld [vmem:[#allocation10 + $0x12c] sm:$0xf0]  ;;  %v3322_v3 = vld [vmem:[#allocation10 + $0x130] sm:$0xf0] }
 0x65c   :  { %1976 = vmatpush.bf16.msra.mxu3 %v4446_v60  ;;  %1989 = vmatpush.bf16.msrb.mxu0 %v4450_v11  ;;  %v3575_v23 = vld [vmem:[#allocation10 + $0x134] sm:$0xf0]  ;;  %v3573_v36 = vld [vmem:[#allocation10 + $0x12c] sm:$0xf]  ;;  %v3304_v50 = vld [vmem:[#allocation10 + $0x100] sm:$0xf] }
 0x65d   :  { %v3312_v27 = vld [vmem:[#allocation10 + $0x108] sm:$0xf]  ;;  %v3571_v28 = vld [vmem:[#allocation10 + $0x114] sm:$0xf0]  ;;  %v3569_v41 = vld [vmem:[#allocation10 + $0x10c] sm:$0xf] }
 0x65e   :  { %1951 = vmatpush.bf16.msra.mxu1 %v4454_v25 }
 0x65f   :  { %v3679_v31 = vpop.eup %3678  ;;  %1964 = vmatpush.bf16.msra.mxu2 %v4457_v33 }
 0x660   :  { %v4439_v51 = vadd.f32 1.0, %v3679_v31  ;;  %1977 = vmatpush.bf16.msra.mxu3 %v4460_v52  ;;  %1990 = vmatpush.bf16.msrb.mxu0 %v4462_v53  ;;  %v3368_v31 = vld [vmem:[#allocation10 + $0x180] sm:$0xf] }
 0x661   :  { %v4481_v16 = vor.u32 %v3586_v35, %v3368_v31  ;;  %v3320_v31 = vld [vmem:[#allocation10 + $0x120] sm:$0xf] }
 0x662   :  { %3680 = vrcp.f32 %v4439_v51  ;;  %v1464_v62 = vand.u32 2147483647, %v4439_v51  ;;  %v1466_v14 = vand.u32 2147483648, %v4439_v51  ;;  %vm1460_vm13 = vweird.f32 %v4439_v51  ;;  %1952 = vmatpush.bf16.msra.mxu1 %v4467_v2 }
 0x663   :  { %3682 = vtanh.f32 %v1471_v38  ;;  %1965 = vmatpush.bf16.msra.mxu2 %v4471_v18  ;;  %v4498_v38 = vor.u32 %v3580_v56, %v3354_v1  ;;  %v3568_v1 = vld [vmem:[#allocation10 + $0x104] sm:$0xf] }
 0x664   :  { %vm1465_vm0 = vcmp.eq.f32.partialorder %v1464_v62, 8.507059e+37  ;;  %v1467_v42 = vor.u32 1.1754944e-38, %v1466_v14  ;;  %1978 = vmatpush.bf16.msra.mxu3 %v4474_v26  ;;  %1991 = vmatpush.bf16.msrb.mxu0 %v4476_v46  ;;  %v3344_v62 = vld [vmem:[#allocation10 + $0x148] sm:$0xf]  ;;  %v3577_v14 = vld [vmem:[#allocation10 + $0x14c] sm:$0xf] }
 0x666   :  { %1953 = vmatpush.bf16.msra.mxu1 %v4481_v16 }
 0x667   :  { %1966 = vmatpush.bf16.msra.mxu2 %v4483_v17 }
 0x668   :  { %v3681_v32 = vpop.eup %3680  ;;  %1992 = vmatpush.bf16.msrb.mxu0 %v4490_v45 }
 0x669   :  { %v1456_v48 = vmul.f32 %v3681_v32, %v4439_v51  ;;  %vm1461_vm10 = vweird.f32 %v3681_v32  ;;  %v4487_v51 = vor.u32 %v3587_v20, %v3376_v9  ;;  %v3683_v59 = vpop.eup %3682  ;;  %v4519_v9 = vor.u32 %v3577_v14, %v3346_v19  ;;  %v3328_v20 = vld [vmem:[#allocation10 + $0x128] sm:$0xf] }
 0x66a   :  { %vm1462_vm15 = vmor %vm1460_vm13, %vm1461_vm10  ;;  %1954 = vmatpush.bf16.msra.mxu1 %v4496_v21  ;;  %v4528_v56 = vor.u32 %v3575_v23, %v3328_v20 }
 0x66b   :  { %v1457_v10 = vsub.f32 1.0, %v1456_v48  ;;  %1979 = vmatpush.bf16.msra.mxu3 %v4487_v51  ;;  %v3576_v48 = vld [vmem:[#allocation10 + $0x144] sm:$0xf]  ;;  %1967 = vmatpush.bf16.msra.mxu2 %v4498_v38  ;;  %vm4551_vm10 = vmand %vm1379_vm2, %vm1490_vm7 }
 0x66c   :  { %v4513_v30 = vor.u32 %v3576_v48, %v3338_v61  ;;  %1993 = vmatpush.bf16.msrb.mxu0 %v4505_v57 }
 0x66d   :  { %v1458_v40 = vmul.f32 %v3681_v32, %v1457_v10 }
 0x66e   :  { %1955 = vmatpush.bf16.msra.mxu1 %v4511_v22 }
 0x66f   :  { %v1459_v37 = vadd.f32 %v3681_v32, %v1458_v40  ;;  %v4516_v40 = vor.u32 %v3579_v6, %v3344_v62  ;;  %1968 = vmatpush.bf16.msra.mxu2 %v4513_v30  ;;  %v4541_v62 = vor.u32 %v3571_v28, %v3312_v27 }
 0x670   :  { %1994 = vmatpush.bf16.msrb.mxu0 %v4519_v9 }
 0x671   :  { %v1463_v58 = vsel %vm1462_vm15, %v3681_v32, %v1459_v37  ;;  %v4502_v32 = vor.u32 %v3583_v8, %v3360_v5  ;;  %v3330_v37 = vld [vmem:[#allocation10 + $0x138] sm:$0xf0]  ;;  %v3306_v5 = vld [vmem:[#allocation10 + $0x110] sm:$0xf0] }
 0x672   :  { %v4492_v13 = vsel %vm1465_vm0, %v1467_v42, %v1463_v58  ;;  %v4523_v42 = vor.u32 %v3574_v63, %v3320_v31  ;;  %v3570_v58 = vld [vmem:[#allocation10 + $0x10c] sm:$0xf0]  ;;  %v4531_v8 = vor.u32 %v3573_v36, %v3330_v37  ;;  %v1492_v31 = vld [vmem:[#allocation2] sm:$0x8] }
 0x673   :  { %v1475_v43 = vrot.slane %v4492_v13, 1  ;;  %v1478_v10 = vmul.f32 %v3683_v59, %v4492_v13  ;;  %1980 = vmatpush.bf16.msra.mxu3 %v4502_v32  ;;  %v1481_v44 = vrot.slane %v4492_v13, 2  ;;  %v4536_v48 = vor.u32 %v3570_v58, %v3304_v50 }
 0x674   :  { %1956 = vmatpush.bf16.msra.mxu1 %v4523_v42  ;;  %v4538_v59 = vor.u32 %v3568_v1, %v3306_v5  ;;  %1995 = vmatpush.bf16.msrb.mxu0 %v4531_v8 }
 0x675   :  { %v1477_v7 = vmul.f32 %v1475_v43, %v4423_v39  ;;  %v3572_v39 = vld [vmem:[#allocation10 + $0x124] sm:$0xf]  ;;  %v3314_v43 = vld [vmem:[#allocation10 + $0x118] sm:$0xf0] }
 0x676   :  { %v4525_v47 = vor.u32 %v3572_v39, %v3322_v3 }
 0x677   :  { %v1479_v35 = vadd.f32 %v1478_v10, %v1477_v7  ;;  %1981 = vmatpush.bf16.msra.mxu3 %v4516_v40  ;;  %v4544_v7 = vor.u32 %v3569_v41, %v3314_v43 }
 0x678   :  { %1969 = vmatpush.bf16.msra.mxu2 %v4525_v47  ;;  %1957 = vmatpush.bf16.msra.mxu1 %v4536_v48 }
 0x679   :  { %3684 = vtanh.f32 %v1479_v35  ;;  %1996 = vmatpush.bf16.msrb.mxu0 %v4544_v7 }
 0x67b   :  { %1982 = vmatpush.bf16.msra.mxu3 %v4528_v56 }
 0x67c   :  { %1970 = vmatpush.bf16.msra.mxu2 %v4538_v59 }
 0x67f   :  { %v3685_v61 = vpop.eup %3684  ;;  %1983 = vmatpush.bf16.msra.mxu3 %v4541_v62 }
 0x680   :  { %v1483_v6 = vmul.f32 %v3685_v61, %v1481_v44 }
 0x682   :  { %v1484_v10 = vpack.c.bf16 %v1483_v6, %v1483_v6 }
 0x684   :  { %v1486_v13 = vshll.u32 %v1484_v10, 16 }
 0x686   :  { %v1488_v19 = vrot.slane %v1486_v13, 5 }
 0x688   :  { %v1493_v35 = vsel %vm4551_vm10, %v1488_v19, %v1492_v31 }
 0x689   :  { %1494 = vst [vmem:[#allocation2] sm:$0x8] %v1493_v35 }
 0x690   :  { %v1563_v63 = vld [vmem:[#allocation2] sm:$0xf] }
 0x691   :  { %1741 = vmatmul.bf16.vlgmr.msrb.gmra.mxu1 %v1563_v63  ;;  %1754 = vmatmul.bf16.vlgmr.msrb.gmra.mxu2 %v1563_v63 }
 0x692   :  { %1767 = vmatmul.bf16.vlgmr.msrb.gmra.mxu3 %v1563_v63  ;;  %1780 = vmatmul.bf16.vlgmr.msra.gmra.mxu0 %v1563_v63 }
 0x693   :  { %2052 = vmatpush.bf16.msrb.mxu1 %v4442_v54  ;;  %2065 = vmatpush.bf16.msrb.mxu2 %v4444_v4 }
 0x694   :  { %2078 = vmatpush.bf16.msrb.mxu3 %v4446_v60  ;;  %2091 = vmatpush.bf16.msra.mxu0 %v4450_v11 }
 0x697   :  { %2053 = vmatpush.bf16.msrb.mxu1 %v4454_v25  ;;  %2066 = vmatpush.bf16.msrb.mxu2 %v4457_v33 }
 0x698   :  { %2079 = vmatpush.bf16.msrb.mxu3 %v4460_v52  ;;  %2092 = vmatpush.bf16.msra.mxu0 %v4462_v53 }
 0x69b   :  { %2054 = vmatpush.bf16.msrb.mxu1 %v4467_v2  ;;  %2067 = vmatpush.bf16.msrb.mxu2 %v4471_v18 }
 0x69c   :  { %2080 = vmatpush.bf16.msrb.mxu3 %v4474_v26  ;;  %2093 = vmatpush.bf16.msra.mxu0 %v4476_v46 }
 0x69f   :  { %2055 = vmatpush.bf16.msrb.mxu1 %v4481_v16  ;;  %2068 = vmatpush.bf16.msrb.mxu2 %v4483_v17 }
 0x6a0   :  { %2081 = vmatpush.bf16.msrb.mxu3 %v4487_v51  ;;  %2094 = vmatpush.bf16.msra.mxu0 %v4490_v45 }
 0x6a1   :  { %1958 = vmatmul.bf16.vlgmr.msra.gmra.mxu1 %v3938_v34  ;;  %1971 = vmatmul.bf16.vlgmr.msra.gmra.mxu2 %v3938_v34 }
 0x6a2   :  { %1984 = vmatmul.bf16.vlgmr.msra.gmra.mxu3 %v3938_v34  ;;  %1997 = vmatmul.bf16.vlgmr.msrb.gmra.mxu0 %v3938_v34  ;;  %v1562_v34 = vld [vmem:[#allocation12 + $0x4] sm:$0xf] }
 0x6a3   :  { %2056 = vmatpush.bf16.msrb.mxu1 %v4496_v21  ;;  %2069 = vmatpush.bf16.msrb.mxu2 %v4498_v38  ;;  %v1565_v39 = vperm.slane %v1562_v34, 0  ;;  %v1568_v3 = vperm.slane %v1562_v34, 3  ;;  %v1566_v50 = vperm.slane %v1562_v34, 1  ;;  %v1567_v58 = vperm.slane %v1562_v34, 2 }
 0x6a4   :  { %2082 = vmatpush.bf16.msrb.mxu3 %v4502_v32  ;;  %2095 = vmatpush.bf16.msra.mxu0 %v4505_v57 }
 0x6a7   :  { %2057 = vmatpush.bf16.msrb.mxu1 %v4511_v22  ;;  %2070 = vmatpush.bf16.msrb.mxu2 %v4513_v30 }
 0x6a8   :  { %2083 = vmatpush.bf16.msrb.mxu3 %v4516_v40  ;;  %2096 = vmatpush.bf16.msra.mxu0 %v4519_v9 }
 0x6ab   :  { %2058 = vmatpush.bf16.msrb.mxu1 %v4523_v42  ;;  %2071 = vmatpush.bf16.msrb.mxu2 %v4525_v47 }
 0x6ac   :  { %2084 = vmatpush.bf16.msrb.mxu3 %v4528_v56  ;;  %2097 = vmatpush.bf16.msra.mxu0 %v4531_v8 }
 0x6af   :  { %2059 = vmatpush.bf16.msrb.mxu1 %v4536_v48  ;;  %2072 = vmatpush.bf16.msrb.mxu2 %v4538_v59 }
 0x6b0   :  { %2085 = vmatpush.bf16.msrb.mxu3 %v4541_v62  ;;  %2098 = vmatpush.bf16.msra.mxu0 %v4544_v7 }
 0x6b3   :  { %2158 = vmatpush.bf16.msra.mxu1 %v4442_v54  ;;  %2171 = vmatpush.bf16.msra.mxu2 %v4444_v4 }
 0x6b4   :  { %2184 = vmatpush.bf16.msra.mxu3 %v4446_v60  ;;  %2197 = vmatpush.bf16.msrb.mxu0 %v4450_v11 }
 0x6b7   :  { %2159 = vmatpush.bf16.msra.mxu1 %v4454_v25  ;;  %2172 = vmatpush.bf16.msra.mxu2 %v4457_v33 }
 0x6b8   :  { %2185 = vmatpush.bf16.msra.mxu3 %v4460_v52  ;;  %2198 = vmatpush.bf16.msrb.mxu0 %v4462_v53 }
 0x6bb   :  { %2160 = vmatpush.bf16.msra.mxu1 %v4467_v2  ;;  %2173 = vmatpush.bf16.msra.mxu2 %v4471_v18 }
 0x6bc   :  { %2186 = vmatpush.bf16.msra.mxu3 %v4474_v26  ;;  %2199 = vmatpush.bf16.msrb.mxu0 %v4476_v46 }
 0x6bf   :  { %2161 = vmatpush.bf16.msra.mxu1 %v4481_v16  ;;  %2174 = vmatpush.bf16.msra.mxu2 %v4483_v17 }
 0x6c0   :  { %2187 = vmatpush.bf16.msra.mxu3 %v4487_v51  ;;  %2200 = vmatpush.bf16.msrb.mxu0 %v4490_v45 }
 0x6c3   :  { %2162 = vmatpush.bf16.msra.mxu1 %v4496_v21  ;;  %2175 = vmatpush.bf16.msra.mxu2 %v4498_v38 }
 0x6c4   :  { %2188 = vmatpush.bf16.msra.mxu3 %v4502_v32  ;;  %2201 = vmatpush.bf16.msrb.mxu0 %v4505_v57 }
 0x6c7   :  { %2163 = vmatpush.bf16.msra.mxu1 %v4511_v22  ;;  %2176 = vmatpush.bf16.msra.mxu2 %v4513_v30 }
 0x6c8   :  { %2189 = vmatpush.bf16.msra.mxu3 %v4516_v40  ;;  %2202 = vmatpush.bf16.msrb.mxu0 %v4519_v9 }
 0x6cb   :  { %2164 = vmatpush.bf16.msra.mxu1 %v4523_v42  ;;  %2177 = vmatpush.bf16.msra.mxu2 %v4525_v47 }
 0x6cc   :  { %2190 = vmatpush.bf16.msra.mxu3 %v4528_v56  ;;  %2203 = vmatpush.bf16.msrb.mxu0 %v4531_v8 }
 0x6cf   :  { %2165 = vmatpush.bf16.msra.mxu1 %v4536_v48  ;;  %2178 = vmatpush.bf16.msra.mxu2 %v4538_v59 }
 0x6d0   :  { %2191 = vmatpush.bf16.msra.mxu3 %v4541_v62  ;;  %2204 = vmatpush.bf16.msrb.mxu0 %v4544_v7 }
 0x70e   :  { %v1742_v20 = vpop.f32.mrf.mxu1 }
 0x70f   :  { %v1743_v23 = vadd.f32 %v1742_v20, %v1565_v39  ;;  %v1781_v36 = vpop.f32.mrf.mxu0 }
 0x710   :  { %v1782_v37 = vadd.f32 %v1781_v36, %v1568_v3 }
 0x711   :  { %1785 = vst [vmem:[#allocation3] sm:$0xff] %v1743_v23 }
 0x712   :  { %1788 = vst [vmem:[#allocation3 + $0x18] sm:$0xff] %v1782_v37 }
 0x714   :  { %v1755_v1 = vpop.f32.mrf.mxu2 }
 0x715   :  { %v1756_v5 = vadd.f32 %v1755_v1, %v1566_v50  ;;  %v1768_v27 = vpop.f32.mrf.mxu3 }
 0x716   :  { %v1769_v28 = vadd.f32 %v1768_v27, %v1567_v58  ;;  %v1744_v41 = vpop.f32.mrf.mxu1 }
 0x717   :  { %1786 = vst [vmem:[#allocation3 + $0x8] sm:$0xff] %v1756_v5  ;;  %v1783_v43 = vpop.f32.mrf.mxu0 }
 0x718   :  { %1787 = vst [vmem:[#allocation3 + $0x10] sm:$0xff] %v1769_v28 }
 0x71c   :  { %v1757_v44 = vpop.f32.mrf.mxu2 }
 0x71d   :  { %v1770_v61 = vpop.f32.mrf.mxu3 }
 0x71e   :  { %v1959_v6 = vpop.f32.mrf.mxu1 }
 0x71f   :  { %v1998_v10 = vpop.f32.mrf.mxu0  ;;  %v1789_v23 = vld [vmem:[#allocation3] ss:$8 sm:$0xf] }
 0x720   :  { %v2008_v13 = vrot.slane %v1998_v10, 5 }
 0x724   :  { %v1972_v19 = vpop.f32.mrf.mxu2 }
 0x725   :  { %v2006_v31 = vrot.slane %v1972_v19, 7  ;;  %v1985_v35 = vpop.f32.mrf.mxu3 }
 0x726   :  { %v2007_v63 = vrot.slane %v1985_v35, 6  ;;  %v1961_v39 = vpop.f32.mrf.mxu1 }
 0x727   :  { %v2009_v34 = vsel %vm681_vm3, %v1959_v6, %v2006_v31  ;;  %v2000_v3 = vpop.f32.mrf.mxu0 }
 0x728   :  { %v2010_v20 = vsel %vm683_vm4, %v2007_v63, %v2008_v13 }
 0x729   :  { %v2011_v36 = vsel %vm685_vm5, %v2009_v34, %v2010_v20 }
 0x72a   :  { %v2013_v37 = vadd.f32 %v2011_v36, %v1789_v23 }
 0x72c   :  { %v3430_v50 = vmul.f32 -1.442695, %v2013_v37  ;;  %v1974_v58 = vpop.f32.mrf.mxu2  ;;  %v2034_v43 = vrot.slane %v2013_v37, 3 }
 0x72d   :  { %v1987_v1 = vpop.f32.mrf.mxu3  ;;  %v2048_v58 = vld [vmem:[#allocation2] sm:$0x1] }
 0x72e   :  { %3686 = vpow2.f32 %v3430_v50 }
 0x734   :  { %v3687_v5 = vpop.eup %3686 }
 0x735   :  { %v2017_v27 = vadd.f32 1.0, %v3687_v5 }
 0x737   :  { %3688 = vrcp.f32 %v2017_v27  ;;  %v2029_v61 = vand.u32 2147483648, %v2017_v27  ;;  %v2027_v10 = vand.u32 2147483647, %v2017_v27  ;;  %vm2023_vm13 = vweird.f32 %v2017_v27 }
 0x738   :  { %3690 = vtanh.f32 %v2034_v43 }
 0x739   :  { %v2030_v19 = vor.u32 1.1754944e-38, %v2029_v61  ;;  %vm2028_vm0 = vcmp.eq.f32.partialorder %v2027_v10, 8.507059e+37 }
 0x73d   :  { %v3689_v28 = vpop.eup %3688 }
 0x73e   :  { %v2019_v41 = vmul.f32 %v3689_v28, %v2017_v27  ;;  %vm2024_vm2 = vweird.f32 %v3689_v28  ;;  %v3691_v39 = vpop.eup %3690 }
 0x73f   :  { %vm2025_vm15 = vmor %vm2023_vm13, %vm2024_vm2 }
 0x740   :  { %v2020_v44 = vsub.f32 1.0, %v2019_v41 }
 0x742   :  { %v2021_v6 = vmul.f32 %v3689_v28, %v2020_v44 }
 0x744   :  { %v2022_v13 = vadd.f32 %v3689_v28, %v2021_v6 }
 0x746   :  { %v2026_v31 = vsel %vm2025_vm15, %v3689_v28, %v2022_v13 }
 0x747   :  { %v2031_v35 = vsel %vm2028_vm0, %v2030_v19, %v2026_v31  ;;  %v2051_v19 = vld [vmem:[#allocation3 + $0x1] ss:$8 sm:$0xf] }
 0x748   :  { %v2038_v63 = vrot.slane %v2031_v35, 1  ;;  %v2041_v3 = vmul.f32 %v3691_v39, %v2031_v35  ;;  %v2044_v23 = vrot.slane %v2031_v35, 2 }
 0x74a   :  { %v2040_v34 = vmul.f32 0.0, %v2038_v63 }
 0x74c   :  { %v4628_v20 = vadd.f32 %v2041_v3, %v2040_v34 }
 0x74e   :  { %3692 = vtanh.f32 %v4628_v20 }
 0x754   :  { %v3693_v36 = vpop.eup %3692 }
 0x755   :  { %v2046_v37 = vmul.f32 %v3693_v36, %v2044_v23 }
 0x757   :  { %v2047_v50 = vpack.c.bf16 %v2046_v37, %v2046_v37 }
 0x759   :  { %v2049_v1 = vsel %vm4187_vm11, %v2047_v50, %v2048_v58  ;;  %2060 = vmatmul.bf16.vlgmr.msrb.gmra.mxu1 %v2047_v50  ;;  %2073 = vmatmul.bf16.vlgmr.msrb.gmra.mxu2 %v2047_v50 }
 0x75a   :  { %2050 = vst [vmem:[#allocation2] sm:$0x1] %v2049_v1  ;;  %2086 = vmatmul.bf16.vlgmr.msrb.gmra.mxu3 %v2047_v50  ;;  %2099 = vmatmul.bf16.vlgmr.msra.gmra.mxu0 %v2047_v50 }
 0x75b   :  { %2263 = vmatpush.bf16.msrb.mxu1 %v4442_v54  ;;  %2276 = vmatpush.bf16.msrb.mxu2 %v4444_v4 }
 0x75c   :  { %2289 = vmatpush.bf16.msrb.mxu3 %v4446_v60  ;;  %2302 = vmatpush.bf16.msra.mxu0 %v4450_v11 }
 0x75f   :  { %2264 = vmatpush.bf16.msrb.mxu1 %v4454_v25  ;;  %2277 = vmatpush.bf16.msrb.mxu2 %v4457_v33 }
 0x760   :  { %2290 = vmatpush.bf16.msrb.mxu3 %v4460_v52  ;;  %2303 = vmatpush.bf16.msra.mxu0 %v4462_v53 }
 0x763   :  { %2265 = vmatpush.bf16.msrb.mxu1 %v4467_v2  ;;  %2278 = vmatpush.bf16.msrb.mxu2 %v4471_v18 }
 0x764   :  { %2291 = vmatpush.bf16.msrb.mxu3 %v4474_v26  ;;  %2304 = vmatpush.bf16.msra.mxu0 %v4476_v46 }
 0x767   :  { %2266 = vmatpush.bf16.msrb.mxu1 %v4481_v16  ;;  %2279 = vmatpush.bf16.msrb.mxu2 %v4483_v17 }
 0x768   :  { %2292 = vmatpush.bf16.msrb.mxu3 %v4487_v51  ;;  %2305 = vmatpush.bf16.msra.mxu0 %v4490_v45 }
 0x76b   :  { %2267 = vmatpush.bf16.msrb.mxu1 %v4496_v21  ;;  %2280 = vmatpush.bf16.msrb.mxu2 %v4498_v38 }
 0x76c   :  { %2293 = vmatpush.bf16.msrb.mxu3 %v4502_v32  ;;  %2306 = vmatpush.bf16.msra.mxu0 %v4505_v57 }
 0x76f   :  { %2268 = vmatpush.bf16.msrb.mxu1 %v4511_v22  ;;  %2281 = vmatpush.bf16.msrb.mxu2 %v4513_v30 }
 0x770   :  { %2294 = vmatpush.bf16.msrb.mxu3 %v4516_v40  ;;  %2307 = vmatpush.bf16.msra.mxu0 %v4519_v9 }
 0x773   :  { %2269 = vmatpush.bf16.msrb.mxu1 %v4523_v42  ;;  %2282 = vmatpush.bf16.msrb.mxu2 %v4525_v47 }
 0x774   :  { %2295 = vmatpush.bf16.msrb.mxu3 %v4528_v56  ;;  %2308 = vmatpush.bf16.msra.mxu0 %v4531_v8 }
 0x777   :  { %2270 = vmatpush.bf16.msrb.mxu1 %v4536_v48  ;;  %2283 = vmatpush.bf16.msrb.mxu2 %v4538_v59 }
 0x778   :  { %2296 = vmatpush.bf16.msrb.mxu3 %v4541_v62  ;;  %2309 = vmatpush.bf16.msra.mxu0 %v4544_v7 }
 0x7d6   :  { %v2061_v24 = vpop.f32.mrf.mxu1 }
 0x7d7   :  { %v2100_v5 = vpop.f32.mrf.mxu0 }
 0x7d8   :  { %v2110_v43 = vrot.slane %v2100_v5, 5 }
 0x7dc   :  { %v2074_v27 = vpop.f32.mrf.mxu2 }
 0x7dd   :  { %v2108_v28 = vrot.slane %v2074_v27, 7  ;;  %v2087_v41 = vpop.f32.mrf.mxu3 }
 0x7de   :  { %v2109_v44 = vrot.slane %v2087_v41, 6  ;;  %v2063_v61 = vpop.f32.mrf.mxu1 }
 0x7df   :  { %v2111_v6 = vsel %vm681_vm3, %v2061_v24, %v2108_v28  ;;  %v2102_v10 = vpop.f32.mrf.mxu0 }
 0x7e0   :  { %v2112_v13 = vsel %vm683_vm4, %v2109_v44, %v2110_v43 }
 0x7e1   :  { %v2113_v31 = vsel %vm685_vm5, %v2111_v6, %v2112_v13 }
 0x7e2   :  { %v2115_v35 = vadd.f32 %v2113_v31, %v2051_v19 }
 0x7e4   :  { %v3431_v63 = vmul.f32 -1.442695, %v2115_v35  ;;  %v2076_v39 = vpop.f32.mrf.mxu2  ;;  %v2136_v50 = vrot.slane %v2115_v35, 3 }
 0x7e5   :  { %v2089_v34 = vpop.f32.mrf.mxu3 }
 0x7e6   :  { %3694 = vpow2.f32 %v3431_v63  ;;  %v2154_v34 = vld [vmem:[#allocation2] sm:$0x1] }
 0x7ec   :  { %v3695_v3 = vpop.eup %3694 }
 0x7ed   :  { %v2119_v23 = vadd.f32 1.0, %v3695_v3 }
 0x7ef   :  { %3696 = vrcp.f32 %v2119_v23  ;;  %v2131_v1 = vand.u32 2147483648, %v2119_v23  ;;  %v2129_v5 = vand.u32 2147483647, %v2119_v23  ;;  %vm2125_vm7 = vweird.f32 %v2119_v23 }
 0x7f0   :  { %3698 = vtanh.f32 %v2136_v50 }
 0x7f1   :  { %v2132_v28 = vor.u32 1.1754944e-38, %v2131_v1  ;;  %vm2130_vm13 = vcmp.eq.f32.partialorder %v2129_v5, 8.507059e+37 }
 0x7f5   :  { %v3697_v36 = vpop.eup %3696 }
 0x7f6   :  { %v2121_v37 = vmul.f32 %v3697_v36, %v2119_v23  ;;  %vm2126_vm11 = vweird.f32 %v3697_v36  ;;  %v3699_v61 = vpop.eup %3698 }
 0x7f7   :  { %vm2127_vm2 = vmor %vm2125_vm7, %vm2126_vm11 }
 0x7f8   :  { %v2122_v58 = vsub.f32 1.0, %v2121_v37 }
 0x7fa   :  { %v2123_v24 = vmul.f32 %v3697_v36, %v2122_v58 }
 0x7fc   :  { %v2124_v27 = vadd.f32 %v3697_v36, %v2123_v24 }
 0x7fe   :  { %v2128_v41 = vsel %vm2127_vm2, %v3697_v36, %v2124_v27 }
 0x7ff   :  { %v2133_v43 = vsel %vm2130_vm13, %v2132_v28, %v2128_v41  ;;  %v2157_v28 = vld [vmem:[#allocation3 + $0x2] ss:$8 sm:$0xf] }
 0x800   :  { %v2140_v44 = vrot.slane %v2133_v43, 1  ;;  %v2143_v10 = vmul.f32 %v3699_v61, %v2133_v43  ;;  %v2146_v19 = vrot.slane %v2133_v43, 2 }
 0x802   :  { %v2142_v6 = vmul.f32 %v2140_v44, %v4628_v20 }
 0x804   :  { %v4669_v13 = vadd.f32 %v2143_v10, %v2142_v6 }
 0x806   :  { %3700 = vtanh.f32 %v4669_v13 }
 0x80c   :  { %v3701_v31 = vpop.eup %3700 }
 0x80d   :  { %v2148_v35 = vmul.f32 %v3701_v31, %v2146_v19 }
 0x80f   :  { %v2149_v63 = vpack.c.bf16 %v2148_v35, %v2148_v35 }
 0x811   :  { %v2151_v39 = vshll.u32 %v2149_v63, 16  ;;  %2166 = vmatmul.bf16.vlgmr.msra.gmra.mxu1 %v2149_v63  ;;  %2179 = vmatmul.bf16.vlgmr.msra.gmra.mxu2 %v2149_v63 }
 0x812   :  { %2192 = vmatmul.bf16.vlgmr.msra.gmra.mxu3 %v2149_v63  ;;  %2205 = vmatmul.bf16.vlgmr.msrb.gmra.mxu0 %v2149_v63 }
 0x813   :  { %v2155_v3 = vsel %vm4233_vm1, %v2151_v39, %v2154_v34  ;;  %2370 = vmatpush.bf16.msra.mxu1 %v4442_v54  ;;  %2383 = vmatpush.bf16.msra.mxu2 %v4444_v4 }
 0x814   :  { %2156 = vst [vmem:[#allocation2] sm:$0x1] %v2155_v3  ;;  %2396 = vmatpush.bf16.msra.mxu3 %v4446_v60  ;;  %2409 = vmatpush.bf16.msrb.mxu0 %v4450_v11 }
 0x817   :  { %2371 = vmatpush.bf16.msra.mxu1 %v4454_v25  ;;  %2384 = vmatpush.bf16.msra.mxu2 %v4457_v33 }
 0x818   :  { %2397 = vmatpush.bf16.msra.mxu3 %v4460_v52  ;;  %2410 = vmatpush.bf16.msrb.mxu0 %v4462_v53 }
 0x81b   :  { %2372 = vmatpush.bf16.msra.mxu1 %v4467_v2  ;;  %2385 = vmatpush.bf16.msra.mxu2 %v4471_v18 }
 0x81c   :  { %2398 = vmatpush.bf16.msra.mxu3 %v4474_v26  ;;  %2411 = vmatpush.bf16.msrb.mxu0 %v4476_v46 }
 0x81f   :  { %2373 = vmatpush.bf16.msra.mxu1 %v4481_v16  ;;  %2386 = vmatpush.bf16.msra.mxu2 %v4483_v17 }
 0x820   :  { %2399 = vmatpush.bf16.msra.mxu3 %v4487_v51  ;;  %2412 = vmatpush.bf16.msrb.mxu0 %v4490_v45 }
 0x823   :  { %2374 = vmatpush.bf16.msra.mxu1 %v4496_v21  ;;  %2387 = vmatpush.bf16.msra.mxu2 %v4498_v38 }
 0x824   :  { %2400 = vmatpush.bf16.msra.mxu3 %v4502_v32  ;;  %2413 = vmatpush.bf16.msrb.mxu0 %v4505_v57 }
 0x827   :  { %2375 = vmatpush.bf16.msra.mxu1 %v4511_v22  ;;  %2388 = vmatpush.bf16.msra.mxu2 %v4513_v30 }
 0x828   :  { %2401 = vmatpush.bf16.msra.mxu3 %v4516_v40  ;;  %2414 = vmatpush.bf16.msrb.mxu0 %v4519_v9 }
 0x82b   :  { %2376 = vmatpush.bf16.msra.mxu1 %v4523_v42  ;;  %2389 = vmatpush.bf16.msra.mxu2 %v4525_v47 }
 0x82c   :  { %2402 = vmatpush.bf16.msra.mxu3 %v4528_v56  ;;  %2415 = vmatpush.bf16.msrb.mxu0 %v4531_v8 }
 0x82f   :  { %2377 = vmatpush.bf16.msra.mxu1 %v4536_v48  ;;  %2390 = vmatpush.bf16.msra.mxu2 %v4538_v59 }
 0x830   :  { %2403 = vmatpush.bf16.msra.mxu3 %v4541_v62  ;;  %2416 = vmatpush.bf16.msrb.mxu0 %v4544_v7 }
 0x88e   :  { %v2167_v49 = vpop.f32.mrf.mxu1 }
 0x88f   :  { %v2206_v20 = vpop.f32.mrf.mxu0 }
 0x890   :  { %v2216_v50 = vrot.slane %v2206_v20, 5 }
 0x894   :  { %v2180_v23 = vpop.f32.mrf.mxu2 }
 0x895   :  { %v2214_v36 = vrot.slane %v2180_v23, 7  ;;  %v2193_v37 = vpop.f32.mrf.mxu3 }
 0x896   :  { %v2215_v58 = vrot.slane %v2193_v37, 6  ;;  %v2169_v1 = vpop.f32.mrf.mxu1 }
 0x897   :  { %v2217_v24 = vsel %vm681_vm3, %v2167_v49, %v2214_v36  ;;  %v2208_v5 = vpop.f32.mrf.mxu0 }
 0x898   :  { %v2218_v27 = vsel %vm683_vm4, %v2215_v58, %v2216_v50 }
 0x899   :  { %v2219_v41 = vsel %vm685_vm5, %v2217_v24, %v2218_v27 }
 0x89a   :  { %v2221_v43 = vadd.f32 %v2219_v41, %v2157_v28 }
 0x89c   :  { %v3432_v44 = vmul.f32 -1.442695, %v2221_v43  ;;  %v2182_v61 = vpop.f32.mrf.mxu2  ;;  %v2242_v63 = vrot.slane %v2221_v43, 3 }
 0x89d   :  { %v2195_v6 = vpop.f32.mrf.mxu3  ;;  %v2259_v61 = vld [vmem:[#allocation2] sm:$0x2] }
 0x89e   :  { %3702 = vpow2.f32 %v3432_v44 }
 0x8a4   :  { %v3703_v10 = vpop.eup %3702 }
 0x8a5   :  { %v2225_v19 = vadd.f32 1.0, %v3703_v10 }
 0x8a7   :  { %3704 = vrcp.f32 %v2225_v19  ;;  %v2237_v34 = vand.u32 2147483648, %v2225_v19  ;;  %v2235_v49 = vand.u32 2147483647, %v2225_v19  ;;  %vm2231_vm15 = vweird.f32 %v2225_v19 }
 0x8a8   :  { %3706 = vtanh.f32 %v2242_v63 }
 0x8a9   :  { %v2238_v23 = vor.u32 1.1754944e-38, %v2237_v34  ;;  %vm2236_vm11 = vcmp.eq.f32.partialorder %v2235_v49, 8.507059e+37 }
 0x8ad   :  { %v3705_v31 = vpop.eup %3704 }
 0x8ae   :  { %v2227_v35 = vmul.f32 %v3705_v31, %v2225_v19  ;;  %vm2232_vm1 = vweird.f32 %v3705_v31  ;;  %v3707_v58 = vpop.eup %3706 }
 0x8af   :  { %vm2233_vm0 = vmor %vm2231_vm15, %vm2232_vm1 }
 0x8b0   :  { %v2228_v39 = vsub.f32 1.0, %v2227_v35 }
 0x8b2   :  { %v2229_v3 = vmul.f32 %v3705_v31, %v2228_v39 }
 0x8b4   :  { %v2230_v20 = vadd.f32 %v3705_v31, %v2229_v3 }
 0x8b6   :  { %v2234_v36 = vsel %vm2233_vm0, %v3705_v31, %v2230_v20  ;;  %v2262_v20 = vld [vmem:[#allocation3 + $0x3] ss:$8 sm:$0xf] }
 0x8b7   :  { %v2239_v37 = vsel %vm2236_vm11, %v2238_v23, %v2234_v36 }
 0x8b8   :  { %v2246_v50 = vrot.slane %v2239_v37, 1  ;;  %v2249_v24 = vmul.f32 %v3707_v58, %v2239_v37  ;;  %v2252_v27 = vrot.slane %v2239_v37, 2 }
 0x8ba   :  { %v2248_v1 = vmul.f32 %v2246_v50, %v4669_v13 }
 0x8bc   :  { %v4710_v5 = vadd.f32 %v2249_v24, %v2248_v1 }
 0x8be   :  { %3708 = vtanh.f32 %v4710_v5 }
 0x8c4   :  { %v3709_v28 = vpop.eup %3708 }
 0x8c5   :  { %v2254_v41 = vmul.f32 %v3709_v28, %v2252_v27 }
 0x8c7   :  { %v2255_v43 = vpack.c.bf16 %v2254_v41, %v2254_v41 }
 0x8c9   :  { %v2257_v44 = vrot.slane %v2255_v43, 7  ;;  %2271 = vmatmul.bf16.vlgmr.msrb.gmra.mxu1 %v2255_v43  ;;  %2284 = vmatmul.bf16.vlgmr.msrb.gmra.mxu2 %v2255_v43 }
 0x8ca   :  { %2297 = vmatmul.bf16.vlgmr.msrb.gmra.mxu3 %v2255_v43  ;;  %2310 = vmatmul.bf16.vlgmr.msra.gmra.mxu0 %v2255_v43 }
 0x8cb   :  { %v2260_v6 = vsel %vm4279_vm12, %v2257_v44, %v2259_v61  ;;  %2475 = vmatpush.bf16.msrb.mxu1 %v4442_v54  ;;  %2488 = vmatpush.bf16.msrb.mxu2 %v4444_v4 }
 0x8cc   :  { %2261 = vst [vmem:[#allocation2] sm:$0x2] %v2260_v6  ;;  %2501 = vmatpush.bf16.msrb.mxu3 %v4446_v60  ;;  %2514 = vmatpush.bf16.msra.mxu0 %v4450_v11 }
 0x8cf   :  { %2476 = vmatpush.bf16.msrb.mxu1 %v4454_v25  ;;  %2489 = vmatpush.bf16.msrb.mxu2 %v4457_v33 }
 0x8d0   :  { %2502 = vmatpush.bf16.msrb.mxu3 %v4460_v52  ;;  %2515 = vmatpush.bf16.msra.mxu0 %v4462_v53 }
 0x8d3   :  { %2477 = vmatpush.bf16.msrb.mxu1 %v4467_v2  ;;  %2490 = vmatpush.bf16.msrb.mxu2 %v4471_v18 }
 0x8d4   :  { %2503 = vmatpush.bf16.msrb.mxu3 %v4474_v26  ;;  %2516 = vmatpush.bf16.msra.mxu0 %v4476_v46 }
 0x8d7   :  { %2478 = vmatpush.bf16.msrb.mxu1 %v4481_v16  ;;  %2491 = vmatpush.bf16.msrb.mxu2 %v4483_v17 }
 0x8d8   :  { %2504 = vmatpush.bf16.msrb.mxu3 %v4487_v51  ;;  %2517 = vmatpush.bf16.msra.mxu0 %v4490_v45 }
 0x8db   :  { %2479 = vmatpush.bf16.msrb.mxu1 %v4496_v21  ;;  %2492 = vmatpush.bf16.msrb.mxu2 %v4498_v38 }
 0x8dc   :  { %2505 = vmatpush.bf16.msrb.mxu3 %v4502_v32  ;;  %2518 = vmatpush.bf16.msra.mxu0 %v4505_v57 }
 0x8df   :  { %2480 = vmatpush.bf16.msrb.mxu1 %v4511_v22  ;;  %2493 = vmatpush.bf16.msrb.mxu2 %v4513_v30 }
 0x8e0   :  { %2506 = vmatpush.bf16.msrb.mxu3 %v4516_v40  ;;  %2519 = vmatpush.bf16.msra.mxu0 %v4519_v9 }
 0x8e3   :  { %2481 = vmatpush.bf16.msrb.mxu1 %v4523_v42  ;;  %2494 = vmatpush.bf16.msrb.mxu2 %v4525_v47 }
 0x8e4   :  { %2507 = vmatpush.bf16.msrb.mxu3 %v4528_v56  ;;  %2520 = vmatpush.bf16.msra.mxu0 %v4531_v8 }
 0x8e7   :  { %2482 = vmatpush.bf16.msrb.mxu1 %v4536_v48  ;;  %2495 = vmatpush.bf16.msrb.mxu2 %v4538_v59 }
 0x8e8   :  { %2508 = vmatpush.bf16.msrb.mxu3 %v4541_v62  ;;  %2521 = vmatpush.bf16.msra.mxu0 %v4544_v7 }
 0x946   :  { %v2272_v15 = vpop.f32.mrf.mxu1 }
 0x947   :  { %v2311_v13 = vpop.f32.mrf.mxu0 }
 0x948   :  { %v2321_v35 = vrot.slane %v2311_v13, 5 }
 0x94c   :  { %v2285_v10 = vpop.f32.mrf.mxu2 }
 0x94d   :  { %v2319_v19 = vrot.slane %v2285_v10, 7  ;;  %v2298_v31 = vpop.f32.mrf.mxu3 }
 0x94e   :  { %v2320_v63 = vrot.slane %v2298_v31, 6  ;;  %v2274_v39 = vpop.f32.mrf.mxu1 }
 0x94f   :  { %v2322_v34 = vsel %vm681_vm3, %v2272_v15, %v2319_v19  ;;  %v2313_v3 = vpop.f32.mrf.mxu0 }
 0x950   :  { %v2323_v49 = vsel %vm683_vm4, %v2320_v63, %v2321_v35 }
 0x951   :  { %v2324_v23 = vsel %vm685_vm5, %v2322_v34, %v2323_v49 }
 0x952   :  { %v2326_v36 = vadd.f32 %v2324_v23, %v2262_v20 }
 0x954   :  { %v3433_v37 = vmul.f32 -1.442695, %v2326_v36  ;;  %v2287_v50 = vpop.f32.mrf.mxu2  ;;  %v2347_v41 = vrot.slane %v2326_v36, 3 }
 0x955   :  { %v2300_v58 = vpop.f32.mrf.mxu3 }
 0x956   :  { %3710 = vpow2.f32 %v3433_v37 }
 0x95c   :  { %v3711_v1 = vpop.eup %3710 }
 0x95d   :  { %v2330_v24 = vadd.f32 1.0, %v3711_v1 }
 0x95f   :  { %3712 = vrcp.f32 %v2330_v24  ;;  %v2342_v44 = vand.u32 2147483648, %v2330_v24  ;;  %v2340_v6 = vand.u32 2147483647, %v2330_v24  ;;  %vm2336_vm7 = vweird.f32 %v2330_v24 }
 0x960   :  { %3714 = vtanh.f32 %v2347_v41 }
 0x961   :  { %v2343_v13 = vor.u32 1.1754944e-38, %v2342_v44  ;;  %vm2341_vm13 = vcmp.eq.f32.partialorder %v2340_v6, 8.507059e+37 }
 0x965   :  { %v3713_v27 = vpop.eup %3712 }
 0x966   :  { %v2332_v28 = vmul.f32 %v3713_v27, %v2330_v24  ;;  %vm2337_vm12 = vweird.f32 %v3713_v27  ;;  %v3715_v35 = vpop.eup %3714 }
 0x967   :  { %vm2338_vm2 = vmor %vm2336_vm7, %vm2337_vm12 }
 0x968   :  { %v2333_v43 = vsub.f32 1.0, %v2332_v28 }
 0x96a   :  { %v2334_v61 = vmul.f32 %v3713_v27, %v2333_v43 }
 0x96c   :  { %v2335_v15 = vadd.f32 %v3713_v27, %v2334_v61 }
 0x96e   :  { %v2339_v10 = vsel %vm2338_vm2, %v3713_v27, %v2335_v15  ;;  %v2369_v15 = vld [vmem:[#allocation3 + $0x4] ss:$8 sm:$0xf] }
 0x96f   :  { %v2344_v19 = vsel %vm2341_vm13, %v2343_v13, %v2339_v10 }
 0x970   :  { %v2351_v31 = vrot.slane %v2344_v19, 1  ;;  %v2354_v39 = vmul.f32 %v3715_v35, %v2344_v19  ;;  %v2357_v3 = vrot.slane %v2344_v19, 2 }
 0x972   :  { %v2353_v63 = vmul.f32 %v2351_v31, %v4710_v5  ;;  %v2366_v5 = vld [vmem:[#allocation2] sm:$0x2] }
 0x974   :  { %v4751_v34 = vadd.f32 %v2354_v39, %v2353_v63 }
 0x976   :  { %3716 = vtanh.f32 %v4751_v34 }
 0x97c   :  { %v3717_v49 = vpop.eup %3716 }
 0x97d   :  { %v2359_v20 = vmul.f32 %v3717_v49, %v2357_v3 }
 0x97f   :  { %v2360_v23 = vpack.c.bf16 %v2359_v20, %v2359_v20 }
 0x981   :  { %v2362_v36 = vshll.u32 %v2360_v23, 16  ;;  %2378 = vmatmul.bf16.vlgmr.msra.gmra.mxu1 %v2360_v23  ;;  %2391 = vmatmul.bf16.vlgmr.msra.gmra.mxu2 %v2360_v23 }
 0x982   :  { %2404 = vmatmul.bf16.vlgmr.msra.gmra.mxu3 %v2360_v23  ;;  %2417 = vmatmul.bf16.vlgmr.msrb.gmra.mxu0 %v2360_v23 }
 0x983   :  { %v2364_v37 = vrot.slane %v2362_v36, 7  ;;  %2582 = vmatpush.bf16.msra.mxu1 %v4442_v54  ;;  %2595 = vmatpush.bf16.msra.mxu2 %v4444_v4 }
 0x984   :  { %2608 = vmatpush.bf16.msra.mxu3 %v4446_v60  ;;  %2621 = vmatpush.bf16.msrb.mxu0 %v4450_v11 }
 0x985   :  { %v2367_v50 = vsel %vm4325_vm6, %v2364_v37, %v2366_v5 }
 0x986   :  { %2368 = vst [vmem:[#allocation2] sm:$0x2] %v2367_v50 }
 0x987   :  { %2583 = vmatpush.bf16.msra.mxu1 %v4454_v25  ;;  %2596 = vmatpush.bf16.msra.mxu2 %v4457_v33 }
 0x988   :  { %2609 = vmatpush.bf16.msra.mxu3 %v4460_v52  ;;  %2622 = vmatpush.bf16.msrb.mxu0 %v4462_v53 }
 0x98b   :  { %2584 = vmatpush.bf16.msra.mxu1 %v4467_v2  ;;  %2597 = vmatpush.bf16.msra.mxu2 %v4471_v18 }
 0x98c   :  { %2610 = vmatpush.bf16.msra.mxu3 %v4474_v26  ;;  %2623 = vmatpush.bf16.msrb.mxu0 %v4476_v46 }
 0x98f   :  { %2585 = vmatpush.bf16.msra.mxu1 %v4481_v16  ;;  %2598 = vmatpush.bf16.msra.mxu2 %v4483_v17 }
 0x990   :  { %2611 = vmatpush.bf16.msra.mxu3 %v4487_v51  ;;  %2624 = vmatpush.bf16.msrb.mxu0 %v4490_v45 }
 0x993   :  { %2586 = vmatpush.bf16.msra.mxu1 %v4496_v21  ;;  %2599 = vmatpush.bf16.msra.mxu2 %v4498_v38 }
 0x994   :  { %2612 = vmatpush.bf16.msra.mxu3 %v4502_v32  ;;  %2625 = vmatpush.bf16.msrb.mxu0 %v4505_v57 }
 0x997   :  { %2587 = vmatpush.bf16.msra.mxu1 %v4511_v22  ;;  %2600 = vmatpush.bf16.msra.mxu2 %v4513_v30 }
 0x998   :  { %2613 = vmatpush.bf16.msra.mxu3 %v4516_v40  ;;  %2626 = vmatpush.bf16.msrb.mxu0 %v4519_v9 }
 0x99b   :  { %2588 = vmatpush.bf16.msra.mxu1 %v4523_v42  ;;  %2601 = vmatpush.bf16.msra.mxu2 %v4525_v47 }
 0x99c   :  { %2614 = vmatpush.bf16.msra.mxu3 %v4528_v56  ;;  %2627 = vmatpush.bf16.msrb.mxu0 %v4531_v8 }
 0x99f   :  { %2589 = vmatpush.bf16.msra.mxu1 %v4536_v48  ;;  %2602 = vmatpush.bf16.msra.mxu2 %v4538_v59 }
 0x9a0   :  { %2615 = vmatpush.bf16.msra.mxu3 %v4541_v62  ;;  %2628 = vmatpush.bf16.msrb.mxu0 %v4544_v7 }
 0x9fe   :  { %v2379_v12 = vpop.f32.mrf.mxu1 }
 0x9ff   :  { %v2418_v58 = vpop.f32.mrf.mxu0 }
 0xa00   :  { %v2428_v28 = vrot.slane %v2418_v58, 5 }
 0xa04   :  { %v2392_v1 = vpop.f32.mrf.mxu2 }
 0xa05   :  { %v2426_v24 = vrot.slane %v2392_v1, 7  ;;  %v2405_v27 = vpop.f32.mrf.mxu3 }
 0xa06   :  { %v2427_v41 = vrot.slane %v2405_v27, 6  ;;  %v2381_v43 = vpop.f32.mrf.mxu1 }
 0xa07   :  { %v2429_v44 = vsel %vm681_vm3, %v2379_v12, %v2426_v24  ;;  %v2420_v61 = vpop.f32.mrf.mxu0 }
 0xa08   :  { %v2430_v6 = vsel %vm683_vm4, %v2427_v41, %v2428_v28 }
 0xa09   :  { %v2431_v13 = vsel %vm685_vm5, %v2429_v44, %v2430_v6 }
 0xa0a   :  { %v2433_v10 = vadd.f32 %v2431_v13, %v2369_v15 }
 0xa0c   :  { %v3434_v19 = vmul.f32 -1.442695, %v2433_v10  ;;  %v2394_v31 = vpop.f32.mrf.mxu2  ;;  %v2454_v20 = vrot.slane %v2433_v10, 3  ;;  %v2471_v10 = vld [vmem:[#allocation2] sm:$0x4] }
 0xa0d   :  { %v2407_v35 = vpop.f32.mrf.mxu3 }
 0xa0e   :  { %3718 = vpow2.f32 %v3434_v19 }
 0xa14   :  { %v3719_v63 = vpop.eup %3718 }
 0xa15   :  { %v2437_v39 = vadd.f32 1.0, %v3719_v63 }
 0xa17   :  { %3720 = vrcp.f32 %v2437_v39  ;;  %v2449_v36 = vand.u32 2147483648, %v2437_v39  ;;  %v2447_v5 = vand.u32 2147483647, %v2437_v39  ;;  %vm2443_vm1 = vweird.f32 %v2437_v39 }
 0xa18   :  { %3722 = vtanh.f32 %v2454_v20 }
 0xa19   :  { %v2450_v12 = vor.u32 1.1754944e-38, %v2449_v36  ;;  %vm2448_vm0 = vcmp.eq.f32.partialorder %v2447_v5, 8.507059e+37 }
 0xa1d   :  { %v3721_v3 = vpop.eup %3720 }
 0xa1e   :  { %v2439_v49 = vmul.f32 %v3721_v3, %v2437_v39  ;;  %vm2444_vm6 = vweird.f32 %v3721_v3  ;;  %v3723_v27 = vpop.eup %3722 }
 0xa1f   :  { %vm2445_vm15 = vmor %vm2443_vm1, %vm2444_vm6 }
 0xa20   :  { %v2440_v23 = vsub.f32 1.0, %v2439_v49 }
 0xa22   :  { %v2441_v37 = vmul.f32 %v3721_v3, %v2440_v23 }
 0xa24   :  { %v2442_v50 = vadd.f32 %v3721_v3, %v2441_v37 }
 0xa26   :  { %v2446_v58 = vsel %vm2445_vm15, %v3721_v3, %v2442_v50 }
 0xa27   :  { %v2451_v1 = vsel %vm2448_vm0, %v2450_v12, %v2446_v58 }
 0xa28   :  { %v2458_v24 = vrot.slane %v2451_v1, 1  ;;  %v2461_v41 = vmul.f32 %v3723_v27, %v2451_v1  ;;  %v2464_v44 = vrot.slane %v2451_v1, 2 }
 0xa2a   :  { %v2460_v28 = vmul.f32 %v2458_v24, %v4751_v34 }
 0xa2c   :  { %v4792_v43 = vadd.f32 %v2461_v41, %v2460_v28 }
 0xa2e   :  { %3724 = vtanh.f32 %v4792_v43 }
 0xa34   :  { %v3725_v61 = vpop.eup %3724 }
 0xa35   :  { %v2466_v6 = vmul.f32 %v3725_v61, %v2464_v44  ;;  %v2581_v44 = vld [vmem:[#allocation3 + $0x6] ss:$8 sm:$0xf] }
 0xa37   :  { %v2467_v15 = vpack.c.bf16 %v2466_v6, %v2466_v6 }
 0xa39   :  { %v2469_v13 = vrot.slane %v2467_v15, 6  ;;  %2483 = vmatmul.bf16.vlgmr.msrb.gmra.mxu1 %v2467_v15  ;;  %2496 = vmatmul.bf16.vlgmr.msrb.gmra.mxu2 %v2467_v15 }
 0xa3a   :  { %2509 = vmatmul.bf16.vlgmr.msrb.gmra.mxu3 %v2467_v15  ;;  %2522 = vmatmul.bf16.vlgmr.msra.gmra.mxu0 %v2467_v15 }
 0xa3b   :  { %v2472_v19 = vsel %vm4371_vm14, %v2469_v13, %v2471_v10  ;;  %2687 = vmatpush.bf16.msrb.mxu1 %v4442_v54  ;;  %2700 = vmatpush.bf16.msrb.mxu2 %v4444_v4 }
 0xa3c   :  { %2473 = vst [vmem:[#allocation2] sm:$0x4] %v2472_v19  ;;  %2713 = vmatpush.bf16.msrb.mxu3 %v4446_v60  ;;  %2726 = vmatpush.bf16.msra.mxu0 %v4450_v11 }
 0xa3f   :  { %2688 = vmatpush.bf16.msrb.mxu1 %v4454_v25  ;;  %2701 = vmatpush.bf16.msrb.mxu2 %v4457_v33 }
 0xa40   :  { %2714 = vmatpush.bf16.msrb.mxu3 %v4460_v52  ;;  %2727 = vmatpush.bf16.msra.mxu0 %v4462_v53 }
 0xa43   :  { %2689 = vmatpush.bf16.msrb.mxu1 %v4467_v2  ;;  %2702 = vmatpush.bf16.msrb.mxu2 %v4471_v18  ;;  %v2578_v23 = vld [vmem:[#allocation2] sm:$0x4] }
 0xa44   :  { %2715 = vmatpush.bf16.msrb.mxu3 %v4474_v26  ;;  %2728 = vmatpush.bf16.msra.mxu0 %v4476_v46  ;;  %v2474_v26 = vld [vmem:[#allocation3 + $0x5] ss:$8 sm:$0xf] }
 0xa47   :  { %2690 = vmatpush.bf16.msrb.mxu1 %v4481_v16  ;;  %2703 = vmatpush.bf16.msrb.mxu2 %v4483_v17 }
 0xa48   :  { %2716 = vmatpush.bf16.msrb.mxu3 %v4487_v51  ;;  %2729 = vmatpush.bf16.msra.mxu0 %v4490_v45 }
 0xa4b   :  { %2691 = vmatpush.bf16.msrb.mxu1 %v4496_v21  ;;  %2704 = vmatpush.bf16.msrb.mxu2 %v4498_v38 }
 0xa4c   :  { %2717 = vmatpush.bf16.msrb.mxu3 %v4502_v32  ;;  %2730 = vmatpush.bf16.msra.mxu0 %v4505_v57 }
 0xa4f   :  { %2692 = vmatpush.bf16.msrb.mxu1 %v4511_v22  ;;  %2705 = vmatpush.bf16.msrb.mxu2 %v4513_v30 }
 0xa50   :  { %2718 = vmatpush.bf16.msrb.mxu3 %v4516_v40  ;;  %2731 = vmatpush.bf16.msra.mxu0 %v4519_v9 }
 0xa53   :  { %2693 = vmatpush.bf16.msrb.mxu1 %v4523_v42  ;;  %2706 = vmatpush.bf16.msrb.mxu2 %v4525_v47 }
 0xa54   :  { %2719 = vmatpush.bf16.msrb.mxu3 %v4528_v56  ;;  %2732 = vmatpush.bf16.msra.mxu0 %v4531_v8 }
 0xa57   :  { %2694 = vmatpush.bf16.msrb.mxu1 %v4536_v48  ;;  %2707 = vmatpush.bf16.msrb.mxu2 %v4538_v59 }
 0xa58   :  { %2720 = vmatpush.bf16.msrb.mxu3 %v4541_v62  ;;  %2733 = vmatpush.bf16.msra.mxu0 %v4544_v7 }
 0xab6   :  { %v2484_v29 = vpop.f32.mrf.mxu1 }
 0xab7   :  { %v2523_v54 = vpop.f32.mrf.mxu0 }
 0xab8   :  { %v2533_v25 = vrot.slane %v2523_v54, 5 }
 0xabc   :  { %v2497_v4 = vpop.f32.mrf.mxu2 }
 0xabd   :  { %v2531_v60 = vrot.slane %v2497_v4, 7  ;;  %v2510_v11 = vpop.f32.mrf.mxu3 }
 0xabe   :  { %v2532_v33 = vrot.slane %v2510_v11, 6  ;;  %v2486_v52 = vpop.f32.mrf.mxu1 }
 0xabf   :  { %v2534_v53 = vsel %vm681_vm3, %v2484_v29, %v2531_v60  ;;  %v2525_v2 = vpop.f32.mrf.mxu0 }
 0xac0   :  { %v2535_v18 = vsel %vm683_vm4, %v2532_v33, %v2533_v25 }
 0xac1   :  { %v2536_v46 = vsel %vm685_vm5, %v2534_v53, %v2535_v18 }
 0xac2   :  { %v2538_v16 = vadd.f32 %v2536_v46, %v2474_v26 }
 0xac4   :  { %v3435_v17 = vmul.f32 -1.442695, %v2538_v16  ;;  %v2499_v51 = vpop.f32.mrf.mxu2  ;;  %v2559_v22 = vrot.slane %v2538_v16, 3 }
 0xac5   :  { %v2512_v45 = vpop.f32.mrf.mxu3 }
 0xac6   :  { %3726 = vpow2.f32 %v3435_v17 }
 0xacc   :  { %v3727_v21 = vpop.eup %3726 }
 0xacd   :  { %v2542_v38 = vadd.f32 1.0, %v3727_v21 }
 0xacf   :  { %3728 = vrcp.f32 %v2542_v38  ;;  %v2554_v40 = vand.u32 2147483648, %v2542_v38  ;;  %v2552_v42 = vand.u32 2147483647, %v2542_v38  ;;  %vm2548_vm11 = vweird.f32 %v2542_v38 }
 0xad0   :  { %3730 = vtanh.f32 %v2559_v22  ;;  %v2683_v22 = vld [vmem:[#allocation2] sm:$0x8] }
 0xad1   :  { %v2555_v56 = vor.u32 1.1754944e-38, %v2554_v40  ;;  %vm2553_vm7 = vcmp.eq.f32.partialorder %v2552_v42, 8.507059e+37 }
 0xad5   :  { %v3729_v32 = vpop.eup %3728 }
 0xad6   :  { %v2544_v57 = vmul.f32 %v3729_v32, %v2542_v38  ;;  %vm2549_vm14 = vweird.f32 %v3729_v32  ;;  %v3731_v62 = vpop.eup %3730 }
 0xad7   :  { %vm2550_vm12 = vmor %vm2548_vm11, %vm2549_vm14 }
 0xad8   :  { %v2545_v30 = vsub.f32 1.0, %v2544_v57 }
 0xada   :  { %v2546_v9 = vmul.f32 %v3729_v32, %v2545_v30 }
 0xadc   :  { %v2547_v47 = vadd.f32 %v3729_v32, %v2546_v9 }
 0xade   :  { %v2551_v8 = vsel %vm2550_vm12, %v3729_v32, %v2547_v47 }
 0xadf   :  { %v2556_v48 = vsel %vm2553_vm7, %v2555_v56, %v2551_v8 }
 0xae0   :  { %v2563_v59 = vrot.slane %v2556_v48, 1  ;;  %v2566_v34 = vmul.f32 %v3731_v62, %v2556_v48  ;;  %v2569_v35 = vrot.slane %v2556_v48, 2 }
 0xae2   :  { %v2565_v7 = vmul.f32 %v2563_v59, %v4792_v43 }
 0xae4   :  { %v2567_v31 = vadd.f32 %v2566_v34, %v2565_v7 }
 0xae6   :  { %3732 = vtanh.f32 %v2567_v31 }
 0xaec   :  { %v3733_v63 = vpop.eup %3732 }
 0xaed   :  { %v2571_v39 = vmul.f32 %v3733_v63, %v2569_v35 }
 0xaef   :  { %v2572_v3 = vpack.c.bf16 %v2571_v39, %v2571_v39 }
 0xaf1   :  { %v2574_v49 = vshll.u32 %v2572_v3, 16  ;;  %2590 = vmatmul.bf16.vlgmr.msra.gmra.mxu1 %v2572_v3  ;;  %2603 = vmatmul.bf16.vlgmr.msra.gmra.mxu2 %v2572_v3 }
 0xaf2   :  { %2616 = vmatmul.bf16.vlgmr.msra.gmra.mxu3 %v2572_v3  ;;  %2629 = vmatmul.bf16.vlgmr.msrb.gmra.mxu0 %v2572_v3 }
 0xaf3   :  { %v2576_v20 = vrot.slane %v2574_v49, 6  ;;  %v3607_v49 = vld [vmem:[#allocation13 + $0x38] sm:$0xff] }
 0xaf4   :  { %2867 = vmatpush.bf16.msra.mxu1 %v3607_v49 }
 0xaf5   :  { %v2579_v36 = vsel %vm4414_vm9, %v2576_v20, %v2578_v23  ;;  %v3606_v20 = vld [vmem:[#allocation13 + $0x30] sm:$0xff] }
 0xaf6   :  { %2580 = vst [vmem:[#allocation2] sm:$0x4] %v2579_v36 }
 0xaf8   :  { %2868 = vmatpush.bf16.msra.mxu1 %v3606_v20 }
 0xb6e   :  { %v2591_v37 = vpop.f32.mrf.mxu1 }
 0xb6f   :  { %v2630_v5 = vpop.f32.mrf.mxu0 }
 0xb70   :  { %v2640_v1 = vrot.slane %v2630_v5, 5  ;;  %v3604_v5 = vld [vmem:[#allocation13 + $0x20] sm:$0xff] }
 0xb74   :  { %v2604_v50 = vpop.f32.mrf.mxu2 }
 0xb75   :  { %v2638_v12 = vrot.slane %v2604_v50, 7  ;;  %v2617_v58 = vpop.f32.mrf.mxu3 }
 0xb76   :  { %v2639_v24 = vrot.slane %v2617_v58, 6  ;;  %v2593_v27 = vpop.f32.mrf.mxu1 }
 0xb77   :  { %v2641_v28 = vsel %vm681_vm3, %v2591_v37, %v2638_v12  ;;  %v2632_v41 = vpop.f32.mrf.mxu0  ;;  %v3605_v37 = vld [vmem:[#allocation13 + $0x28] sm:$0xff]  ;;  %v3603_v12 = vld [vmem:[#allocation13 + $0x18] sm:$0xff] }
 0xb78   :  { %v2642_v43 = vsel %vm683_vm4, %v2639_v24, %v2640_v1  ;;  %2869 = vmatpush.bf16.msra.mxu1 %v3605_v37  ;;  %v3602_v24 = vld [vmem:[#allocation13 + $0x10] sm:$0xff] }
 0xb79   :  { %v2643_v61 = vsel %vm685_vm5, %v2641_v28, %v2642_v43 }
 0xb7a   :  { %v2645_v6 = vadd.f32 %v2643_v61, %v2581_v44  ;;  %v3601_v44 = vld [vmem:[#allocation13 + $0x8] sm:$0xff] }
 0xb7c   :  { %v3436_v55 = vmul.f32 -1.442695, %v2645_v6  ;;  %v2606_v15 = vpop.f32.mrf.mxu2  ;;  %v2666_v4 = vrot.slane %v2645_v6, 3  ;;  %2870 = vmatpush.bf16.msra.mxu1 %v3604_v5 }
 0xb7d   :  { %v2619_v13 = vpop.f32.mrf.mxu3 }
 0xb7e   :  { %3734 = vpow2.f32 %v3436_v55  ;;  %v3600_v13 = vld [vmem:[#allocation13] sm:$0xff] }
 0xb80   :  { %2871 = vmatpush.bf16.msra.mxu1 %v3603_v12 }
 0xb84   :  { %v3735_v10 = vpop.eup %3734  ;;  %2872 = vmatpush.bf16.msra.mxu1 %v3602_v24 }
 0xb85   :  { %v2649_v19 = vadd.f32 1.0, %v3735_v10 }
 0xb87   :  { %3736 = vrcp.f32 %v2649_v19  ;;  %v2661_v11 = vand.u32 2147483648, %v2649_v19  ;;  %v2659_v33 = vand.u32 2147483647, %v2649_v19  ;;  %vm2655_vm2 = vweird.f32 %v2649_v19 }
 0xb88   :  { %3738 = vtanh.f32 %v2666_v4  ;;  %2873 = vmatpush.bf16.msra.mxu1 %v3601_v44 }
 0xb89   :  { %v2662_v53 = vor.u32 1.1754944e-38, %v2661_v11  ;;  %vm2660_vm6 = vcmp.eq.f32.partialorder %v2659_v33, 8.507059e+37 }
 0xb8c   :  { %2874 = vmatpush.bf16.msra.mxu1 %v3600_v13 }
 0xb8d   :  { %v3737_v29 = vpop.eup %3736 }
 0xb8e   :  { %v2651_v54 = vmul.f32 %v3737_v29, %v2649_v19  ;;  %vm2656_vm9 = vweird.f32 %v3737_v29  ;;  %v3739_v46 = vpop.eup %3738 }
 0xb8f   :  { %vm2657_vm13 = vmor %vm2655_vm2, %vm2656_vm9 }
 0xb90   :  { %v2652_v60 = vsub.f32 1.0, %v2651_v54 }
 0xb92   :  { %v2653_v25 = vmul.f32 %v3737_v29, %v2652_v60 }
 0xb94   :  { %v2654_v52 = vadd.f32 %v3737_v29, %v2653_v25 }
 0xb96   :  { %v2658_v2 = vsel %vm2657_vm13, %v3737_v29, %v2654_v52 }
 0xb97   :  { %v2663_v18 = vsel %vm2660_vm6, %v2662_v53, %v2658_v2 }
 0xb98   :  { %v2670_v26 = vrot.slane %v2663_v18, 1  ;;  %v2673_v17 = vmul.f32 %v3739_v46, %v2663_v18  ;;  %v2676_v45 = vrot.slane %v2663_v18, 2 }
 0xb9a   :  { %v2672_v16 = vmul.f32 %v2670_v26, %v2567_v31  ;;  %v2686_v31 = vld [vmem:[#allocation3 + $0x7] ss:$8 sm:$0xf] }
 0xb9c   :  { %v4838_v51 = vadd.f32 %v2673_v17, %v2672_v16 }
 0xb9e   :  { %3740 = vtanh.f32 %v4838_v51 }
 0xba4   :  { %v3741_v21 = vpop.eup %3740 }
 0xba5   :  { %v2678_v38 = vmul.f32 %v3741_v21, %v2676_v45  ;;  %v3621_v45 = vld [vmem:[%s4862_s7] ss:$0 sm:$0xff] }
 0xba7   :  { %v2679_v32 = vpack.c.bf16 %v2678_v38, %v2678_v38 }
 0xba9   :  { %v2681_v57 = vrot.slane %v2679_v32, 5  ;;  %2695 = vmatmul.bf16.vlgmr.msrb.gmra.mxu1 %v2679_v32  ;;  %2708 = vmatmul.bf16.vlgmr.msrb.gmra.mxu2 %v2679_v32 }
 0xbaa   :  { %2721 = vmatmul.bf16.vlgmr.msrb.gmra.mxu3 %v2679_v32  ;;  %2734 = vmatmul.bf16.vlgmr.msra.gmra.mxu0 %v2679_v32 }
 0xbab   :  { %v2684_v30 = vsel %vm4427_vm8, %v2681_v57, %v2683_v22 }
 0xbac   :  { %2685 = vst [vmem:[#allocation2] sm:$0x8] %v2684_v30 }
 0xbb3   :  { %v2790_v2 = vld [vmem:[#allocation2] sm:$0x8] }
 0xc26   :  { %v2696_v40 = vpop.f32.mrf.mxu1 }
 0xc27   :  { %v2735_v9 = vpop.f32.mrf.mxu0 }
 0xc28   :  { %v2745_v8 = vrot.slane %v2735_v9, 5 }
 0xc2c   :  { %v2709_v42 = vpop.f32.mrf.mxu2 }
 0xc2d   :  { %v2743_v47 = vrot.slane %v2709_v42, 7  ;;  %v2722_v56 = vpop.f32.mrf.mxu3 }
 0xc2e   :  { %v2744_v48 = vrot.slane %v2722_v56, 6  ;;  %v2698_v59 = vpop.f32.mrf.mxu1 }
 0xc2f   :  { %v2746_v62 = vsel %vm681_vm3, %v2696_v40, %v2743_v47  ;;  %v2737_v7 = vpop.f32.mrf.mxu0 }
 0xc30   :  { %v2747_v34 = vsel %vm683_vm4, %v2744_v48, %v2745_v8 }
 0xc31   :  { %v2748_v35 = vsel %vm685_vm5, %v2746_v62, %v2747_v34 }
 0xc32   :  { %v2750_v63 = vadd.f32 %v2748_v35, %v2686_v31 }
 0xc34   :  { %v3437_v0 = vmul.f32 -1.442695, %v2750_v63  ;;  %v2711_v39 = vpop.f32.mrf.mxu2  ;;  %v2771_v1 = vrot.slane %v2750_v63, 3 }
 0xc35   :  { %v2724_v3 = vpop.f32.mrf.mxu3 }
 0xc36   :  { %3742 = vpow2.f32 %v3437_v0 }
 0xc3c   :  { %v3743_v23 = vpop.eup %3742 }
 0xc3d   :  { %v2754_v36 = vadd.f32 1.0, %v3743_v23 }
 0xc3f   :  { %3744 = vrcp.f32 %v2754_v36  ;;  %v2766_v28 = vand.u32 2147483648, %v2754_v36  ;;  %v2764_v43 = vand.u32 2147483647, %v2754_v36  ;;  %vm2760_vm4 = vweird.f32 %v2754_v36 }
 0xc40   :  { %3746 = vtanh.f32 %v2771_v1 }
 0xc41   :  { %v2767_v6 = vor.u32 1.1754944e-38, %v2766_v28  ;;  %vm2765_vm8 = vcmp.eq.f32.partialorder %v2764_v43, 8.507059e+37 }
 0xc45   :  { %v3745_v50 = vpop.eup %3744 }
 0xc46   :  { %v2756_v58 = vmul.f32 %v3745_v50, %v2754_v36  ;;  %vm2761_vm3 = vweird.f32 %v3745_v50  ;;  %v3747_v19 = vpop.eup %3746 }
 0xc47   :  { %vm2762_vm5 = vmor %vm2760_vm4, %vm2761_vm3 }
 0xc48   :  { %v2757_v27 = vsub.f32 1.0, %v2756_v58 }
 0xc4a   :  { %v2758_v41 = vmul.f32 %v3745_v50, %v2757_v27 }
 0xc4c   :  { %v2759_v61 = vadd.f32 %v3745_v50, %v2758_v41 }
 0xc4e   :  { %v2763_v55 = vsel %vm2762_vm5, %v3745_v50, %v2759_v61 }
 0xc4f   :  { %v2768_v15 = vsel %vm2765_vm8, %v2767_v6, %v2763_v55 }
 0xc50   :  { %v2775_v10 = vrot.slane %v2768_v15, 1  ;;  %v2778_v54 = vmul.f32 %v3747_v19, %v2768_v15  ;;  %v2781_v60 = vrot.slane %v2768_v15, 2 }
 0xc52   :  { %v2777_v29 = vmul.f32 %v2775_v10, %v4838_v51 }
 0xc54   :  { %v2779_v4 = vadd.f32 %v2778_v54, %v2777_v29 }
 0xc56   :  { %3748 = vtanh.f32 %v2779_v4 }
 0xc5c   :  { %v3749_v11 = vpop.eup %3748 }
 0xc5d   :  { %v2783_v25 = vmul.f32 %v3749_v11, %v2781_v60 }
 0xc5f   :  { %v2784_v33 = vpack.c.bf16 %v2783_v25, %v2783_v25 }
 0xc61   :  { %v2786_v52 = vshll.u32 %v2784_v33, 16 }
 0xc63   :  { %v2788_v53 = vrot.slane %v2786_v52, 5 }
 0xc65   :  { %v2791_v18 = vsel %vm4551_vm10, %v2788_v53, %v2790_v2 }
 0xc66   :  { %2792 = vst [vmem:[#allocation2] sm:$0x8] %v2791_v18 }
 0xc6d   :  { %v2793_v26 = vld [vmem:[#allocation2] sm:$0xf] }
 0xc6e   :  { %v2794_v46 = vunpack.c.l.bf16 %v2793_v26 }
 0xc70   :  { %vm2795_vm1 = vcmp.gt.f32.partialorder %v2794_v46, 0.0  ;;  %v2796_v16 = vmul.f32 0.01, %v2794_v46 }
 0xc72   :  { %v2797_v17 = vsel %vm2795_vm1, %v2794_v46, %v2796_v16 }
 0xc73   :  { %v2798_v51 = vpack.c.bf16 %v2797_v17, %v2797_v17 }
 0xc75   :  { %2875 = vmatmul.bf16.vlgmr.msra.gmra.mxu1 %v2798_v51 }
 0xcf2   :  { %v2876_v14 = vpop.f32.mrf.mxu1 }
 0xcf3   :  { %v2877_v21 = vadd.f32 %v3621_v45, %v2876_v14 }
 0xcf5   :  { %2880 = vst [vmem:[#allocation15] sm:$0xff] %v2877_v21 }
 0xcf6   :  { %2891 = dma.vmem_to_hbm [thread:$0]  %s2887_s15, 128, %s2889_s1, [#allocation6]  }
 0xcfa   :  { %v2878_v38 = vpop.f32.mrf.mxu1 }
 0xcfb   :  { %3926 = dma.done.wait [#allocation6], 128  }
 0xcfc   :  { %3927 = vsyncadd [#allocation6], 4294967168 }
 0xcfd   :  { %2896 = vsyncpa [#allocation5], 1 }
 0xcfe   :  { %2897 = vsyncpa [#allocation8], 1 }
 0xcff   :  { %2898 = vsyncpa [#allocation11], 1 }
 0xd00   :  { %2899 = vsyncpa [#allocation14], 1 }
 0xd01   :  { %2900 = vsyncpa [#allocation6], 1 }

</bundles_post_ra>
